<compile_context>
chip_gen: v7x
topology: tpu7x:2x2x1
jax: 0.10.0
libtpu: 0.0.40
codegen_flags: <defaults>
</compile_context>

<pallas_src>
import functools

import jax
import jax.numpy as jnp
from jax import lax
from jax.experimental import pallas as pl
from jax.experimental.pallas import tpu as pltpu  # noqa: F401  (kept for TPU backend import)


# ----------------------------------------------------------------------------
# Fused-gate LSTM cell step.  Gate order along the 4H axis is (i, f, o, g).
# ----------------------------------------------------------------------------
def _lstm_step(gate_in, h, c, w_hh, H):
    pre = gate_in + jnp.dot(h, w_hh, preferred_element_type=jnp.float32)   # [B, 4H]
    sig = jax.nn.sigmoid(pre[:, : 3 * H])     # i | f | o  in one EUP pass
    g_t = jnp.tanh(pre[:, 3 * H:])            # g          in one EUP pass
    i_t = sig[:, :H]
    f_t = sig[:, H:2 * H]
    o_t = sig[:, 2 * H:3 * H]
    c_new = f_t * c + i_t * g_t
    h_new = o_t * jnp.tanh(c_new)
    return h_new, c_new


# ----------------------------------------------------------------------------
# Fused kernel
# ----------------------------------------------------------------------------
def _lstm_vae_kernel(
    # inputs
    x_ref, eps_ref,                # x is time-major [T_in, B, F]
    e1_wih, e1_whh, e1_b,          # encoder LSTM1 (F -> 2E), fused gates
    e2_wih, e2_whh, e2_b,          # encoder LSTM2 (2E -> E)
    w_mulv, b_mulv,                # merged mu|logvar head  [E, 2L], [1, 2L]
    d1_wih, d1_whh, d1_b,          # decoder LSTM1 (L -> E)
    d2_wih, d2_whh, d2_b,          # decoder LSTM2 (E -> 2E)
    w_head, b_head,                # merged par1|par2|par3 head [2E, out+2*Nf], [1, out+2*Nf]
    # outputs (2 lane-packed stores)
    mulv_ref, head_ref,
    *, seq_out, latent_dim, output_size, nf_lognorm,
):
    T_in, B, F = x_ref.shape
    H1 = e1_whh.shape[0]           # 2 * embedding_dim
    E = e2_whh.shape[0]            # embedding_dim
    L = latent_dim

    # ---------------- Encoder ----------------
    # Hoisted layer-1 input projection (one big M = T*B matmul), time-major.
    x_flat = x_ref[...].reshape(T_in * B, F)
    xp = (jnp.dot(x_flat, e1_wih[...], preferred_element_type=jnp.float32)
          + e1_b[...]).reshape(T_in, B, 4 * H1)

    w1hh = e1_whh[...]
    w2ih = e2_wih[...]
    w2hh = e2_whh[...]
    b2 = e2_b[...]

    h1 = jnp.zeros((B, H1), jnp.float32); c1 = jnp.zeros((B, H1), jnp.float32)
    h2 = jnp.zeros((B, E), jnp.float32);  c2 = jnp.zeros((B, E), jnp.float32)

    # Wavefront over the two stacked encoder LSTMs (fully unrolled: T_in = 8).
    for t in range(T_in):
        h1, c1 = _lstm_step(xp[t], h1, c1, w1hh, H1)
        gin2 = jnp.dot(h1, w2ih, preferred_element_type=jnp.float32) + b2
        h2, c2 = _lstm_step(gin2, h2, c2, w2hh, E)

    # ---------------- mu | logvar (merged) + reparameterization (vanilla KLD) ----
    mulv = jnp.dot(h2, w_mulv[...], preferred_element_type=jnp.float32) + b_mulv[...]
    mulv_ref[...] = mulv                                      # single [B, 2L] store
    mu = mulv[:, :L]
    logvar = mulv[:, L:2 * L]
    z = mu + eps_ref[...] * jnp.exp(0.5 * logvar)             # [B, L]

    # ---------------- Decoder ----------------
    # z is constant over time: its fused-gate projection is computed exactly once.
    zp = jnp.dot(z, d1_wih[...], preferred_element_type=jnp.float32) + d1_b[...]
    w3hh = d1_whh[...]
    w4ih = d2_wih[...]
    w4hh = d2_whh[...]
    b4 = d2_b[...]

    h3 = jnp.zeros((B, E), jnp.float32);  c3 = jnp.zeros((B, E), jnp.float32)
    h4 = jnp.zeros((B, H1), jnp.float32); c4 = jnp.zeros((B, H1), jnp.float32)

    # Wavefront over the two stacked decoder LSTMs; keep h4_t live in vregs.
    h4_steps = []
    for t in range(seq_out):
        h3, c3 = _lstm_step(zp, h3, c3, w3hh, E)
        gin4 = jnp.dot(h3, w4ih, preferred_element_type=jnp.float32) + b4
        h4, c4 = _lstm_step(gin4, h4, c4, w4hh, H1)
        h4_steps.append(h4)

    # Time-major flat sequence [T_out*B, H1] (row order: t-major, b-minor).
    h4_seq = jnp.concatenate(h4_steps, axis=0)

    # ---------------- Merged decoder heads + fused activations ----------------
    raw = (jnp.dot(h4_seq, w_head[...], preferred_element_type=jnp.float32)
           + b_head[...])                                      # [T_out*B, out+2*Nf]
    a1 = raw[:, :output_size]
    a2 = raw[:, output_size:output_size + nf_lognorm]
    a3 = raw[:, output_size + nf_lognorm:output_size + 2 * nf_lognorm]
    p2 = 1.0 + 5e-3 + jnp.where(a2 > 0, a2, a2 * lax.rsqrt(1.0 + a2 * a2))   # ISRLU
    p3 = 0.5 * (1.0 + 0.999 * jnp.tanh(a3))                                  # ClippedTanh

    # Single lane-packed store; par1/2/3 split happens in the wrapper.
    head_ref[...] = jnp.concatenate([a1, p2, p3], axis=1).reshape(
        seq_out, B, output_size + 2 * nf_lognorm)


# ----------------------------------------------------------------------------
# Wrapper
# ----------------------------------------------------------------------------
def lstm_vae_forward(params, cfg, x, eps_key):
    B = x.shape[0]
    T_in, T_out = cfg["seq_in"], cfg["seq_out"]
    L = cfg["latent_dim"]
    out, nf = cfg["output_size"], cfg["Nf_lognorm"]
    d_head = out + 2 * nf

    eps = jax.random.normal(eps_key, (B, L), jnp.float32)
    # Wrapper-side layout plumbing: time-major input so the per-step fetch in
    # the kernel is a contiguous leading-axis block.
    x_tm = jnp.transpose(x.astype(jnp.float32), (1, 0, 2))        # [T_in, B, F]

    kernel = functools.partial(
        _lstm_vae_kernel,
        seq_out=T_out, latent_dim=L, output_size=out, nf_lognorm=nf,
    )

    args = (
        x_tm, eps,
        *params["enc_lstm1"], *params["enc_lstm2"],
        *params["mulogvar"],
        *params["dec_lstm1"], *params["dec_lstm2"],
        *params["heads"],
    )

    mulv, head_tm = pl.pallas_call(
        kernel,
        out_shape=(
            jax.ShapeDtypeStruct((B, 2 * L), jnp.float32),
            jax.ShapeDtypeStruct((T_out, B, d_head), jnp.float32),
        ),
    )(*args)

    mu = mulv[:, :L]
    logvar = mulv[:, L:]
    head = jnp.transpose(head_tm, (1, 0, 2))                      # [B, T_out, d_head]
    p1 = head[:, :, :out]
    p2 = head[:, :, out:out + nf]
    p3 = head[:, :, out + nf:out + 2 * nf]
    return x, mu, logvar, (p1, p2, p3)


# ----------------------------------------------------------------------------
# Parameter construction (shapes mirror the PyTorch module; deterministic)
# ----------------------------------------------------------------------------
_GATE_ORDER = (0, 1, 3, 2)  # PyTorch (i, f, g, o) -> kernel fused order (i, f, o, g)


def _lstm_params(key, d_in, hidden):
    """nn.LSTM default init U(-1/sqrt(H), 1/sqrt(H)); stored gate-fused:
    w_ih [d_in, 4H], w_hh [H, 4H], b [1, 4H] with b = b_ih + b_hh, gate order i|f|o|g."""
    k1, k2, k3, k4 = jax.random.split(key, 4)
    s = 1.0 / jnp.sqrt(hidden)
    w_ih = jax.random.uniform(k1, (4 * hidden, d_in), jnp.float32, -s, s)
    w_hh = jax.random.uniform(k2, (4 * hidden, hidden), jnp.float32, -s, s)
    b_ih = jax.random.uniform(k3, (4 * hidden,), jnp.float32, -s, s)
    b_hh = jax.random.uniform(k4, (4 * hidden,), jnp.float32, -s, s)
    order = jnp.array(_GATE_ORDER)

    def fuse(w, din):
        w4 = w.reshape(4, hidden, din)[order]                   # (4, H, din) reordered
        return jnp.transpose(w4, (2, 0, 1)).reshape(din, 4 * hidden)

    w_ih_f = fuse(w_ih, d_in)
    w_hh_f = fuse(w_hh, hidden)
    b_f = (b_ih + b_hh).reshape(4, hidden)[order].reshape(1, 4 * hidden)
    return (w_ih_f, w_hh_f, b_f)


def _merged_linear_params(keys, d_in, d_outs):
    """kaiming_normal_ (std=sqrt(2/fan_in)) per head, zero bias; heads concatenated."""
    std = jnp.sqrt(2.0 / d_in)
    ws = [jax.random.normal(k, (d_in, d), jnp.float32) * std for k, d in zip(keys, d_outs)]
    w = jnp.concatenate(ws, axis=1)
    b = jnp.zeros((1, int(sum(d_outs))), jnp.float32)
    return (w, b)


def make_params(key, *, seq_in, seq_out, no_features, output_size,
                embedding_dim, latent_dim, Nf_lognorm):
    hidden = 2 * embedding_dim
    ks = jax.random.split(key, 9)
    params = {
        # Encoder: LSTMenc(no_features -> hidden), LSTM1(hidden -> embedding_dim)
        "enc_lstm1": _lstm_params(ks[0], no_features, hidden),
        "enc_lstm2": _lstm_params(ks[1], hidden, embedding_dim),
        "mulogvar": _merged_linear_params(ks[2:4], embedding_dim, (latent_dim, latent_dim)),
        # Decoder: LSTMdec(latent_dim -> embedding_dim), LSTM1(embedding_dim -> hidden)
        "dec_lstm1": _lstm_params(ks[4], latent_dim, embedding_dim),
        "dec_lstm2": _lstm_params(ks[5], embedding_dim, hidden),
        "heads": _merged_linear_params(ks[6:9], hidden, (output_size, Nf_lognorm, Nf_lognorm)),
    }
    cfg = dict(seq_in=seq_in, seq_out=seq_out, no_features=no_features,
               output_size=output_size, embedding_dim=embedding_dim,
               latent_dim=latent_dim, Nf_lognorm=Nf_lognorm, hidden=hidden)
    return params, cfg


# ----------------------------------------------------------------------------
if __name__ == "__main__":
    B = 2
    seq_in = 8
    seq_out = 8
    no_features = 4
    output_size = 4
    embedding_dim = 16      # hidden_size = 32
    latent_dim = 8
    Nf_lognorm = 4          # decoder uses Nf_lognorm == output_size (as in Decoder_vae)

    root = jax.random.PRNGKey(0)
    k_x, k_eps, k_params = jax.random.split(root, 3)

    x = jax.random.normal(k_x, (B, seq_in, no_features), jnp.float32)

    params, cfg = make_params(
        k_params,
        seq_in=seq_in, seq_out=seq_out, no_features=no_features,
        output_size=output_size, embedding_dim=embedding_dim,
        latent_dim=latent_dim, Nf_lognorm=Nf_lognorm,
    )

    x_out, mu, logvar, (par1, par2, par3) = lstm_vae_forward(params, cfg, x, k_eps)
    jax.block_until_ready((x_out, mu, logvar, par1, par2, par3))

    assert x_out.shape == (B, seq_in, no_features)
    assert mu.shape == (B, latent_dim) and logvar.shape == (B, latent_dim)
    assert par1.shape == (B, seq_out, output_size)
    assert par2.shape == (B, seq_out, Nf_lognorm)
    assert par3.shape == (B, seq_out, Nf_lognorm)
    assert bool(jnp.all(jnp.isfinite(par1)))
    assert bool(jnp.all(jnp.isfinite(mu))) and bool(jnp.all(jnp.isfinite(logvar)))
    # act2 output > 1 - tiny, act3 output in (0, 1)
    assert bool(jnp.all(par2 > 0.0)) and bool(jnp.all(par3 > 0.0)) and bool(jnp.all(par3 < 1.0))

    print("KERNEL_OK")
</pallas_src>

<mosaic_0001>
module attributes {stable_mosaic.version = 11 : i64} {
  func.func @_lstm_vae_kernel(%arg0: memref<8x2x4xf32, #tpu.memory_space<vmem>>, %arg1: memref<2x8xf32, #tpu.memory_space<vmem>>, %arg2: memref<4x128xf32, #tpu.memory_space<vmem>>, %arg3: memref<32x128xf32, #tpu.memory_space<vmem>>, %arg4: memref<1x128xf32, #tpu.memory_space<vmem>>, %arg5: memref<32x64xf32, #tpu.memory_space<vmem>>, %arg6: memref<16x64xf32, #tpu.memory_space<vmem>>, %arg7: memref<1x64xf32, #tpu.memory_space<vmem>>, %arg8: memref<16x16xf32, #tpu.memory_space<vmem>>, %arg9: memref<1x16xf32, #tpu.memory_space<vmem>>, %arg10: memref<8x64xf32, #tpu.memory_space<vmem>>, %arg11: memref<16x64xf32, #tpu.memory_space<vmem>>, %arg12: memref<1x64xf32, #tpu.memory_space<vmem>>, %arg13: memref<16x128xf32, #tpu.memory_space<vmem>>, %arg14: memref<32x128xf32, #tpu.memory_space<vmem>>, %arg15: memref<1x128xf32, #tpu.memory_space<vmem>>, %arg16: memref<32x12xf32, #tpu.memory_space<vmem>>, %arg17: memref<1x12xf32, #tpu.memory_space<vmem>>, %arg18: memref<2x16xf32, #tpu.memory_space<vmem>>, %arg19: memref<8x2x12xf32, #tpu.memory_space<vmem>>) attributes {dimension_semantics = [], scalar_prefetch = 0 : i64, scratch_operands = 0 : i64, tpu.core_type = #tpu.core_type<tc>} {
    %c0 = arith.constant 0 : index
    %c0_0 = arith.constant 0 : index
    %c0_1 = arith.constant 0 : index
    %0 = vector.load %arg0[%c0, %c0_0, %c0_1] : memref<8x2x4xf32, #tpu.memory_space<vmem>>, vector<8x2x4xf32>
    %1 = vector.shape_cast %0 : vector<8x2x4xf32> to vector<16x4xf32>
    %c0_2 = arith.constant 0 : index
    %c0_3 = arith.constant 0 : index
    %2 = vector.load %arg2[%c0_2, %c0_3] : memref<4x128xf32, #tpu.memory_space<vmem>>, vector<4x128xf32>
    %cst = arith.constant dense<0.000000e+00> : vector<16x128xf32>
    %3 = tpu.matmul %1, %2, %cst {dimension_numbers = #tpu.dot_dimension_numbers<[1], [0], [0], [1], [0, 0, 1, 1], [], []>} : vector<16x4xf32>, vector<4x128xf32>, vector<16x128xf32> -> vector<16x128xf32>
    %c0_4 = arith.constant 0 : index
    %c0_5 = arith.constant 0 : index
    %4 = vector.load %arg4[%c0_4, %c0_5] : memref<1x128xf32, #tpu.memory_space<vmem>>, vector<1x128xf32>
    %5 = vector.broadcast %4 : vector<1x128xf32> to vector<16x128xf32>
    %6 = arith.addf %3, %5 : vector<16x128xf32>
    %7 = vector.shape_cast %6 : vector<16x128xf32> to vector<8x2x128xf32>
    %c0_6 = arith.constant 0 : index
    %c0_7 = arith.constant 0 : index
    %8 = vector.load %arg3[%c0_6, %c0_7] : memref<32x128xf32, #tpu.memory_space<vmem>>, vector<32x128xf32>
    %c0_8 = arith.constant 0 : index
    %c0_9 = arith.constant 0 : index
    %9 = vector.load %arg5[%c0_8, %c0_9] : memref<32x64xf32, #tpu.memory_space<vmem>>, vector<32x64xf32>
    %c0_10 = arith.constant 0 : index
    %c0_11 = arith.constant 0 : index
    %10 = vector.load %arg6[%c0_10, %c0_11] : memref<16x64xf32, #tpu.memory_space<vmem>>, vector<16x64xf32>
    %c0_12 = arith.constant 0 : index
    %c0_13 = arith.constant 0 : index
    %11 = vector.load %arg7[%c0_12, %c0_13] : memref<1x64xf32, #tpu.memory_space<vmem>>, vector<1x64xf32>
    %cst_14 = arith.constant 0.000000e+00 : f32
    %12 = vector.broadcast %cst_14 : f32 to vector<2x32xf32>
    %cst_15 = arith.constant 0.000000e+00 : f32
    %13 = vector.broadcast %cst_15 : f32 to vector<2x32xf32>
    %cst_16 = arith.constant 0.000000e+00 : f32
    %14 = vector.broadcast %cst_16 : f32 to vector<2x16xf32>
    %cst_17 = arith.constant 0.000000e+00 : f32
    %15 = vector.broadcast %cst_17 : f32 to vector<2x16xf32>
    %16 = vector.extract_strided_slice %7 {offsets = [0, 0, 0], sizes = [1, 2, 128], strides = [1, 1, 1]} : vector<8x2x128xf32> to vector<1x2x128xf32>
    %17 = vector.shape_cast %16 : vector<1x2x128xf32> to vector<2x128xf32>
    %cst_18 = arith.constant dense<0.000000e+00> : vector<2x128xf32>
    %18 = tpu.matmul %12, %8, %cst_18 {dimension_numbers = #tpu.dot_dimension_numbers<[1], [0], [0], [1], [0, 0, 1, 1], [], []>} : vector<2x32xf32>, vector<32x128xf32>, vector<2x128xf32> -> vector<2x128xf32>
    %19 = arith.addf %17, %18 : vector<2x128xf32>
    %20 = vector.extract_strided_slice %19 {offsets = [0, 0], sizes = [2, 96], strides = [1, 1]} : vector<2x128xf32> to vector<2x96xf32>
    %21 = arith.negf %20 : vector<2x96xf32>
    %22 = math.exp %21 : vector<2x96xf32>
    %cst_19 = arith.constant 1.000000e+00 : f32
    %23 = vector.broadcast %cst_19 : f32 to vector<2x96xf32>
    %24 = arith.addf %23, %22 : vector<2x96xf32>
    %25 = arith.divf %23, %24 : vector<2x96xf32>
    %26 = vector.extract_strided_slice %19 {offsets = [0, 96], sizes = [2, 32], strides = [1, 1]} : vector<2x128xf32> to vector<2x32xf32>
    %27 = math.tanh %26 : vector<2x32xf32>
    %28 = vector.extract_strided_slice %25 {offsets = [0, 0], sizes = [2, 32], strides = [1, 1]} : vector<2x96xf32> to vector<2x32xf32>
    %29 = vector.extract_strided_slice %25 {offsets = [0, 32], sizes = [2, 32], strides = [1, 1]} : vector<2x96xf32> to vector<2x32xf32>
    %30 = vector.extract_strided_slice %25 {offsets = [0, 64], sizes = [2, 32], strides = [1, 1]} : vector<2x96xf32> to vector<2x32xf32>
    %31 = arith.mulf %29, %13 : vector<2x32xf32>
    %32 = arith.mulf %28, %27 : vector<2x32xf32>
    %33 = arith.addf %31, %32 : vector<2x32xf32>
    %34 = math.tanh %33 : vector<2x32xf32>
    %35 = arith.mulf %30, %34 : vector<2x32xf32>
    %cst_20 = arith.constant dense<0.000000e+00> : vector<2x64xf32>
    %36 = tpu.matmul %35, %9, %cst_20 {dimension_numbers = #tpu.dot_dimension_numbers<[1], [0], [0], [1], [0, 0, 1, 1], [], []>} : vector<2x32xf32>, vector<32x64xf32>, vector<2x64xf32> -> vector<2x64xf32>
    %37 = vector.broadcast %11 : vector<1x64xf32> to vector<2x64xf32>
    %38 = arith.addf %36, %37 : vector<2x64xf32>
    %cst_21 = arith.constant dense<0.000000e+00> : vector<2x64xf32>
    %39 = tpu.matmul %14, %10, %cst_21 {dimension_numbers = #tpu.dot_dimension_numbers<[1], [0], [0], [1], [0, 0, 1, 1], [], []>} : vector<2x16xf32>, vector<16x64xf32>, vector<2x64xf32> -> vector<2x64xf32>
    %40 = arith.addf %38, %39 : vector<2x64xf32>
    %41 = vector.extract_strided_slice %40 {offsets = [0, 0], sizes = [2, 48], strides = [1, 1]} : vector<2x64xf32> to vector<2x48xf32>
    %42 = arith.negf %41 : vector<2x48xf32>
    %43 = math.exp %42 : vector<2x48xf32>
    %cst_22 = arith.constant 1.000000e+00 : f32
    %44 = vector.broadcast %cst_22 : f32 to vector<2x48xf32>
    %45 = arith.addf %44, %43 : vector<2x48xf32>
    %46 = arith.divf %44, %45 : vector<2x48xf32>
    %47 = vector.extract_strided_slice %40 {offsets = [0, 48], sizes = [2, 16], strides = [1, 1]} : vector<2x64xf32> to vector<2x16xf32>
    %48 = math.tanh %47 : vector<2x16xf32>
    %49 = vector.extract_strided_slice %46 {offsets = [0, 0], sizes = [2, 16], strides = [1, 1]} : vector<2x48xf32> to vector<2x16xf32>
    %50 = vector.extract_strided_slice %46 {offsets = [0, 16], sizes = [2, 16], strides = [1, 1]} : vector<2x48xf32> to vector<2x16xf32>
    %51 = vector.extract_strided_slice %46 {offsets = [0, 32], sizes = [2, 16], strides = [1, 1]} : vector<2x48xf32> to vector<2x16xf32>
    %52 = arith.mulf %50, %15 : vector<2x16xf32>
    %53 = arith.mulf %49, %48 : vector<2x16xf32>
    %54 = arith.addf %52, %53 : vector<2x16xf32>
    %55 = math.tanh %54 : vector<2x16xf32>
    %56 = arith.mulf %51, %55 : vector<2x16xf32>
    %57 = vector.extract_strided_slice %7 {offsets = [1, 0, 0], sizes = [1, 2, 128], strides = [1, 1, 1]} : vector<8x2x128xf32> to vector<1x2x128xf32>
    %58 = vector.shape_cast %57 : vector<1x2x128xf32> to vector<2x128xf32>
    %cst_23 = arith.constant dense<0.000000e+00> : vector<2x128xf32>
    %59 = tpu.matmul %35, %8, %cst_23 {dimension_numbers = #tpu.dot_dimension_numbers<[1], [0], [0], [1], [0, 0, 1, 1], [], []>} : vector<2x32xf32>, vector<32x128xf32>, vector<2x128xf32> -> vector<2x128xf32>
    %60 = arith.addf %58, %59 : vector<2x128xf32>
    %61 = vector.extract_strided_slice %60 {offsets = [0, 0], sizes = [2, 96], strides = [1, 1]} : vector<2x128xf32> to vector<2x96xf32>
    %62 = arith.negf %61 : vector<2x96xf32>
    %63 = math.exp %62 : vector<2x96xf32>
    %cst_24 = arith.constant 1.000000e+00 : f32
    %64 = vector.broadcast %cst_24 : f32 to vector<2x96xf32>
    %65 = arith.addf %64, %63 : vector<2x96xf32>
    %66 = arith.divf %64, %65 : vector<2x96xf32>
    %67 = vector.extract_strided_slice %60 {offsets = [0, 96], sizes = [2, 32], strides = [1, 1]} : vector<2x128xf32> to vector<2x32xf32>
    %68 = math.tanh %67 : vector<2x32xf32>
    %69 = vector.extract_strided_slice %66 {offsets = [0, 0], sizes = [2, 32], strides = [1, 1]} : vector<2x96xf32> to vector<2x32xf32>
    %70 = vector.extract_strided_slice %66 {offsets = [0, 32], sizes = [2, 32], strides = [1, 1]} : vector<2x96xf32> to vector<2x32xf32>
    %71 = vector.extract_strided_slice %66 {offsets = [0, 64], sizes = [2, 32], strides = [1, 1]} : vector<2x96xf32> to vector<2x32xf32>
    %72 = arith.mulf %70, %33 : vector<2x32xf32>
    %73 = arith.mulf %69, %68 : vector<2x32xf32>
    %74 = arith.addf %72, %73 : vector<2x32xf32>
    %75 = math.tanh %74 : vector<2x32xf32>
    %76 = arith.mulf %71, %75 : vector<2x32xf32>
    %cst_25 = arith.constant dense<0.000000e+00> : vector<2x64xf32>
    %77 = tpu.matmul %76, %9, %cst_25 {dimension_numbers = #tpu.dot_dimension_numbers<[1], [0], [0], [1], [0, 0, 1, 1], [], []>} : vector<2x32xf32>, vector<32x64xf32>, vector<2x64xf32> -> vector<2x64xf32>
    %78 = vector.broadcast %11 : vector<1x64xf32> to vector<2x64xf32>
    %79 = arith.addf %77, %78 : vector<2x64xf32>
    %cst_26 = arith.constant dense<0.000000e+00> : vector<2x64xf32>
    %80 = tpu.matmul %56, %10, %cst_26 {dimension_numbers = #tpu.dot_dimension_numbers<[1], [0], [0], [1], [0, 0, 1, 1], [], []>} : vector<2x16xf32>, vector<16x64xf32>, vector<2x64xf32> -> vector<2x64xf32>
    %81 = arith.addf %79, %80 : vector<2x64xf32>
    %82 = vector.extract_strided_slice %81 {offsets = [0, 0], sizes = [2, 48], strides = [1, 1]} : vector<2x64xf32> to vector<2x48xf32>
    %83 = arith.negf %82 : vector<2x48xf32>
    %84 = math.exp %83 : vector<2x48xf32>
    %cst_27 = arith.constant 1.000000e+00 : f32
    %85 = vector.broadcast %cst_27 : f32 to vector<2x48xf32>
    %86 = arith.addf %85, %84 : vector<2x48xf32>
    %87 = arith.divf %85, %86 : vector<2x48xf32>
    %88 = vector.extract_strided_slice %81 {offsets = [0, 48], sizes = [2, 16], strides = [1, 1]} : vector<2x64xf32> to vector<2x16xf32>
    %89 = math.tanh %88 : vector<2x16xf32>
    %90 = vector.extract_strided_slice %87 {offsets = [0, 0], sizes = [2, 16], strides = [1, 1]} : vector<2x48xf32> to vector<2x16xf32>
    %91 = vector.extract_strided_slice %87 {offsets = [0, 16], sizes = [2, 16], strides = [1, 1]} : vector<2x48xf32> to vector<2x16xf32>
    %92 = vector.extract_strided_slice %87 {offsets = [0, 32], sizes = [2, 16], strides = [1, 1]} : vector<2x48xf32> to vector<2x16xf32>
    %93 = arith.mulf %91, %54 : vector<2x16xf32>
    %94 = arith.mulf %90, %89 : vector<2x16xf32>
    %95 = arith.addf %93, %94 : vector<2x16xf32>
    %96 = math.tanh %95 : vector<2x16xf32>
    %97 = arith.mulf %92, %96 : vector<2x16xf32>
    %98 = vector.extract_strided_slice %7 {offsets = [2, 0, 0], sizes = [1, 2, 128], strides = [1, 1, 1]} : vector<8x2x128xf32> to vector<1x2x128xf32>
    %99 = vector.shape_cast %98 : vector<1x2x128xf32> to vector<2x128xf32>
    %cst_28 = arith.constant dense<0.000000e+00> : vector<2x128xf32>
    %100 = tpu.matmul %76, %8, %cst_28 {dimension_numbers = #tpu.dot_dimension_numbers<[1], [0], [0], [1], [0, 0, 1, 1], [], []>} : vector<2x32xf32>, vector<32x128xf32>, vector<2x128xf32> -> vector<2x128xf32>
    %101 = arith.addf %99, %100 : vector<2x128xf32>
    %102 = vector.extract_strided_slice %101 {offsets = [0, 0], sizes = [2, 96], strides = [1, 1]} : vector<2x128xf32> to vector<2x96xf32>
    %103 = arith.negf %102 : vector<2x96xf32>
    %104 = math.exp %103 : vector<2x96xf32>
    %cst_29 = arith.constant 1.000000e+00 : f32
    %105 = vector.broadcast %cst_29 : f32 to vector<2x96xf32>
    %106 = arith.addf %105, %104 : vector<2x96xf32>
    %107 = arith.divf %105, %106 : vector<2x96xf32>
    %108 = vector.extract_strided_slice %101 {offsets = [0, 96], sizes = [2, 32], strides = [1, 1]} : vector<2x128xf32> to vector<2x32xf32>
    %109 = math.tanh %108 : vector<2x32xf32>
    %110 = vector.extract_strided_slice %107 {offsets = [0, 0], sizes = [2, 32], strides = [1, 1]} : vector<2x96xf32> to vector<2x32xf32>
    %111 = vector.extract_strided_slice %107 {offsets = [0, 32], sizes = [2, 32], strides = [1, 1]} : vector<2x96xf32> to vector<2x32xf32>
    %112 = vector.extract_strided_slice %107 {offsets = [0, 64], sizes = [2, 32], strides = [1, 1]} : vector<2x96xf32> to vector<2x32xf32>
    %113 = arith.mulf %111, %74 : vector<2x32xf32>
    %114 = arith.mulf %110, %109 : vector<2x32xf32>
    %115 = arith.addf %113, %114 : vector<2x32xf32>
    %116 = math.tanh %115 : vector<2x32xf32>
    %117 = arith.mulf %112, %116 : vector<2x32xf32>
    %cst_30 = arith.constant dense<0.000000e+00> : vector<2x64xf32>
    %118 = tpu.matmul %117, %9, %cst_30 {dimension_numbers = #tpu.dot_dimension_numbers<[1], [0], [0], [1], [0, 0, 1, 1], [], []>} : vector<2x32xf32>, vector<32x64xf32>, vector<2x64xf32> -> vector<2x64xf32>
    %119 = vector.broadcast %11 : vector<1x64xf32> to vector<2x64xf32>
    %120 = arith.addf %118, %119 : vector<2x64xf32>
    %cst_31 = arith.constant dense<0.000000e+00> : vector<2x64xf32>
    %121 = tpu.matmul %97, %10, %cst_31 {dimension_numbers = #tpu.dot_dimension_numbers<[1], [0], [0], [1], [0, 0, 1, 1], [], []>} : vector<2x16xf32>, vector<16x64xf32>, vector<2x64xf32> -> vector<2x64xf32>
    %122 = arith.addf %120, %121 : vector<2x64xf32>
    %123 = vector.extract_strided_slice %122 {offsets = [0, 0], sizes = [2, 48], strides = [1, 1]} : vector<2x64xf32> to vector<2x48xf32>
    %124 = arith.negf %123 : vector<2x48xf32>
    %125 = math.exp %124 : vector<2x48xf32>
    %cst_32 = arith.constant 1.000000e+00 : f32
    %126 = vector.broadcast %cst_32 : f32 to vector<2x48xf32>
    %127 = arith.addf %126, %125 : vector<2x48xf32>
    %128 = arith.divf %126, %127 : vector<2x48xf32>
    %129 = vector.extract_strided_slice %122 {offsets = [0, 48], sizes = [2, 16], strides = [1, 1]} : vector<2x64xf32> to vector<2x16xf32>
    %130 = math.tanh %129 : vector<2x16xf32>
    %131 = vector.extract_strided_slice %128 {offsets = [0, 0], sizes = [2, 16], strides = [1, 1]} : vector<2x48xf32> to vector<2x16xf32>
    %132 = vector.extract_strided_slice %128 {offsets = [0, 16], sizes = [2, 16], strides = [1, 1]} : vector<2x48xf32> to vector<2x16xf32>
    %133 = vector.extract_strided_slice %128 {offsets = [0, 32], sizes = [2, 16], strides = [1, 1]} : vector<2x48xf32> to vector<2x16xf32>
    %134 = arith.mulf %132, %95 : vector<2x16xf32>
    %135 = arith.mulf %131, %130 : vector<2x16xf32>
    %136 = arith.addf %134, %135 : vector<2x16xf32>
    %137 = math.tanh %136 : vector<2x16xf32>
    %138 = arith.mulf %133, %137 : vector<2x16xf32>
    %139 = vector.extract_strided_slice %7 {offsets = [3, 0, 0], sizes = [1, 2, 128], strides = [1, 1, 1]} : vector<8x2x128xf32> to vector<1x2x128xf32>
    %140 = vector.shape_cast %139 : vector<1x2x128xf32> to vector<2x128xf32>
    %cst_33 = arith.constant dense<0.000000e+00> : vector<2x128xf32>
    %141 = tpu.matmul %117, %8, %cst_33 {dimension_numbers = #tpu.dot_dimension_numbers<[1], [0], [0], [1], [0, 0, 1, 1], [], []>} : vector<2x32xf32>, vector<32x128xf32>, vector<2x128xf32> -> vector<2x128xf32>
    %142 = arith.addf %140, %141 : vector<2x128xf32>
    %143 = vector.extract_strided_slice %142 {offsets = [0, 0], sizes = [2, 96], strides = [1, 1]} : vector<2x128xf32> to vector<2x96xf32>
    %144 = arith.negf %143 : vector<2x96xf32>
    %145 = math.exp %144 : vector<2x96xf32>
    %cst_34 = arith.constant 1.000000e+00 : f32
    %146 = vector.broadcast %cst_34 : f32 to vector<2x96xf32>
    %147 = arith.addf %146, %145 : vector<2x96xf32>
    %148 = arith.divf %146, %147 : vector<2x96xf32>
    %149 = vector.extract_strided_slice %142 {offsets = [0, 96], sizes = [2, 32], strides = [1, 1]} : vector<2x128xf32> to vector<2x32xf32>
    %150 = math.tanh %149 : vector<2x32xf32>
    %151 = vector.extract_strided_slice %148 {offsets = [0, 0], sizes = [2, 32], strides = [1, 1]} : vector<2x96xf32> to vector<2x32xf32>
    %152 = vector.extract_strided_slice %148 {offsets = [0, 32], sizes = [2, 32], strides = [1, 1]} : vector<2x96xf32> to vector<2x32xf32>
    %153 = vector.extract_strided_slice %148 {offsets = [0, 64], sizes = [2, 32], strides = [1, 1]} : vector<2x96xf32> to vector<2x32xf32>
    %154 = arith.mulf %152, %115 : vector<2x32xf32>
    %155 = arith.mulf %151, %150 : vector<2x32xf32>
    %156 = arith.addf %154, %155 : vector<2x32xf32>
    %157 = math.tanh %156 : vector<2x32xf32>
    %158 = arith.mulf %153, %157 : vector<2x32xf32>
    %cst_35 = arith.constant dense<0.000000e+00> : vector<2x64xf32>
    %159 = tpu.matmul %158, %9, %cst_35 {dimension_numbers = #tpu.dot_dimension_numbers<[1], [0], [0], [1], [0, 0, 1, 1], [], []>} : vector<2x32xf32>, vector<32x64xf32>, vector<2x64xf32> -> vector<2x64xf32>
    %160 = vector.broadcast %11 : vector<1x64xf32> to vector<2x64xf32>
    %161 = arith.addf %159, %160 : vector<2x64xf32>
    %cst_36 = arith.constant dense<0.000000e+00> : vector<2x64xf32>
    %162 = tpu.matmul %138, %10, %cst_36 {dimension_numbers = #tpu.dot_dimension_numbers<[1], [0], [0], [1], [0, 0, 1, 1], [], []>} : vector<2x16xf32>, vector<16x64xf32>, vector<2x64xf32> -> vector<2x64xf32>
    %163 = arith.addf %161, %162 : vector<2x64xf32>
    %164 = vector.extract_strided_slice %163 {offsets = [0, 0], sizes = [2, 48], strides = [1, 1]} : vector<2x64xf32> to vector<2x48xf32>
    %165 = arith.negf %164 : vector<2x48xf32>
    %166 = math.exp %165 : vector<2x48xf32>
    %cst_37 = arith.constant 1.000000e+00 : f32
    %167 = vector.broadcast %cst_37 : f32 to vector<2x48xf32>
    %168 = arith.addf %167, %166 : vector<2x48xf32>
    %169 = arith.divf %167, %168 : vector<2x48xf32>
    %170 = vector.extract_strided_slice %163 {offsets = [0, 48], sizes = [2, 16], strides = [1, 1]} : vector<2x64xf32> to vector<2x16xf32>
    %171 = math.tanh %170 : vector<2x16xf32>
    %172 = vector.extract_strided_slice %169 {offsets = [0, 0], sizes = [2, 16], strides = [1, 1]} : vector<2x48xf32> to vector<2x16xf32>
    %173 = vector.extract_strided_slice %169 {offsets = [0, 16], sizes = [2, 16], strides = [1, 1]} : vector<2x48xf32> to vector<2x16xf32>
    %174 = vector.extract_strided_slice %169 {offsets = [0, 32], sizes = [2, 16], strides = [1, 1]} : vector<2x48xf32> to vector<2x16xf32>
    %175 = arith.mulf %173, %136 : vector<2x16xf32>
    %176 = arith.mulf %172, %171 : vector<2x16xf32>
    %177 = arith.addf %175, %176 : vector<2x16xf32>
    %178 = math.tanh %177 : vector<2x16xf32>
    %179 = arith.mulf %174, %178 : vector<2x16xf32>
    %180 = vector.extract_strided_slice %7 {offsets = [4, 0, 0], sizes = [1, 2, 128], strides = [1, 1, 1]} : vector<8x2x128xf32> to vector<1x2x128xf32>
    %181 = vector.shape_cast %180 : vector<1x2x128xf32> to vector<2x128xf32>
    %cst_38 = arith.constant dense<0.000000e+00> : vector<2x128xf32>
    %182 = tpu.matmul %158, %8, %cst_38 {dimension_numbers = #tpu.dot_dimension_numbers<[1], [0], [0], [1], [0, 0, 1, 1], [], []>} : vector<2x32xf32>, vector<32x128xf32>, vector<2x128xf32> -> vector<2x128xf32>
    %183 = arith.addf %181, %182 : vector<2x128xf32>
    %184 = vector.extract_strided_slice %183 {offsets = [0, 0], sizes = [2, 96], strides = [1, 1]} : vector<2x128xf32> to vector<2x96xf32>
    %185 = arith.negf %184 : vector<2x96xf32>
    %186 = math.exp %185 : vector<2x96xf32>
    %cst_39 = arith.constant 1.000000e+00 : f32
    %187 = vector.broadcast %cst_39 : f32 to vector<2x96xf32>
    %188 = arith.addf %187, %186 : vector<2x96xf32>
    %189 = arith.divf %187, %188 : vector<2x96xf32>
    %190 = vector.extract_strided_slice %183 {offsets = [0, 96], sizes = [2, 32], strides = [1, 1]} : vector<2x128xf32> to vector<2x32xf32>
    %191 = math.tanh %190 : vector<2x32xf32>
    %192 = vector.extract_strided_slice %189 {offsets = [0, 0], sizes = [2, 32], strides = [1, 1]} : vector<2x96xf32> to vector<2x32xf32>
    %193 = vector.extract_strided_slice %189 {offsets = [0, 32], sizes = [2, 32], strides = [1, 1]} : vector<2x96xf32> to vector<2x32xf32>
    %194 = vector.extract_strided_slice %189 {offsets = [0, 64], sizes = [2, 32], strides = [1, 1]} : vector<2x96xf32> to vector<2x32xf32>
    %195 = arith.mulf %193, %156 : vector<2x32xf32>
    %196 = arith.mulf %192, %191 : vector<2x32xf32>
    %197 = arith.addf %195, %196 : vector<2x32xf32>
    %198 = math.tanh %197 : vector<2x32xf32>
    %199 = arith.mulf %194, %198 : vector<2x32xf32>
    %cst_40 = arith.constant dense<0.000000e+00> : vector<2x64xf32>
    %200 = tpu.matmul %199, %9, %cst_40 {dimension_numbers = #tpu.dot_dimension_numbers<[1], [0], [0], [1], [0, 0, 1, 1], [], []>} : vector<2x32xf32>, vector<32x64xf32>, vector<2x64xf32> -> vector<2x64xf32>
    %201 = vector.broadcast %11 : vector<1x64xf32> to vector<2x64xf32>
    %202 = arith.addf %200, %201 : vector<2x64xf32>
    %cst_41 = arith.constant dense<0.000000e+00> : vector<2x64xf32>
    %203 = tpu.matmul %179, %10, %cst_41 {dimension_numbers = #tpu.dot_dimension_numbers<[1], [0], [0], [1], [0, 0, 1, 1], [], []>} : vector<2x16xf32>, vector<16x64xf32>, vector<2x64xf32> -> vector<2x64xf32>
    %204 = arith.addf %202, %203 : vector<2x64xf32>
    %205 = vector.extract_strided_slice %204 {offsets = [0, 0], sizes = [2, 48], strides = [1, 1]} : vector<2x64xf32> to vector<2x48xf32>
    %206 = arith.negf %205 : vector<2x48xf32>
    %207 = math.exp %206 : vector<2x48xf32>
    %cst_42 = arith.constant 1.000000e+00 : f32
    %208 = vector.broadcast %cst_42 : f32 to vector<2x48xf32>
    %209 = arith.addf %208, %207 : vector<2x48xf32>
    %210 = arith.divf %208, %209 : vector<2x48xf32>
    %211 = vector.extract_strided_slice %204 {offsets = [0, 48], sizes = [2, 16], strides = [1, 1]} : vector<2x64xf32> to vector<2x16xf32>
    %212 = math.tanh %211 : vector<2x16xf32>
    %213 = vector.extract_strided_slice %210 {offsets = [0, 0], sizes = [2, 16], strides = [1, 1]} : vector<2x48xf32> to vector<2x16xf32>
    %214 = vector.extract_strided_slice %210 {offsets = [0, 16], sizes = [2, 16], strides = [1, 1]} : vector<2x48xf32> to vector<2x16xf32>
    %215 = vector.extract_strided_slice %210 {offsets = [0, 32], sizes = [2, 16], strides = [1, 1]} : vector<2x48xf32> to vector<2x16xf32>
    %216 = arith.mulf %214, %177 : vector<2x16xf32>
    %217 = arith.mulf %213, %212 : vector<2x16xf32>
    %218 = arith.addf %216, %217 : vector<2x16xf32>
    %219 = math.tanh %218 : vector<2x16xf32>
    %220 = arith.mulf %215, %219 : vector<2x16xf32>
    %221 = vector.extract_strided_slice %7 {offsets = [5, 0, 0], sizes = [1, 2, 128], strides = [1, 1, 1]} : vector<8x2x128xf32> to vector<1x2x128xf32>
    %222 = vector.shape_cast %221 : vector<1x2x128xf32> to vector<2x128xf32>
    %cst_43 = arith.constant dense<0.000000e+00> : vector<2x128xf32>
    %223 = tpu.matmul %199, %8, %cst_43 {dimension_numbers = #tpu.dot_dimension_numbers<[1], [0], [0], [1], [0, 0, 1, 1], [], []>} : vector<2x32xf32>, vector<32x128xf32>, vector<2x128xf32> -> vector<2x128xf32>
    %224 = arith.addf %222, %223 : vector<2x128xf32>
    %225 = vector.extract_strided_slice %224 {offsets = [0, 0], sizes = [2, 96], strides = [1, 1]} : vector<2x128xf32> to vector<2x96xf32>
    %226 = arith.negf %225 : vector<2x96xf32>
    %227 = math.exp %226 : vector<2x96xf32>
    %cst_44 = arith.constant 1.000000e+00 : f32
    %228 = vector.broadcast %cst_44 : f32 to vector<2x96xf32>
    %229 = arith.addf %228, %227 : vector<2x96xf32>
    %230 = arith.divf %228, %229 : vector<2x96xf32>
    %231 = vector.extract_strided_slice %224 {offsets = [0, 96], sizes = [2, 32], strides = [1, 1]} : vector<2x128xf32> to vector<2x32xf32>
    %232 = math.tanh %231 : vector<2x32xf32>
    %233 = vector.extract_strided_slice %230 {offsets = [0, 0], sizes = [2, 32], strides = [1, 1]} : vector<2x96xf32> to vector<2x32xf32>
    %234 = vector.extract_strided_slice %230 {offsets = [0, 32], sizes = [2, 32], strides = [1, 1]} : vector<2x96xf32> to vector<2x32xf32>
    %235 = vector.extract_strided_slice %230 {offsets = [0, 64], sizes = [2, 32], strides = [1, 1]} : vector<2x96xf32> to vector<2x32xf32>
    %236 = arith.mulf %234, %197 : vector<2x32xf32>
    %237 = arith.mulf %233, %232 : vector<2x32xf32>
    %238 = arith.addf %236, %237 : vector<2x32xf32>
    %239 = math.tanh %238 : vector<2x32xf32>
    %240 = arith.mulf %235, %239 : vector<2x32xf32>
    %cst_45 = arith.constant dense<0.000000e+00> : vector<2x64xf32>
    %241 = tpu.matmul %240, %9, %cst_45 {dimension_numbers = #tpu.dot_dimension_numbers<[1], [0], [0], [1], [0, 0, 1, 1], [], []>} : vector<2x32xf32>, vector<32x64xf32>, vector<2x64xf32> -> vector<2x64xf32>
    %242 = vector.broadcast %11 : vector<1x64xf32> to vector<2x64xf32>
    %243 = arith.addf %241, %242 : vector<2x64xf32>
    %cst_46 = arith.constant dense<0.000000e+00> : vector<2x64xf32>
    %244 = tpu.matmul %220, %10, %cst_46 {dimension_numbers = #tpu.dot_dimension_numbers<[1], [0], [0], [1], [0, 0, 1, 1], [], []>} : vector<2x16xf32>, vector<16x64xf32>, vector<2x64xf32> -> vector<2x64xf32>
    %245 = arith.addf %243, %244 : vector<2x64xf32>
    %246 = vector.extract_strided_slice %245 {offsets = [0, 0], sizes = [2, 48], strides = [1, 1]} : vector<2x64xf32> to vector<2x48xf32>
    %247 = arith.negf %246 : vector<2x48xf32>
    %248 = math.exp %247 : vector<2x48xf32>
    %cst_47 = arith.constant 1.000000e+00 : f32
    %249 = vector.broadcast %cst_47 : f32 to vector<2x48xf32>
    %250 = arith.addf %249, %248 : vector<2x48xf32>
    %251 = arith.divf %249, %250 : vector<2x48xf32>
    %252 = vector.extract_strided_slice %245 {offsets = [0, 48], sizes = [2, 16], strides = [1, 1]} : vector<2x64xf32> to vector<2x16xf32>
    %253 = math.tanh %252 : vector<2x16xf32>
    %254 = vector.extract_strided_slice %251 {offsets = [0, 0], sizes = [2, 16], strides = [1, 1]} : vector<2x48xf32> to vector<2x16xf32>
    %255 = vector.extract_strided_slice %251 {offsets = [0, 16], sizes = [2, 16], strides = [1, 1]} : vector<2x48xf32> to vector<2x16xf32>
    %256 = vector.extract_strided_slice %251 {offsets = [0, 32], sizes = [2, 16], strides = [1, 1]} : vector<2x48xf32> to vector<2x16xf32>
    %257 = arith.mulf %255, %218 : vector<2x16xf32>
    %258 = arith.mulf %254, %253 : vector<2x16xf32>
    %259 = arith.addf %257, %258 : vector<2x16xf32>
    %260 = math.tanh %259 : vector<2x16xf32>
    %261 = arith.mulf %256, %260 : vector<2x16xf32>
    %262 = vector.extract_strided_slice %7 {offsets = [6, 0, 0], sizes = [1, 2, 128], strides = [1, 1, 1]} : vector<8x2x128xf32> to vector<1x2x128xf32>
    %263 = vector.shape_cast %262 : vector<1x2x128xf32> to vector<2x128xf32>
    %cst_48 = arith.constant dense<0.000000e+00> : vector<2x128xf32>
    %264 = tpu.matmul %240, %8, %cst_48 {dimension_numbers = #tpu.dot_dimension_numbers<[1], [0], [0], [1], [0, 0, 1, 1], [], []>} : vector<2x32xf32>, vector<32x128xf32>, vector<2x128xf32> -> vector<2x128xf32>
    %265 = arith.addf %263, %264 : vector<2x128xf32>
    %266 = vector.extract_strided_slice %265 {offsets = [0, 0], sizes = [2, 96], strides = [1, 1]} : vector<2x128xf32> to vector<2x96xf32>
    %267 = arith.negf %266 : vector<2x96xf32>
    %268 = math.exp %267 : vector<2x96xf32>
    %cst_49 = arith.constant 1.000000e+00 : f32
    %269 = vector.broadcast %cst_49 : f32 to vector<2x96xf32>
    %270 = arith.addf %269, %268 : vector<2x96xf32>
    %271 = arith.divf %269, %270 : vector<2x96xf32>
    %272 = vector.extract_strided_slice %265 {offsets = [0, 96], sizes = [2, 32], strides = [1, 1]} : vector<2x128xf32> to vector<2x32xf32>
    %273 = math.tanh %272 : vector<2x32xf32>
    %274 = vector.extract_strided_slice %271 {offsets = [0, 0], sizes = [2, 32], strides = [1, 1]} : vector<2x96xf32> to vector<2x32xf32>
    %275 = vector.extract_strided_slice %271 {offsets = [0, 32], sizes = [2, 32], strides = [1, 1]} : vector<2x96xf32> to vector<2x32xf32>
    %276 = vector.extract_strided_slice %271 {offsets = [0, 64], sizes = [2, 32], strides = [1, 1]} : vector<2x96xf32> to vector<2x32xf32>
    %277 = arith.mulf %275, %238 : vector<2x32xf32>
    %278 = arith.mulf %274, %273 : vector<2x32xf32>
    %279 = arith.addf %277, %278 : vector<2x32xf32>
    %280 = math.tanh %279 : vector<2x32xf32>
    %281 = arith.mulf %276, %280 : vector<2x32xf32>
    %cst_50 = arith.constant dense<0.000000e+00> : vector<2x64xf32>
    %282 = tpu.matmul %281, %9, %cst_50 {dimension_numbers = #tpu.dot_dimension_numbers<[1], [0], [0], [1], [0, 0, 1, 1], [], []>} : vector<2x32xf32>, vector<32x64xf32>, vector<2x64xf32> -> vector<2x64xf32>
    %283 = vector.broadcast %11 : vector<1x64xf32> to vector<2x64xf32>
    %284 = arith.addf %282, %283 : vector<2x64xf32>
    %cst_51 = arith.constant dense<0.000000e+00> : vector<2x64xf32>
    %285 = tpu.matmul %261, %10, %cst_51 {dimension_numbers = #tpu.dot_dimension_numbers<[1], [0], [0], [1], [0, 0, 1, 1], [], []>} : vector<2x16xf32>, vector<16x64xf32>, vector<2x64xf32> -> vector<2x64xf32>
    %286 = arith.addf %284, %285 : vector<2x64xf32>
    %287 = vector.extract_strided_slice %286 {offsets = [0, 0], sizes = [2, 48], strides = [1, 1]} : vector<2x64xf32> to vector<2x48xf32>
    %288 = arith.negf %287 : vector<2x48xf32>
    %289 = math.exp %288 : vector<2x48xf32>
    %cst_52 = arith.constant 1.000000e+00 : f32
    %290 = vector.broadcast %cst_52 : f32 to vector<2x48xf32>
    %291 = arith.addf %290, %289 : vector<2x48xf32>
    %292 = arith.divf %290, %291 : vector<2x48xf32>
    %293 = vector.extract_strided_slice %286 {offsets = [0, 48], sizes = [2, 16], strides = [1, 1]} : vector<2x64xf32> to vector<2x16xf32>
    %294 = math.tanh %293 : vector<2x16xf32>
    %295 = vector.extract_strided_slice %292 {offsets = [0, 0], sizes = [2, 16], strides = [1, 1]} : vector<2x48xf32> to vector<2x16xf32>
    %296 = vector.extract_strided_slice %292 {offsets = [0, 16], sizes = [2, 16], strides = [1, 1]} : vector<2x48xf32> to vector<2x16xf32>
    %297 = vector.extract_strided_slice %292 {offsets = [0, 32], sizes = [2, 16], strides = [1, 1]} : vector<2x48xf32> to vector<2x16xf32>
    %298 = arith.mulf %296, %259 : vector<2x16xf32>
    %299 = arith.mulf %295, %294 : vector<2x16xf32>
    %300 = arith.addf %298, %299 : vector<2x16xf32>
    %301 = math.tanh %300 : vector<2x16xf32>
    %302 = arith.mulf %297, %301 : vector<2x16xf32>
    %303 = vector.extract_strided_slice %7 {offsets = [7, 0, 0], sizes = [1, 2, 128], strides = [1, 1, 1]} : vector<8x2x128xf32> to vector<1x2x128xf32>
    %304 = vector.shape_cast %303 : vector<1x2x128xf32> to vector<2x128xf32>
    %cst_53 = arith.constant dense<0.000000e+00> : vector<2x128xf32>
    %305 = tpu.matmul %281, %8, %cst_53 {dimension_numbers = #tpu.dot_dimension_numbers<[1], [0], [0], [1], [0, 0, 1, 1], [], []>} : vector<2x32xf32>, vector<32x128xf32>, vector<2x128xf32> -> vector<2x128xf32>
    %306 = arith.addf %304, %305 : vector<2x128xf32>
    %307 = vector.extract_strided_slice %306 {offsets = [0, 0], sizes = [2, 96], strides = [1, 1]} : vector<2x128xf32> to vector<2x96xf32>
    %308 = arith.negf %307 : vector<2x96xf32>
    %309 = math.exp %308 : vector<2x96xf32>
    %cst_54 = arith.constant 1.000000e+00 : f32
    %310 = vector.broadcast %cst_54 : f32 to vector<2x96xf32>
    %311 = arith.addf %310, %309 : vector<2x96xf32>
    %312 = arith.divf %310, %311 : vector<2x96xf32>
    %313 = vector.extract_strided_slice %306 {offsets = [0, 96], sizes = [2, 32], strides = [1, 1]} : vector<2x128xf32> to vector<2x32xf32>
    %314 = math.tanh %313 : vector<2x32xf32>
    %315 = vector.extract_strided_slice %312 {offsets = [0, 0], sizes = [2, 32], strides = [1, 1]} : vector<2x96xf32> to vector<2x32xf32>
    %316 = vector.extract_strided_slice %312 {offsets = [0, 32], sizes = [2, 32], strides = [1, 1]} : vector<2x96xf32> to vector<2x32xf32>
    %317 = vector.extract_strided_slice %312 {offsets = [0, 64], sizes = [2, 32], strides = [1, 1]} : vector<2x96xf32> to vector<2x32xf32>
    %318 = arith.mulf %316, %279 : vector<2x32xf32>
    %319 = arith.mulf %315, %314 : vector<2x32xf32>
    %320 = arith.addf %318, %319 : vector<2x32xf32>
    %321 = math.tanh %320 : vector<2x32xf32>
    %322 = arith.mulf %317, %321 : vector<2x32xf32>
    %cst_55 = arith.constant dense<0.000000e+00> : vector<2x64xf32>
    %323 = tpu.matmul %322, %9, %cst_55 {dimension_numbers = #tpu.dot_dimension_numbers<[1], [0], [0], [1], [0, 0, 1, 1], [], []>} : vector<2x32xf32>, vector<32x64xf32>, vector<2x64xf32> -> vector<2x64xf32>
    %324 = vector.broadcast %11 : vector<1x64xf32> to vector<2x64xf32>
    %325 = arith.addf %323, %324 : vector<2x64xf32>
    %cst_56 = arith.constant dense<0.000000e+00> : vector<2x64xf32>
    %326 = tpu.matmul %302, %10, %cst_56 {dimension_numbers = #tpu.dot_dimension_numbers<[1], [0], [0], [1], [0, 0, 1, 1], [], []>} : vector<2x16xf32>, vector<16x64xf32>, vector<2x64xf32> -> vector<2x64xf32>
    %327 = arith.addf %325, %326 : vector<2x64xf32>
    %328 = vector.extract_strided_slice %327 {offsets = [0, 0], sizes = [2, 48], strides = [1, 1]} : vector<2x64xf32> to vector<2x48xf32>
    %329 = arith.negf %328 : vector<2x48xf32>
    %330 = math.exp %329 : vector<2x48xf32>
    %cst_57 = arith.constant 1.000000e+00 : f32
    %331 = vector.broadcast %cst_57 : f32 to vector<2x48xf32>
    %332 = arith.addf %331, %330 : vector<2x48xf32>
    %333 = arith.divf %331, %332 : vector<2x48xf32>
    %334 = vector.extract_strided_slice %327 {offsets = [0, 48], sizes = [2, 16], strides = [1, 1]} : vector<2x64xf32> to vector<2x16xf32>
    %335 = math.tanh %334 : vector<2x16xf32>
    %336 = vector.extract_strided_slice %333 {offsets = [0, 0], sizes = [2, 16], strides = [1, 1]} : vector<2x48xf32> to vector<2x16xf32>
    %337 = vector.extract_strided_slice %333 {offsets = [0, 16], sizes = [2, 16], strides = [1, 1]} : vector<2x48xf32> to vector<2x16xf32>
    %338 = vector.extract_strided_slice %333 {offsets = [0, 32], sizes = [2, 16], strides = [1, 1]} : vector<2x48xf32> to vector<2x16xf32>
    %339 = arith.mulf %337, %300 : vector<2x16xf32>
    %340 = arith.mulf %336, %335 : vector<2x16xf32>
    %341 = arith.addf %339, %340 : vector<2x16xf32>
    %342 = math.tanh %341 : vector<2x16xf32>
    %343 = arith.mulf %338, %342 : vector<2x16xf32>
    %c0_58 = arith.constant 0 : index
    %c0_59 = arith.constant 0 : index
    %344 = vector.load %arg8[%c0_58, %c0_59] : memref<16x16xf32, #tpu.memory_space<vmem>>, vector<16x16xf32>
    %cst_60 = arith.constant dense<0.000000e+00> : vector<2x16xf32>
    %345 = tpu.matmul %343, %344, %cst_60 {dimension_numbers = #tpu.dot_dimension_numbers<[1], [0], [0], [1], [0, 0, 1, 1], [], []>} : vector<2x16xf32>, vector<16x16xf32>, vector<2x16xf32> -> vector<2x16xf32>
    %c0_61 = arith.constant 0 : index
    %c0_62 = arith.constant 0 : index
    %346 = vector.load %arg9[%c0_61, %c0_62] : memref<1x16xf32, #tpu.memory_space<vmem>>, vector<1x16xf32>
    %347 = vector.broadcast %346 : vector<1x16xf32> to vector<2x16xf32>
    %348 = arith.addf %345, %347 : vector<2x16xf32>
    %c0_63 = arith.constant 0 : index
    %c0_64 = arith.constant 0 : index
    %349 = vector.load %arg18[%c0_63, %c0_64] : memref<2x16xf32, #tpu.memory_space<vmem>>, vector<2x16xf32>
    tpu.vector_store %arg18[%c0_63, %c0_64], %348 {strides = array<i32>} : memref<2x16xf32, #tpu.memory_space<vmem>>, vector<2x16xf32>,
    %350 = vector.extract_strided_slice %348 {offsets = [0, 0], sizes = [2, 8], strides = [1, 1]} : vector<2x16xf32> to vector<2x8xf32>
    %351 = vector.extract_strided_slice %348 {offsets = [0, 8], sizes = [2, 8], strides = [1, 1]} : vector<2x16xf32> to vector<2x8xf32>
    %c0_65 = arith.constant 0 : index
    %c0_66 = arith.constant 0 : index
    %352 = vector.load %arg1[%c0_65, %c0_66] : memref<2x8xf32, #tpu.memory_space<vmem>>, vector<2x8xf32>
    %cst_67 = arith.constant 5.000000e-01 : f32
    %353 = vector.broadcast %cst_67 : f32 to vector<2x8xf32>
    %354 = arith.mulf %353, %351 : vector<2x8xf32>
    %355 = math.exp %354 : vector<2x8xf32>
    %356 = arith.mulf %352, %355 : vector<2x8xf32>
    %357 = arith.addf %350, %356 : vector<2x8xf32>
    %c0_68 = arith.constant 0 : index
    %c0_69 = arith.constant 0 : index
    %358 = vector.load %arg10[%c0_68, %c0_69] : memref<8x64xf32, #tpu.memory_space<vmem>>, vector<8x64xf32>
    %cst_70 = arith.constant dense<0.000000e+00> : vector<2x64xf32>
    %359 = tpu.matmul %357, %358, %cst_70 {dimension_numbers = #tpu.dot_dimension_numbers<[1], [0], [0], [1], [0, 0, 1, 1], [], []>} : vector<2x8xf32>, vector<8x64xf32>, vector<2x64xf32> -> vector<2x64xf32>
    %c0_71 = arith.constant 0 : index
    %c0_72 = arith.constant 0 : index
    %360 = vector.load %arg12[%c0_71, %c0_72] : memref<1x64xf32, #tpu.memory_space<vmem>>, vector<1x64xf32>
    %361 = vector.broadcast %360 : vector<1x64xf32> to vector<2x64xf32>
    %362 = arith.addf %359, %361 : vector<2x64xf32>
    %c0_73 = arith.constant 0 : index
    %c0_74 = arith.constant 0 : index
    %363 = vector.load %arg11[%c0_73, %c0_74] : memref<16x64xf32, #tpu.memory_space<vmem>>, vector<16x64xf32>
    %c0_75 = arith.constant 0 : index
    %c0_76 = arith.constant 0 : index
    %364 = vector.load %arg13[%c0_75, %c0_76] : memref<16x128xf32, #tpu.memory_space<vmem>>, vector<16x128xf32>
    %c0_77 = arith.constant 0 : index
    %c0_78 = arith.constant 0 : index
    %365 = vector.load %arg14[%c0_77, %c0_78] : memref<32x128xf32, #tpu.memory_space<vmem>>, vector<32x128xf32>
    %c0_79 = arith.constant 0 : index
    %c0_80 = arith.constant 0 : index
    %366 = vector.load %arg15[%c0_79, %c0_80] : memref<1x128xf32, #tpu.memory_space<vmem>>, vector<1x128xf32>
    %cst_81 = arith.constant 0.000000e+00 : f32
    %367 = vector.broadcast %cst_81 : f32 to vector<2x16xf32>
    %cst_82 = arith.constant 0.000000e+00 : f32
    %368 = vector.broadcast %cst_82 : f32 to vector<2x16xf32>
    %cst_83 = arith.constant 0.000000e+00 : f32
    %369 = vector.broadcast %cst_83 : f32 to vector<2x32xf32>
    %cst_84 = arith.constant 0.000000e+00 : f32
    %370 = vector.broadcast %cst_84 : f32 to vector<2x32xf32>
    %cst_85 = arith.constant dense<0.000000e+00> : vector<2x64xf32>
    %371 = tpu.matmul %367, %363, %cst_85 {dimension_numbers = #tpu.dot_dimension_numbers<[1], [0], [0], [1], [0, 0, 1, 1], [], []>} : vector<2x16xf32>, vector<16x64xf32>, vector<2x64xf32> -> vector<2x64xf32>
    %372 = arith.addf %362, %371 : vector<2x64xf32>
    %373 = vector.extract_strided_slice %372 {offsets = [0, 0], sizes = [2, 48], strides = [1, 1]} : vector<2x64xf32> to vector<2x48xf32>
    %374 = arith.negf %373 : vector<2x48xf32>
    %375 = math.exp %374 : vector<2x48xf32>
    %cst_86 = arith.constant 1.000000e+00 : f32
    %376 = vector.broadcast %cst_86 : f32 to vector<2x48xf32>
    %377 = arith.addf %376, %375 : vector<2x48xf32>
    %378 = arith.divf %376, %377 : vector<2x48xf32>
    %379 = vector.extract_strided_slice %372 {offsets = [0, 48], sizes = [2, 16], strides = [1, 1]} : vector<2x64xf32> to vector<2x16xf32>
    %380 = math.tanh %379 : vector<2x16xf32>
    %381 = vector.extract_strided_slice %378 {offsets = [0, 0], sizes = [2, 16], strides = [1, 1]} : vector<2x48xf32> to vector<2x16xf32>
    %382 = vector.extract_strided_slice %378 {offsets = [0, 16], sizes = [2, 16], strides = [1, 1]} : vector<2x48xf32> to vector<2x16xf32>
    %383 = vector.extract_strided_slice %378 {offsets = [0, 32], sizes = [2, 16], strides = [1, 1]} : vector<2x48xf32> to vector<2x16xf32>
    %384 = arith.mulf %382, %368 : vector<2x16xf32>
    %385 = arith.mulf %381, %380 : vector<2x16xf32>
    %386 = arith.addf %384, %385 : vector<2x16xf32>
    %387 = math.tanh %386 : vector<2x16xf32>
    %388 = arith.mulf %383, %387 : vector<2x16xf32>
    %cst_87 = arith.constant dense<0.000000e+00> : vector<2x128xf32>
    %389 = tpu.matmul %388, %364, %cst_87 {dimension_numbers = #tpu.dot_dimension_numbers<[1], [0], [0], [1], [0, 0, 1, 1], [], []>} : vector<2x16xf32>, vector<16x128xf32>, vector<2x128xf32> -> vector<2x128xf32>
    %390 = vector.broadcast %366 : vector<1x128xf32> to vector<2x128xf32>
    %391 = arith.addf %389, %390 : vector<2x128xf32>
    %cst_88 = arith.constant dense<0.000000e+00> : vector<2x128xf32>
    %392 = tpu.matmul %369, %365, %cst_88 {dimension_numbers = #tpu.dot_dimension_numbers<[1], [0], [0], [1], [0, 0, 1, 1], [], []>} : vector<2x32xf32>, vector<32x128xf32>, vector<2x128xf32> -> vector<2x128xf32>
    %393 = arith.addf %391, %392 : vector<2x128xf32>
    %394 = vector.extract_strided_slice %393 {offsets = [0, 0], sizes = [2, 96], strides = [1, 1]} : vector<2x128xf32> to vector<2x96xf32>
    %395 = arith.negf %394 : vector<2x96xf32>
    %396 = math.exp %395 : vector<2x96xf32>
    %cst_89 = arith.constant 1.000000e+00 : f32
    %397 = vector.broadcast %cst_89 : f32 to vector<2x96xf32>
    %398 = arith.addf %397, %396 : vector<2x96xf32>
    %399 = arith.divf %397, %398 : vector<2x96xf32>
    %400 = vector.extract_strided_slice %393 {offsets = [0, 96], sizes = [2, 32], strides = [1, 1]} : vector<2x128xf32> to vector<2x32xf32>
    %401 = math.tanh %400 : vector<2x32xf32>
    %402 = vector.extract_strided_slice %399 {offsets = [0, 0], sizes = [2, 32], strides = [1, 1]} : vector<2x96xf32> to vector<2x32xf32>
    %403 = vector.extract_strided_slice %399 {offsets = [0, 32], sizes = [2, 32], strides = [1, 1]} : vector<2x96xf32> to vector<2x32xf32>
    %404 = vector.extract_strided_slice %399 {offsets = [0, 64], sizes = [2, 32], strides = [1, 1]} : vector<2x96xf32> to vector<2x32xf32>
    %405 = arith.mulf %403, %370 : vector<2x32xf32>
    %406 = arith.mulf %402, %401 : vector<2x32xf32>
    %407 = arith.addf %405, %406 : vector<2x32xf32>
    %408 = math.tanh %407 : vector<2x32xf32>
    %409 = arith.mulf %404, %408 : vector<2x32xf32>
    %cst_90 = arith.constant dense<0.000000e+00> : vector<2x64xf32>
    %410 = tpu.matmul %388, %363, %cst_90 {dimension_numbers = #tpu.dot_dimension_numbers<[1], [0], [0], [1], [0, 0, 1, 1], [], []>} : vector<2x16xf32>, vector<16x64xf32>, vector<2x64xf32> -> vector<2x64xf32>
    %411 = arith.addf %362, %410 : vector<2x64xf32>
    %412 = vector.extract_strided_slice %411 {offsets = [0, 0], sizes = [2, 48], strides = [1, 1]} : vector<2x64xf32> to vector<2x48xf32>
    %413 = arith.negf %412 : vector<2x48xf32>
    %414 = math.exp %413 : vector<2x48xf32>
    %cst_91 = arith.constant 1.000000e+00 : f32
    %415 = vector.broadcast %cst_91 : f32 to vector<2x48xf32>
    %416 = arith.addf %415, %414 : vector<2x48xf32>
    %417 = arith.divf %415, %416 : vector<2x48xf32>
    %418 = vector.extract_strided_slice %411 {offsets = [0, 48], sizes = [2, 16], strides = [1, 1]} : vector<2x64xf32> to vector<2x16xf32>
    %419 = math.tanh %418 : vector<2x16xf32>
    %420 = vector.extract_strided_slice %417 {offsets = [0, 0], sizes = [2, 16], strides = [1, 1]} : vector<2x48xf32> to vector<2x16xf32>
    %421 = vector.extract_strided_slice %417 {offsets = [0, 16], sizes = [2, 16], strides = [1, 1]} : vector<2x48xf32> to vector<2x16xf32>
    %422 = vector.extract_strided_slice %417 {offsets = [0, 32], sizes = [2, 16], strides = [1, 1]} : vector<2x48xf32> to vector<2x16xf32>
    %423 = arith.mulf %421, %386 : vector<2x16xf32>
    %424 = arith.mulf %420, %419 : vector<2x16xf32>
    %425 = arith.addf %423, %424 : vector<2x16xf32>
    %426 = math.tanh %425 : vector<2x16xf32>
    %427 = arith.mulf %422, %426 : vector<2x16xf32>
    %cst_92 = arith.constant dense<0.000000e+00> : vector<2x128xf32>
    %428 = tpu.matmul %427, %364, %cst_92 {dimension_numbers = #tpu.dot_dimension_numbers<[1], [0], [0], [1], [0, 0, 1, 1], [], []>} : vector<2x16xf32>, vector<16x128xf32>, vector<2x128xf32> -> vector<2x128xf32>
    %429 = vector.broadcast %366 : vector<1x128xf32> to vector<2x128xf32>
    %430 = arith.addf %428, %429 : vector<2x128xf32>
    %cst_93 = arith.constant dense<0.000000e+00> : vector<2x128xf32>
    %431 = tpu.matmul %409, %365, %cst_93 {dimension_numbers = #tpu.dot_dimension_numbers<[1], [0], [0], [1], [0, 0, 1, 1], [], []>} : vector<2x32xf32>, vector<32x128xf32>, vector<2x128xf32> -> vector<2x128xf32>
    %432 = arith.addf %430, %431 : vector<2x128xf32>
    %433 = vector.extract_strided_slice %432 {offsets = [0, 0], sizes = [2, 96], strides = [1, 1]} : vector<2x128xf32> to vector<2x96xf32>
    %434 = arith.negf %433 : vector<2x96xf32>
    %435 = math.exp %434 : vector<2x96xf32>
    %cst_94 = arith.constant 1.000000e+00 : f32
    %436 = vector.broadcast %cst_94 : f32 to vector<2x96xf32>
    %437 = arith.addf %436, %435 : vector<2x96xf32>
    %438 = arith.divf %436, %437 : vector<2x96xf32>
    %439 = vector.extract_strided_slice %432 {offsets = [0, 96], sizes = [2, 32], strides = [1, 1]} : vector<2x128xf32> to vector<2x32xf32>
    %440 = math.tanh %439 : vector<2x32xf32>
    %441 = vector.extract_strided_slice %438 {offsets = [0, 0], sizes = [2, 32], strides = [1, 1]} : vector<2x96xf32> to vector<2x32xf32>
    %442 = vector.extract_strided_slice %438 {offsets = [0, 32], sizes = [2, 32], strides = [1, 1]} : vector<2x96xf32> to vector<2x32xf32>
    %443 = vector.extract_strided_slice %438 {offsets = [0, 64], sizes = [2, 32], strides = [1, 1]} : vector<2x96xf32> to vector<2x32xf32>
    %444 = arith.mulf %442, %407 : vector<2x32xf32>
    %445 = arith.mulf %441, %440 : vector<2x32xf32>
    %446 = arith.addf %444, %445 : vector<2x32xf32>
    %447 = math.tanh %446 : vector<2x32xf32>
    %448 = arith.mulf %443, %447 : vector<2x32xf32>
    %cst_95 = arith.constant dense<0.000000e+00> : vector<2x64xf32>
    %449 = tpu.matmul %427, %363, %cst_95 {dimension_numbers = #tpu.dot_dimension_numbers<[1], [0], [0], [1], [0, 0, 1, 1], [], []>} : vector<2x16xf32>, vector<16x64xf32>, vector<2x64xf32> -> vector<2x64xf32>
    %450 = arith.addf %362, %449 : vector<2x64xf32>
    %451 = vector.extract_strided_slice %450 {offsets = [0, 0], sizes = [2, 48], strides = [1, 1]} : vector<2x64xf32> to vector<2x48xf32>
    %452 = arith.negf %451 : vector<2x48xf32>
    %453 = math.exp %452 : vector<2x48xf32>
    %cst_96 = arith.constant 1.000000e+00 : f32
    %454 = vector.broadcast %cst_96 : f32 to vector<2x48xf32>
    %455 = arith.addf %454, %453 : vector<2x48xf32>
    %456 = arith.divf %454, %455 : vector<2x48xf32>
    %457 = vector.extract_strided_slice %450 {offsets = [0, 48], sizes = [2, 16], strides = [1, 1]} : vector<2x64xf32> to vector<2x16xf32>
    %458 = math.tanh %457 : vector<2x16xf32>
    %459 = vector.extract_strided_slice %456 {offsets = [0, 0], sizes = [2, 16], strides = [1, 1]} : vector<2x48xf32> to vector<2x16xf32>
    %460 = vector.extract_strided_slice %456 {offsets = [0, 16], sizes = [2, 16], strides = [1, 1]} : vector<2x48xf32> to vector<2x16xf32>
    %461 = vector.extract_strided_slice %456 {offsets = [0, 32], sizes = [2, 16], strides = [1, 1]} : vector<2x48xf32> to vector<2x16xf32>
    %462 = arith.mulf %460, %425 : vector<2x16xf32>
    %463 = arith.mulf %459, %458 : vector<2x16xf32>
    %464 = arith.addf %462, %463 : vector<2x16xf32>
    %465 = math.tanh %464 : vector<2x16xf32>
    %466 = arith.mulf %461, %465 : vector<2x16xf32>
    %cst_97 = arith.constant dense<0.000000e+00> : vector<2x128xf32>
    %467 = tpu.matmul %466, %364, %cst_97 {dimension_numbers = #tpu.dot_dimension_numbers<[1], [0], [0], [1], [0, 0, 1, 1], [], []>} : vector<2x16xf32>, vector<16x128xf32>, vector<2x128xf32> -> vector<2x128xf32>
    %468 = vector.broadcast %366 : vector<1x128xf32> to vector<2x128xf32>
    %469 = arith.addf %467, %468 : vector<2x128xf32>
    %cst_98 = arith.constant dense<0.000000e+00> : vector<2x128xf32>
    %470 = tpu.matmul %448, %365, %cst_98 {dimension_numbers = #tpu.dot_dimension_numbers<[1], [0], [0], [1], [0, 0, 1, 1], [], []>} : vector<2x32xf32>, vector<32x128xf32>, vector<2x128xf32> -> vector<2x128xf32>
    %471 = arith.addf %469, %470 : vector<2x128xf32>
    %472 = vector.extract_strided_slice %471 {offsets = [0, 0], sizes = [2, 96], strides = [1, 1]} : vector<2x128xf32> to vector<2x96xf32>
    %473 = arith.negf %472 : vector<2x96xf32>
    %474 = math.exp %473 : vector<2x96xf32>
    %cst_99 = arith.constant 1.000000e+00 : f32
    %475 = vector.broadcast %cst_99 : f32 to vector<2x96xf32>
    %476 = arith.addf %475, %474 : vector<2x96xf32>
    %477 = arith.divf %475, %476 : vector<2x96xf32>
    %478 = vector.extract_strided_slice %471 {offsets = [0, 96], sizes = [2, 32], strides = [1, 1]} : vector<2x128xf32> to vector<2x32xf32>
    %479 = math.tanh %478 : vector<2x32xf32>
    %480 = vector.extract_strided_slice %477 {offsets = [0, 0], sizes = [2, 32], strides = [1, 1]} : vector<2x96xf32> to vector<2x32xf32>
    %481 = vector.extract_strided_slice %477 {offsets = [0, 32], sizes = [2, 32], strides = [1, 1]} : vector<2x96xf32> to vector<2x32xf32>
    %482 = vector.extract_strided_slice %477 {offsets = [0, 64], sizes = [2, 32], strides = [1, 1]} : vector<2x96xf32> to vector<2x32xf32>
    %483 = arith.mulf %481, %446 : vector<2x32xf32>
    %484 = arith.mulf %480, %479 : vector<2x32xf32>
    %485 = arith.addf %483, %484 : vector<2x32xf32>
    %486 = math.tanh %485 : vector<2x32xf32>
    %487 = arith.mulf %482, %486 : vector<2x32xf32>
    %cst_100 = arith.constant dense<0.000000e+00> : vector<2x64xf32>
    %488 = tpu.matmul %466, %363, %cst_100 {dimension_numbers = #tpu.dot_dimension_numbers<[1], [0], [0], [1], [0, 0, 1, 1], [], []>} : vector<2x16xf32>, vector<16x64xf32>, vector<2x64xf32> -> vector<2x64xf32>
    %489 = arith.addf %362, %488 : vector<2x64xf32>
    %490 = vector.extract_strided_slice %489 {offsets = [0, 0], sizes = [2, 48], strides = [1, 1]} : vector<2x64xf32> to vector<2x48xf32>
    %491 = arith.negf %490 : vector<2x48xf32>
    %492 = math.exp %491 : vector<2x48xf32>
    %cst_101 = arith.constant 1.000000e+00 : f32
    %493 = vector.broadcast %cst_101 : f32 to vector<2x48xf32>
    %494 = arith.addf %493, %492 : vector<2x48xf32>
    %495 = arith.divf %493, %494 : vector<2x48xf32>
    %496 = vector.extract_strided_slice %489 {offsets = [0, 48], sizes = [2, 16], strides = [1, 1]} : vector<2x64xf32> to vector<2x16xf32>
    %497 = math.tanh %496 : vector<2x16xf32>
    %498 = vector.extract_strided_slice %495 {offsets = [0, 0], sizes = [2, 16], strides = [1, 1]} : vector<2x48xf32> to vector<2x16xf32>
    %499 = vector.extract_strided_slice %495 {offsets = [0, 16], sizes = [2, 16], strides = [1, 1]} : vector<2x48xf32> to vector<2x16xf32>
    %500 = vector.extract_strided_slice %495 {offsets = [0, 32], sizes = [2, 16], strides = [1, 1]} : vector<2x48xf32> to vector<2x16xf32>
    %501 = arith.mulf %499, %464 : vector<2x16xf32>
    %502 = arith.mulf %498, %497 : vector<2x16xf32>
    %503 = arith.addf %501, %502 : vector<2x16xf32>
    %504 = math.tanh %503 : vector<2x16xf32>
    %505 = arith.mulf %500, %504 : vector<2x16xf32>
    %cst_102 = arith.constant dense<0.000000e+00> : vector<2x128xf32>
    %506 = tpu.matmul %505, %364, %cst_102 {dimension_numbers = #tpu.dot_dimension_numbers<[1], [0], [0], [1], [0, 0, 1, 1], [], []>} : vector<2x16xf32>, vector<16x128xf32>, vector<2x128xf32> -> vector<2x128xf32>
    %507 = vector.broadcast %366 : vector<1x128xf32> to vector<2x128xf32>
    %508 = arith.addf %506, %507 : vector<2x128xf32>
    %cst_103 = arith.constant dense<0.000000e+00> : vector<2x128xf32>
    %509 = tpu.matmul %487, %365, %cst_103 {dimension_numbers = #tpu.dot_dimension_numbers<[1], [0], [0], [1], [0, 0, 1, 1], [], []>} : vector<2x32xf32>, vector<32x128xf32>, vector<2x128xf32> -> vector<2x128xf32>
    %510 = arith.addf %508, %509 : vector<2x128xf32>
    %511 = vector.extract_strided_slice %510 {offsets = [0, 0], sizes = [2, 96], strides = [1, 1]} : vector<2x128xf32> to vector<2x96xf32>
    %512 = arith.negf %511 : vector<2x96xf32>
    %513 = math.exp %512 : vector<2x96xf32>
    %cst_104 = arith.constant 1.000000e+00 : f32
    %514 = vector.broadcast %cst_104 : f32 to vector<2x96xf32>
    %515 = arith.addf %514, %513 : vector<2x96xf32>
    %516 = arith.divf %514, %515 : vector<2x96xf32>
    %517 = vector.extract_strided_slice %510 {offsets = [0, 96], sizes = [2, 32], strides = [1, 1]} : vector<2x128xf32> to vector<2x32xf32>
    %518 = math.tanh %517 : vector<2x32xf32>
    %519 = vector.extract_strided_slice %516 {offsets = [0, 0], sizes = [2, 32], strides = [1, 1]} : vector<2x96xf32> to vector<2x32xf32>
    %520 = vector.extract_strided_slice %516 {offsets = [0, 32], sizes = [2, 32], strides = [1, 1]} : vector<2x96xf32> to vector<2x32xf32>
    %521 = vector.extract_strided_slice %516 {offsets = [0, 64], sizes = [2, 32], strides = [1, 1]} : vector<2x96xf32> to vector<2x32xf32>
    %522 = arith.mulf %520, %485 : vector<2x32xf32>
    %523 = arith.mulf %519, %518 : vector<2x32xf32>
    %524 = arith.addf %522, %523 : vector<2x32xf32>
    %525 = math.tanh %524 : vector<2x32xf32>
    %526 = arith.mulf %521, %525 : vector<2x32xf32>
    %cst_105 = arith.constant dense<0.000000e+00> : vector<2x64xf32>
    %527 = tpu.matmul %505, %363, %cst_105 {dimension_numbers = #tpu.dot_dimension_numbers<[1], [0], [0], [1], [0, 0, 1, 1], [], []>} : vector<2x16xf32>, vector<16x64xf32>, vector<2x64xf32> -> vector<2x64xf32>
    %528 = arith.addf %362, %527 : vector<2x64xf32>
    %529 = vector.extract_strided_slice %528 {offsets = [0, 0], sizes = [2, 48], strides = [1, 1]} : vector<2x64xf32> to vector<2x48xf32>
    %530 = arith.negf %529 : vector<2x48xf32>
    %531 = math.exp %530 : vector<2x48xf32>
    %cst_106 = arith.constant 1.000000e+00 : f32
    %532 = vector.broadcast %cst_106 : f32 to vector<2x48xf32>
    %533 = arith.addf %532, %531 : vector<2x48xf32>
    %534 = arith.divf %532, %533 : vector<2x48xf32>
    %535 = vector.extract_strided_slice %528 {offsets = [0, 48], sizes = [2, 16], strides = [1, 1]} : vector<2x64xf32> to vector<2x16xf32>
    %536 = math.tanh %535 : vector<2x16xf32>
    %537 = vector.extract_strided_slice %534 {offsets = [0, 0], sizes = [2, 16], strides = [1, 1]} : vector<2x48xf32> to vector<2x16xf32>
    %538 = vector.extract_strided_slice %534 {offsets = [0, 16], sizes = [2, 16], strides = [1, 1]} : vector<2x48xf32> to vector<2x16xf32>
    %539 = vector.extract_strided_slice %534 {offsets = [0, 32], sizes = [2, 16], strides = [1, 1]} : vector<2x48xf32> to vector<2x16xf32>
    %540 = arith.mulf %538, %503 : vector<2x16xf32>
    %541 = arith.mulf %537, %536 : vector<2x16xf32>
    %542 = arith.addf %540, %541 : vector<2x16xf32>
    %543 = math.tanh %542 : vector<2x16xf32>
    %544 = arith.mulf %539, %543 : vector<2x16xf32>
    %cst_107 = arith.constant dense<0.000000e+00> : vector<2x128xf32>
    %545 = tpu.matmul %544, %364, %cst_107 {dimension_numbers = #tpu.dot_dimension_numbers<[1], [0], [0], [1], [0, 0, 1, 1], [], []>} : vector<2x16xf32>, vector<16x128xf32>, vector<2x128xf32> -> vector<2x128xf32>
    %546 = vector.broadcast %366 : vector<1x128xf32> to vector<2x128xf32>
    %547 = arith.addf %545, %546 : vector<2x128xf32>
    %cst_108 = arith.constant dense<0.000000e+00> : vector<2x128xf32>
    %548 = tpu.matmul %526, %365, %cst_108 {dimension_numbers = #tpu.dot_dimension_numbers<[1], [0], [0], [1], [0, 0, 1, 1], [], []>} : vector<2x32xf32>, vector<32x128xf32>, vector<2x128xf32> -> vector<2x128xf32>
    %549 = arith.addf %547, %548 : vector<2x128xf32>
    %550 = vector.extract_strided_slice %549 {offsets = [0, 0], sizes = [2, 96], strides = [1, 1]} : vector<2x128xf32> to vector<2x96xf32>
    %551 = arith.negf %550 : vector<2x96xf32>
    %552 = math.exp %551 : vector<2x96xf32>
    %cst_109 = arith.constant 1.000000e+00 : f32
    %553 = vector.broadcast %cst_109 : f32 to vector<2x96xf32>
    %554 = arith.addf %553, %552 : vector<2x96xf32>
    %555 = arith.divf %553, %554 : vector<2x96xf32>
    %556 = vector.extract_strided_slice %549 {offsets = [0, 96], sizes = [2, 32], strides = [1, 1]} : vector<2x128xf32> to vector<2x32xf32>
    %557 = math.tanh %556 : vector<2x32xf32>
    %558 = vector.extract_strided_slice %555 {offsets = [0, 0], sizes = [2, 32], strides = [1, 1]} : vector<2x96xf32> to vector<2x32xf32>
    %559 = vector.extract_strided_slice %555 {offsets = [0, 32], sizes = [2, 32], strides = [1, 1]} : vector<2x96xf32> to vector<2x32xf32>
    %560 = vector.extract_strided_slice %555 {offsets = [0, 64], sizes = [2, 32], strides = [1, 1]} : vector<2x96xf32> to vector<2x32xf32>
    %561 = arith.mulf %559, %524 : vector<2x32xf32>
    %562 = arith.mulf %558, %557 : vector<2x32xf32>
    %563 = arith.addf %561, %562 : vector<2x32xf32>
    %564 = math.tanh %563 : vector<2x32xf32>
    %565 = arith.mulf %560, %564 : vector<2x32xf32>
    %cst_110 = arith.constant dense<0.000000e+00> : vector<2x64xf32>
    %566 = tpu.matmul %544, %363, %cst_110 {dimension_numbers = #tpu.dot_dimension_numbers<[1], [0], [0], [1], [0, 0, 1, 1], [], []>} : vector<2x16xf32>, vector<16x64xf32>, vector<2x64xf32> -> vector<2x64xf32>
    %567 = arith.addf %362, %566 : vector<2x64xf32>
    %568 = vector.extract_strided_slice %567 {offsets = [0, 0], sizes = [2, 48], strides = [1, 1]} : vector<2x64xf32> to vector<2x48xf32>
    %569 = arith.negf %568 : vector<2x48xf32>
    %570 = math.exp %569 : vector<2x48xf32>
    %cst_111 = arith.constant 1.000000e+00 : f32
    %571 = vector.broadcast %cst_111 : f32 to vector<2x48xf32>
    %572 = arith.addf %571, %570 : vector<2x48xf32>
    %573 = arith.divf %571, %572 : vector<2x48xf32>
    %574 = vector.extract_strided_slice %567 {offsets = [0, 48], sizes = [2, 16], strides = [1, 1]} : vector<2x64xf32> to vector<2x16xf32>
    %575 = math.tanh %574 : vector<2x16xf32>
    %576 = vector.extract_strided_slice %573 {offsets = [0, 0], sizes = [2, 16], strides = [1, 1]} : vector<2x48xf32> to vector<2x16xf32>
    %577 = vector.extract_strided_slice %573 {offsets = [0, 16], sizes = [2, 16], strides = [1, 1]} : vector<2x48xf32> to vector<2x16xf32>
    %578 = vector.extract_strided_slice %573 {offsets = [0, 32], sizes = [2, 16], strides = [1, 1]} : vector<2x48xf32> to vector<2x16xf32>
    %579 = arith.mulf %577, %542 : vector<2x16xf32>
    %580 = arith.mulf %576, %575 : vector<2x16xf32>
    %581 = arith.addf %579, %580 : vector<2x16xf32>
    %582 = math.tanh %581 : vector<2x16xf32>
    %583 = arith.mulf %578, %582 : vector<2x16xf32>
    %cst_112 = arith.constant dense<0.000000e+00> : vector<2x128xf32>
    %584 = tpu.matmul %583, %364, %cst_112 {dimension_numbers = #tpu.dot_dimension_numbers<[1], [0], [0], [1], [0, 0, 1, 1], [], []>} : vector<2x16xf32>, vector<16x128xf32>, vector<2x128xf32> -> vector<2x128xf32>
    %585 = vector.broadcast %366 : vector<1x128xf32> to vector<2x128xf32>
    %586 = arith.addf %584, %585 : vector<2x128xf32>
    %cst_113 = arith.constant dense<0.000000e+00> : vector<2x128xf32>
    %587 = tpu.matmul %565, %365, %cst_113 {dimension_numbers = #tpu.dot_dimension_numbers<[1], [0], [0], [1], [0, 0, 1, 1], [], []>} : vector<2x32xf32>, vector<32x128xf32>, vector<2x128xf32> -> vector<2x128xf32>
    %588 = arith.addf %586, %587 : vector<2x128xf32>
    %589 = vector.extract_strided_slice %588 {offsets = [0, 0], sizes = [2, 96], strides = [1, 1]} : vector<2x128xf32> to vector<2x96xf32>
    %590 = arith.negf %589 : vector<2x96xf32>
    %591 = math.exp %590 : vector<2x96xf32>
    %cst_114 = arith.constant 1.000000e+00 : f32
    %592 = vector.broadcast %cst_114 : f32 to vector<2x96xf32>
    %593 = arith.addf %592, %591 : vector<2x96xf32>
    %594 = arith.divf %592, %593 : vector<2x96xf32>
    %595 = vector.extract_strided_slice %588 {offsets = [0, 96], sizes = [2, 32], strides = [1, 1]} : vector<2x128xf32> to vector<2x32xf32>
    %596 = math.tanh %595 : vector<2x32xf32>
    %597 = vector.extract_strided_slice %594 {offsets = [0, 0], sizes = [2, 32], strides = [1, 1]} : vector<2x96xf32> to vector<2x32xf32>
    %598 = vector.extract_strided_slice %594 {offsets = [0, 32], sizes = [2, 32], strides = [1, 1]} : vector<2x96xf32> to vector<2x32xf32>
    %599 = vector.extract_strided_slice %594 {offsets = [0, 64], sizes = [2, 32], strides = [1, 1]} : vector<2x96xf32> to vector<2x32xf32>
    %600 = arith.mulf %598, %563 : vector<2x32xf32>
    %601 = arith.mulf %597, %596 : vector<2x32xf32>
    %602 = arith.addf %600, %601 : vector<2x32xf32>
    %603 = math.tanh %602 : vector<2x32xf32>
    %604 = arith.mulf %599, %603 : vector<2x32xf32>
    %cst_115 = arith.constant dense<0.000000e+00> : vector<2x64xf32>
    %605 = tpu.matmul %583, %363, %cst_115 {dimension_numbers = #tpu.dot_dimension_numbers<[1], [0], [0], [1], [0, 0, 1, 1], [], []>} : vector<2x16xf32>, vector<16x64xf32>, vector<2x64xf32> -> vector<2x64xf32>
    %606 = arith.addf %362, %605 : vector<2x64xf32>
    %607 = vector.extract_strided_slice %606 {offsets = [0, 0], sizes = [2, 48], strides = [1, 1]} : vector<2x64xf32> to vector<2x48xf32>
    %608 = arith.negf %607 : vector<2x48xf32>
    %609 = math.exp %608 : vector<2x48xf32>
    %cst_116 = arith.constant 1.000000e+00 : f32
    %610 = vector.broadcast %cst_116 : f32 to vector<2x48xf32>
    %611 = arith.addf %610, %609 : vector<2x48xf32>
    %612 = arith.divf %610, %611 : vector<2x48xf32>
    %613 = vector.extract_strided_slice %606 {offsets = [0, 48], sizes = [2, 16], strides = [1, 1]} : vector<2x64xf32> to vector<2x16xf32>
    %614 = math.tanh %613 : vector<2x16xf32>
    %615 = vector.extract_strided_slice %612 {offsets = [0, 0], sizes = [2, 16], strides = [1, 1]} : vector<2x48xf32> to vector<2x16xf32>
    %616 = vector.extract_strided_slice %612 {offsets = [0, 16], sizes = [2, 16], strides = [1, 1]} : vector<2x48xf32> to vector<2x16xf32>
    %617 = vector.extract_strided_slice %612 {offsets = [0, 32], sizes = [2, 16], strides = [1, 1]} : vector<2x48xf32> to vector<2x16xf32>
    %618 = arith.mulf %616, %581 : vector<2x16xf32>
    %619 = arith.mulf %615, %614 : vector<2x16xf32>
    %620 = arith.addf %618, %619 : vector<2x16xf32>
    %621 = math.tanh %620 : vector<2x16xf32>
    %622 = arith.mulf %617, %621 : vector<2x16xf32>
    %cst_117 = arith.constant dense<0.000000e+00> : vector<2x128xf32>
    %623 = tpu.matmul %622, %364, %cst_117 {dimension_numbers = #tpu.dot_dimension_numbers<[1], [0], [0], [1], [0, 0, 1, 1], [], []>} : vector<2x16xf32>, vector<16x128xf32>, vector<2x128xf32> -> vector<2x128xf32>
    %624 = vector.broadcast %366 : vector<1x128xf32> to vector<2x128xf32>
    %625 = arith.addf %623, %624 : vector<2x128xf32>
    %cst_118 = arith.constant dense<0.000000e+00> : vector<2x128xf32>
    %626 = tpu.matmul %604, %365, %cst_118 {dimension_numbers = #tpu.dot_dimension_numbers<[1], [0], [0], [1], [0, 0, 1, 1], [], []>} : vector<2x32xf32>, vector<32x128xf32>, vector<2x128xf32> -> vector<2x128xf32>
    %627 = arith.addf %625, %626 : vector<2x128xf32>
    %628 = vector.extract_strided_slice %627 {offsets = [0, 0], sizes = [2, 96], strides = [1, 1]} : vector<2x128xf32> to vector<2x96xf32>
    %629 = arith.negf %628 : vector<2x96xf32>
    %630 = math.exp %629 : vector<2x96xf32>
    %cst_119 = arith.constant 1.000000e+00 : f32
    %631 = vector.broadcast %cst_119 : f32 to vector<2x96xf32>
    %632 = arith.addf %631, %630 : vector<2x96xf32>
    %633 = arith.divf %631, %632 : vector<2x96xf32>
    %634 = vector.extract_strided_slice %627 {offsets = [0, 96], sizes = [2, 32], strides = [1, 1]} : vector<2x128xf32> to vector<2x32xf32>
    %635 = math.tanh %634 : vector<2x32xf32>
    %636 = vector.extract_strided_slice %633 {offsets = [0, 0], sizes = [2, 32], strides = [1, 1]} : vector<2x96xf32> to vector<2x32xf32>
    %637 = vector.extract_strided_slice %633 {offsets = [0, 32], sizes = [2, 32], strides = [1, 1]} : vector<2x96xf32> to vector<2x32xf32>
    %638 = vector.extract_strided_slice %633 {offsets = [0, 64], sizes = [2, 32], strides = [1, 1]} : vector<2x96xf32> to vector<2x32xf32>
    %639 = arith.mulf %637, %602 : vector<2x32xf32>
    %640 = arith.mulf %636, %635 : vector<2x32xf32>
    %641 = arith.addf %639, %640 : vector<2x32xf32>
    %642 = math.tanh %641 : vector<2x32xf32>
    %643 = arith.mulf %638, %642 : vector<2x32xf32>
    %cst_120 = arith.constant dense<0.000000e+00> : vector<2x64xf32>
    %644 = tpu.matmul %622, %363, %cst_120 {dimension_numbers = #tpu.dot_dimension_numbers<[1], [0], [0], [1], [0, 0, 1, 1], [], []>} : vector<2x16xf32>, vector<16x64xf32>, vector<2x64xf32> -> vector<2x64xf32>
    %645 = arith.addf %362, %644 : vector<2x64xf32>
    %646 = vector.extract_strided_slice %645 {offsets = [0, 0], sizes = [2, 48], strides = [1, 1]} : vector<2x64xf32> to vector<2x48xf32>
    %647 = arith.negf %646 : vector<2x48xf32>
    %648 = math.exp %647 : vector<2x48xf32>
    %cst_121 = arith.constant 1.000000e+00 : f32
    %649 = vector.broadcast %cst_121 : f32 to vector<2x48xf32>
    %650 = arith.addf %649, %648 : vector<2x48xf32>
    %651 = arith.divf %649, %650 : vector<2x48xf32>
    %652 = vector.extract_strided_slice %645 {offsets = [0, 48], sizes = [2, 16], strides = [1, 1]} : vector<2x64xf32> to vector<2x16xf32>
    %653 = math.tanh %652 : vector<2x16xf32>
    %654 = vector.extract_strided_slice %651 {offsets = [0, 0], sizes = [2, 16], strides = [1, 1]} : vector<2x48xf32> to vector<2x16xf32>
    %655 = vector.extract_strided_slice %651 {offsets = [0, 16], sizes = [2, 16], strides = [1, 1]} : vector<2x48xf32> to vector<2x16xf32>
    %656 = vector.extract_strided_slice %651 {offsets = [0, 32], sizes = [2, 16], strides = [1, 1]} : vector<2x48xf32> to vector<2x16xf32>
    %657 = arith.mulf %655, %620 : vector<2x16xf32>
    %658 = arith.mulf %654, %653 : vector<2x16xf32>
    %659 = arith.addf %657, %658 : vector<2x16xf32>
    %660 = math.tanh %659 : vector<2x16xf32>
    %661 = arith.mulf %656, %660 : vector<2x16xf32>
    %cst_122 = arith.constant dense<0.000000e+00> : vector<2x128xf32>
    %662 = tpu.matmul %661, %364, %cst_122 {dimension_numbers = #tpu.dot_dimension_numbers<[1], [0], [0], [1], [0, 0, 1, 1], [], []>} : vector<2x16xf32>, vector<16x128xf32>, vector<2x128xf32> -> vector<2x128xf32>
    %663 = vector.broadcast %366 : vector<1x128xf32> to vector<2x128xf32>
    %664 = arith.addf %662, %663 : vector<2x128xf32>
    %cst_123 = arith.constant dense<0.000000e+00> : vector<2x128xf32>
    %665 = tpu.matmul %643, %365, %cst_123 {dimension_numbers = #tpu.dot_dimension_numbers<[1], [0], [0], [1], [0, 0, 1, 1], [], []>} : vector<2x32xf32>, vector<32x128xf32>, vector<2x128xf32> -> vector<2x128xf32>
    %666 = arith.addf %664, %665 : vector<2x128xf32>
    %667 = vector.extract_strided_slice %666 {offsets = [0, 0], sizes = [2, 96], strides = [1, 1]} : vector<2x128xf32> to vector<2x96xf32>
    %668 = arith.negf %667 : vector<2x96xf32>
    %669 = math.exp %668 : vector<2x96xf32>
    %cst_124 = arith.constant 1.000000e+00 : f32
    %670 = vector.broadcast %cst_124 : f32 to vector<2x96xf32>
    %671 = arith.addf %670, %669 : vector<2x96xf32>
    %672 = arith.divf %670, %671 : vector<2x96xf32>
    %673 = vector.extract_strided_slice %666 {offsets = [0, 96], sizes = [2, 32], strides = [1, 1]} : vector<2x128xf32> to vector<2x32xf32>
    %674 = math.tanh %673 : vector<2x32xf32>
    %675 = vector.extract_strided_slice %672 {offsets = [0, 0], sizes = [2, 32], strides = [1, 1]} : vector<2x96xf32> to vector<2x32xf32>
    %676 = vector.extract_strided_slice %672 {offsets = [0, 32], sizes = [2, 32], strides = [1, 1]} : vector<2x96xf32> to vector<2x32xf32>
    %677 = vector.extract_strided_slice %672 {offsets = [0, 64], sizes = [2, 32], strides = [1, 1]} : vector<2x96xf32> to vector<2x32xf32>
    %678 = arith.mulf %676, %641 : vector<2x32xf32>
    %679 = arith.mulf %675, %674 : vector<2x32xf32>
    %680 = arith.addf %678, %679 : vector<2x32xf32>
    %681 = math.tanh %680 : vector<2x32xf32>
    %682 = arith.mulf %677, %681 : vector<2x32xf32>
    %683 = tpu.concatenate %409, %448, %487, %526, %565, %604, %643, %682 in 0 : vector<2x32xf32>, vector<2x32xf32>, vector<2x32xf32>, vector<2x32xf32>, vector<2x32xf32>, vector<2x32xf32>, vector<2x32xf32>, vector<2x32xf32> -> vector<16x32xf32>
    %c0_125 = arith.constant 0 : index
    %c0_126 = arith.constant 0 : index
    %684 = vector.load %arg16[%c0_125, %c0_126] : memref<32x12xf32, #tpu.memory_space<vmem>>, vector<32x12xf32>
    %cst_127 = arith.constant dense<0.000000e+00> : vector<16x12xf32>
    %685 = tpu.matmul %683, %684, %cst_127 {dimension_numbers = #tpu.dot_dimension_numbers<[1], [0], [0], [1], [0, 0, 1, 1], [], []>} : vector<16x32xf32>, vector<32x12xf32>, vector<16x12xf32> -> vector<16x12xf32>
    %c0_128 = arith.constant 0 : index
    %c0_129 = arith.constant 0 : index
    %686 = vector.load %arg17[%c0_128, %c0_129] : memref<1x12xf32, #tpu.memory_space<vmem>>, vector<1x12xf32>
    %687 = vector.broadcast %686 : vector<1x12xf32> to vector<16x12xf32>
    %688 = arith.addf %685, %687 : vector<16x12xf32>
    %689 = vector.extract_strided_slice %688 {offsets = [0, 0], sizes = [16, 4], strides = [1, 1]} : vector<16x12xf32> to vector<16x4xf32>
    %690 = vector.extract_strided_slice %688 {offsets = [0, 4], sizes = [16, 4], strides = [1, 1]} : vector<16x12xf32> to vector<16x4xf32>
    %691 = vector.extract_strided_slice %688 {offsets = [0, 8], sizes = [16, 4], strides = [1, 1]} : vector<16x12xf32> to vector<16x4xf32>
    %cst_130 = arith.constant 0.000000e+00 : f32
    %692 = vector.broadcast %cst_130 : f32 to vector<16x4xf32>
    %693 = arith.cmpf ogt, %690, %692 : vector<16x4xf32>
    %694 = arith.mulf %690, %690 : vector<16x4xf32>
    %cst_131 = arith.constant 1.000000e+00 : f32
    %695 = vector.broadcast %cst_131 : f32 to vector<16x4xf32>
    %696 = arith.addf %695, %694 : vector<16x4xf32>
    %697 = math.rsqrt %696 : vector<16x4xf32>
    %698 = arith.mulf %690, %697 : vector<16x4xf32>
    %699 = arith.select %693, %690, %698 : vector<16x4xi1>, vector<16x4xf32>
    %cst_132 = arith.constant 1.005000e+00 : f32
    %700 = vector.broadcast %cst_132 : f32 to vector<16x4xf32>
    %701 = arith.addf %700, %699 : vector<16x4xf32>
    %702 = math.tanh %691 : vector<16x4xf32>
    %cst_133 = arith.constant 9.990000e-01 : f32
    %703 = vector.broadcast %cst_133 : f32 to vector<16x4xf32>
    %704 = arith.mulf %703, %702 : vector<16x4xf32>
    %cst_134 = arith.constant 1.000000e+00 : f32
    %705 = vector.broadcast %cst_134 : f32 to vector<16x4xf32>
    %706 = arith.addf %705, %704 : vector<16x4xf32>
    %cst_135 = arith.constant 5.000000e-01 : f32
    %707 = vector.broadcast %cst_135 : f32 to vector<16x4xf32>
    %708 = arith.mulf %707, %706 : vector<16x4xf32>
    %709 = tpu.concatenate %689, %701, %708 in 1 : vector<16x4xf32>, vector<16x4xf32>, vector<16x4xf32> -> vector<16x12xf32>
    %710 = vector.shape_cast %709 : vector<16x12xf32> to vector<8x2x12xf32>
    %c0_136 = arith.constant 0 : index
    %c0_137 = arith.constant 0 : index
    %c0_138 = arith.constant 0 : index
    %711 = vector.load %arg19[%c0_136, %c0_137, %c0_138] : memref<8x2x12xf32, #tpu.memory_space<vmem>>, vector<8x2x12xf32>
    tpu.vector_store %arg19[%c0_136, %c0_137, %c0_138], %710 {strides = array<i32>} : memref<8x2x12xf32, #tpu.memory_space<vmem>>, vector<8x2x12xf32>,
    return
  }
}

</mosaic_0001>

<bundles_post_ra>
// kernel: tpu_custom_call.1
= control target key start
LH: loop header
LB: loop body
LE: loop exit
PB: predicated region body
PF: predicated region fallthrough
CT: control target
= control target key end

     0   :  { %s7832_s0 = inlined_call_operand.vmem [shape: f32[8,2,4], index: 0, kind: input, shape index: {}]   ;;  %s7833_s1 = inlined_call_operand.hbm [shape: f32[2,8], index: 1, kind: input, shape index: {}]   ;;  %s7834_s2 = inlined_call_operand.hbm [shape: f32[4,128], index: 2, kind: input, shape index: {}]   ;;  %s7835_s3 = inlined_call_operand.vmem [shape: f32[32,128], index: 3, kind: input, shape index: {}]   ;;  %s7836_s4 = inlined_call_operand.hbm [shape: f32[1,128], index: 4, kind: input, shape index: {}]   ;;  %s7837_s5 = inlined_call_operand.vmem [shape: f32[32,64], index: 5, kind: input, shape index: {}]   ;;  %s7838_s6 = inlined_call_operand.hbm [shape: f32[16,64], index: 6, kind: input, shape index: {}]   ;;  %s7839_s7 = inlined_call_operand.hbm [shape: f32[1,64], index: 7, kind: input, shape index: {}]   ;;  %s7840_s8 = inlined_call_operand.hbm [shape: f32[16,16], index: 8, kind: input, shape index: {}]   ;;  %s7841_s9 = inlined_call_operand.hbm [shape: f32[1,16], index: 9, kind: input, shape index: {}]   ;;  %s7842_s10 = inlined_call_operand.hbm [shape: f32[8,64], index: 10, kind: input, shape index: {}]   ;;  %s7843_s11 = inlined_call_operand.vmem [shape: f32[16,64], index: 11, kind: input, shape index: {}]   ;;  %s7844_s12 = inlined_call_operand.hbm [shape: f32[1,64], index: 12, kind: input, shape index: {}]   ;;  %s7845_s13 = inlined_call_operand.hbm [shape: f32[16,128], index: 13, kind: input, shape index: {}]   ;;  %s7846_s14 = inlined_call_operand.vmem [shape: f32[32,128], index: 14, kind: input, shape index: {}]   ;;  %s7847_s15 = inlined_call_operand.hbm [shape: f32[1,128], index: 15, kind: input, shape index: {}]   ;;  %s7848_s16 = inlined_call_operand.vmem [shape: f32[32,12], index: 16, kind: input, shape index: {}]   ;;  %s7849_s17 = inlined_call_operand.vmem [shape: f32[1,12], index: 17, kind: input, shape index: {}]   ;;  %s7850_s18 = inlined_call_operand.hbm [shape: f32[2,16], index: 18, kind: output, shape index: {0}]   ;;  %s7851_s19 = inlined_call_operand.hbm [shape: f32[8,2,12], index: 19, kind: output, shape index: {1}]  }
   0x1   :  { %7857 = sst [smem:[#allocation31_spill]] %s7832_s0 }
   0x2   :  { %7858 = sst [smem:[#allocation32_spill]] %s7833_s1 }
   0x3   :  { %7859 = sst [smem:[#allocation33_spill]] %s7834_s2 }
   0x4   :  { %7860 = sst [smem:[#allocation34_spill]] %s7835_s3 }
   0x5   :  { %7861 = sst [smem:[#allocation35_spill]] %s7851_s19 }
   0x6   :  { %25 = vsyncpa [#allocation3], 0 }
   0x7   :  { %26 = vsyncpa [#allocation6], 0 }
   0x8   :  { %27 = vsyncpa [#allocation9], 0 }
   0x9   :  { %28 = vsyncpa [#allocation12], 0 }
   0xa   :  { %29 = vsyncpa [#allocation15], 0 }
   0xb   :  { %30 = vsyncpa [#allocation18], 0 }
   0xc   :  { %31 = vsyncpa [#allocation4], 0 }
   0xd   :  { %32 = vsyncpa [#allocation22], 0  ;;  %s6821_s0 = smov [#allocation5]   ;;  %s6822_s20 = smov [#allocation8]  }
   0xe   :  { %s51_s30 = sshll.u32 %s6821_s0, 4  ;;  %s74_s21 = sshll.u32 %s6822_s20, 4  ;;  %s52_s30 = int_to_ptr.vmem [resolvable:$true] %s51_s30  ;;  %s6947_s21 = int_to_ptr.vmem [resolvable:$true] %s74_s21 }
   0xf   :  { %s7862_s2 = sld [smem:[#allocation33_spill]] }
  0x15   :  { %s6519_s23 = scalar_lea.hbm %s7862_s2, 64 }
  0x16   :  { %p6520_p0 = scmp.ne.s32.totalorder %s7862_s2, %s6519_s23  ;;  %p6523_p1 = scmp.lt.u32.totalorder %s6519_s23, %s7862_s2 }
  0x18   :  { %p6525_p2 = pnand %p6523_p1, %p6520_p0 }
  0x1a   :  { %6528 = shalt.err (!%p6525_p2)
}
  0x1b   :  { %s6529_s27 = scalar_lea.vmem %s52_s30, 64  ;;  %p6534_p4 = scmp.lt.s32.totalorder %s52_s30, %s52_s30 }
  0x1c   :  { %p6530_p3 = scmp.ne.s32.totalorder %s52_s30, %s6529_s27  ;;  %p6535_p5 = scmp.lt.s32.totalorder %s6529_s27, %s6529_s27 }
  0x1e   :  { %p6536_p6 = por %p6535_p5, %p6534_p4 }
  0x20   :  { %p6537_p7 = pnand %p6536_p6, %p6530_p3 }
  0x22   :  { %6540 = shalt.err (!%p6537_p7)
}
  0x23   :  { %54 = dma.hbm_to_vmem [thread:$0]  %s7862_s2, 64, %s52_s30, [#allocation6]  }
  0x24   :  { %s6541_s1 = scalar_lea.hbm %s7838_s6, 256 }
  0x25   :  { %p6542_p8 = scmp.ne.s32.totalorder %s7838_s6, %s6541_s1  ;;  %p6545_p9 = scmp.lt.u32.totalorder %s6541_s1, %s7838_s6 }
  0x27   :  { %p6547_p10 = pnand %p6545_p9, %p6542_p8 }
  0x29   :  { %6550 = shalt.err (!%p6547_p10)
}
  0x2a   :  { %s6551_s3 = scalar_lea.vmem %s6947_s21, 256  ;;  %p6556_p12 = scmp.lt.s32.totalorder %s6947_s21, %s6947_s21 }
  0x2b   :  { %p6552_p11 = scmp.ne.s32.totalorder %s6947_s21, %s6551_s3  ;;  %p6557_p13 = scmp.lt.s32.totalorder %s6551_s3, %s6551_s3 }
  0x2d   :  { %p6558_p0 = por %p6557_p13, %p6556_p12 }
  0x2f   :  { %p6559_p1 = pnand %p6558_p0, %p6552_p11 }
  0x31   :  { %6562 = shalt.err (!%p6559_p1)
}
  0x32   :  { %s6823_s30 = smov 128   ;;  %s6824_s2 = smov 8  }
  0x33   :  { %80 = dma.hbm_to_vmem [thread:$0]  %s7838_s6, 256, %s6947_s21, [#allocation9], %s6823_s30, %s6823_s30, %s6824_s2  }
  0x34   :  { %s6825_s28 = smov [#allocation11]   ;;  %s6826_s0 = smov [#allocation14]  }
  0x35   :  { %s96_s29 = sshll.u32 %s6825_s28, 4  ;;  %s119_s20 = sshll.u32 %s6826_s0, 4  ;;  %s97_s29 = int_to_ptr.vmem [resolvable:$true] %s96_s29  ;;  %s120_s20 = int_to_ptr.vmem [resolvable:$true] %s119_s20 }
  0x36   :  { %s6563_s24 = scalar_lea.hbm %s7840_s8, 256 }
  0x37   :  { %p6564_p2 = scmp.ne.s32.totalorder %s7840_s8, %s6563_s24  ;;  %p6567_p3 = scmp.lt.u32.totalorder %s6563_s24, %s7840_s8 }
  0x39   :  { %p6569_p4 = pnand %p6567_p3, %p6564_p2 }
  0x3b   :  { %6572 = shalt.err (!%p6569_p4)
}
  0x3c   :  { %s6573_s6 = scalar_lea.vmem %s97_s29, 256  ;;  %p6578_p6 = scmp.lt.s32.totalorder %s97_s29, %s97_s29 }
  0x3d   :  { %p6574_p5 = scmp.ne.s32.totalorder %s97_s29, %s6573_s6  ;;  %p6579_p7 = scmp.lt.s32.totalorder %s6573_s6, %s6573_s6 }
  0x3f   :  { %p6580_p8 = por %p6579_p7, %p6578_p6 }
  0x41   :  { %p6581_p9 = pnand %p6580_p8, %p6574_p5 }
  0x43   :  { %6584 = shalt.err (!%p6581_p9)
}
  0x44   :  { %102 = dma.hbm_to_vmem [thread:$0]  %s7840_s8, 256, %s97_s29, [#allocation12], %s6823_s30, %s6823_s30, %s6824_s2  }
  0x45   :  { %s6585_s19 = scalar_lea.hbm %s7842_s10, 128 }
  0x46   :  { %p6586_p10 = scmp.ne.s32.totalorder %s7842_s10, %s6585_s19  ;;  %p6589_p11 = scmp.lt.u32.totalorder %s6585_s19, %s7842_s10 }
  0x48   :  { %p6591_p12 = pnand %p6589_p11, %p6586_p10 }
  0x4a   :  { %6594 = shalt.err (!%p6591_p12)
}
  0x4b   :  { %s6595_s23 = scalar_lea.vmem %s120_s20, 128  ;;  %p6600_p0 = scmp.lt.s32.totalorder %s120_s20, %s120_s20 }
  0x4c   :  { %p6596_p13 = scmp.ne.s32.totalorder %s120_s20, %s6595_s23  ;;  %p6601_p1 = scmp.lt.s32.totalorder %s6595_s23, %s6595_s23 }
  0x4e   :  { %p6602_p2 = por %p6601_p1, %p6600_p0 }
  0x50   :  { %p6603_p3 = pnand %p6602_p2, %p6596_p13 }
  0x52   :  { %6606 = shalt.err (!%p6603_p3)
}
  0x53   :  { %122 = dma.hbm_to_vmem [thread:$0]  %s7842_s10, 128, %s120_s20, [#allocation15]  }
  0x54   :  { %s6827_s25 = smov [#allocation17]   ;;  %s6828_s6 = smov [#allocation2]  }
  0x55   :  { %s140_s3 = sshll.u32 %s6827_s25, 4  ;;  %s41_s21 = sshll.u32 %s6828_s6, 4  ;;  %s141_s3 = int_to_ptr.vmem [resolvable:$true] %s140_s3  ;;  %s42_s21 = int_to_ptr.vmem [resolvable:$true] %s41_s21 }
  0x56   :  { %s6607_s28 = scalar_lea.hbm %s7845_s13, 256 }
  0x57   :  { %p6608_p4 = scmp.ne.s32.totalorder %s7845_s13, %s6607_s28  ;;  %p6611_p5 = scmp.lt.u32.totalorder %s6607_s28, %s7845_s13 }
  0x59   :  { %p6613_p6 = pnand %p6611_p5, %p6608_p4 }
  0x5b   :  { %6616 = shalt.err (!%p6613_p6)
}
  0x5c   :  { %s6617_s10 = scalar_lea.vmem %s141_s3, 256  ;;  %p6622_p8 = scmp.lt.s32.totalorder %s141_s3, %s141_s3 }
  0x5d   :  { %p6618_p7 = scmp.ne.s32.totalorder %s141_s3, %s6617_s10  ;;  %p6623_p9 = scmp.lt.s32.totalorder %s6617_s10, %s6617_s10 }
  0x5f   :  { %p6624_p10 = por %p6623_p9, %p6622_p8 }
  0x61   :  { %p6625_p11 = pnand %p6624_p10, %p6618_p7 }
  0x63   :  { %6628 = shalt.err (!%p6625_p11)
}
  0x64   :  { %146 = dma.hbm_to_vmem [thread:$0]  %s7845_s13, 256, %s141_s3, [#allocation18], %s6823_s30, %s6823_s30, %s6824_s2  }
  0x65   :  { %s7863_s29 = sld [smem:[#allocation32_spill]] }
  0x6b   :  { %s6629_s25 = scalar_lea.hbm %s7863_s29, 32 }
  0x6c   :  { %p6630_p12 = scmp.ne.s32.totalorder %s7863_s29, %s6629_s25  ;;  %p6633_p13 = scmp.lt.u32.totalorder %s6629_s25, %s7863_s29 }
  0x6e   :  { %p6635_p0 = pnand %p6633_p13, %p6630_p12 }
  0x70   :  { %6638 = shalt.err (!%p6635_p0)
}
  0x71   :  { %s6639_s19 = scalar_lea.vmem %s42_s21, 32  ;;  %p6644_p2 = scmp.lt.s32.totalorder %s42_s21, %s42_s21 }
  0x72   :  { %p6640_p1 = scmp.ne.s32.totalorder %s42_s21, %s6639_s19  ;;  %p6645_p3 = scmp.lt.s32.totalorder %s6639_s19, %s6639_s19 }
  0x74   :  { %p6646_p4 = por %p6645_p3, %p6644_p2 }
  0x76   :  { %p6647_p5 = pnand %p6646_p4, %p6640_p1 }
  0x78   :  { %6650 = shalt.err (!%p6647_p5)
}
  0x79   :  { %44 = dma.hbm_to_vmem [thread:$0]  %s7863_s29, 32, %s42_s21, [#allocation3]  }
  0x7a   :  { %s6829_s2 = smov [#allocation7]   ;;  %s6830_s0 = smov [#allocation10]  }
  0x7b   :  { %s63_s3 = sshll.u32 %s6829_s2, 4  ;;  %s87_s1 = sshll.u32 %s6830_s0, 4  ;;  %s64_s3 = int_to_ptr.vmem [resolvable:$true] %s63_s3  ;;  %s88_s1 = int_to_ptr.vmem [resolvable:$true] %s87_s1 }
  0x7c   :  { %s6651_s20 = scalar_lea.hbm %s7836_s4, 16 }
  0x7d   :  { %p6652_p6 = scmp.ne.s32.totalorder %s7836_s4, %s6651_s20  ;;  %p6655_p7 = scmp.lt.u32.totalorder %s6651_s20, %s7836_s4 }
  0x7f   :  { %p6657_p8 = pnand %p6655_p7, %p6652_p6 }
  0x81   :  { %6660 = shalt.err (!%p6657_p8)
}
  0x82   :  { %s6661_s21 = scalar_lea.vmem %s64_s3, 16  ;;  %s6665_s29 = scalar_lea.vmem %s64_s3, 32 }
  0x83   :  { %p6662_p9 = scmp.ne.s32.totalorder %s64_s3, %s6661_s21  ;;  %p6666_p10 = scmp.lt.s32.totalorder %s64_s3, %s64_s3 }
  0x84   :  { %p6667_p11 = scmp.lt.s32.totalorder %s6665_s29, %s6661_s21 }
  0x86   :  { %p6668_p12 = por %p6667_p11, %p6666_p10 }
  0x88   :  { %p6669_p13 = pnand %p6668_p12, %p6662_p9 }
  0x8a   :  { %6672 = shalt.err (!%p6669_p13)
}
  0x8b   :  { %66 = dma.hbm_to_vmem [thread:$0]  %s7836_s4, 16, %s64_s3, [#allocation6]  }
  0x8c   :  { %s6673_s19 = scalar_lea.hbm %s7839_s7, 16 }
  0x8d   :  { %p6674_p0 = scmp.ne.s32.totalorder %s7839_s7, %s6673_s19  ;;  %p6677_p1 = scmp.lt.u32.totalorder %s6673_s19, %s7839_s7 }
  0x8f   :  { %p6679_p2 = pnand %p6677_p1, %p6674_p0 }
  0x91   :  { %6682 = shalt.err (!%p6679_p2)
}
  0x92   :  { %s6683_s22 = scalar_lea.vmem %s88_s1, 16  ;;  %s6687_s10 = scalar_lea.vmem %s88_s1, 32 }
  0x93   :  { %p6684_p3 = scmp.ne.s32.totalorder %s88_s1, %s6683_s22  ;;  %p6688_p4 = scmp.lt.s32.totalorder %s88_s1, %s88_s1 }
  0x94   :  { %p6689_p5 = scmp.lt.s32.totalorder %s6687_s10, %s6683_s22 }
  0x96   :  { %p6690_p6 = por %p6689_p5, %p6688_p4 }
  0x98   :  { %p6691_p7 = pnand %p6690_p6, %p6684_p3 }
  0x9a   :  { %6694 = shalt.err (!%p6691_p7)
}
  0x9b   :  { %90 = dma.hbm_to_vmem [thread:$0]  %s7839_s7, 16, %s88_s1, [#allocation9]  }
  0x9c   :  { %s6831_s20 = smov [#allocation13]   ;;  %s6832_s23 = smov [#allocation16]  }
  0x9d   :  { %s109_s24 = sshll.u32 %s6831_s20, 4  ;;  %s131_s8 = sshll.u32 %s6832_s23, 4  ;;  %s110_s24 = int_to_ptr.vmem [resolvable:$true] %s109_s24  ;;  %s132_s8 = int_to_ptr.vmem [resolvable:$true] %s131_s8 }
  0x9e   :  { %s6695_s29 = scalar_lea.hbm %s7841_s9, 16 }
  0x9f   :  { %p6696_p8 = scmp.ne.s32.totalorder %s7841_s9, %s6695_s29  ;;  %p6699_p9 = scmp.lt.u32.totalorder %s6695_s29, %s7841_s9 }
  0xa1   :  { %p6701_p10 = pnand %p6699_p9, %p6696_p8 }
  0xa3   :  { %6704 = shalt.err (!%p6701_p10)
}
  0xa4   :  { %s6705_s7 = scalar_lea.vmem %s110_s24, 16  ;;  %s6709_s1 = scalar_lea.vmem %s110_s24, 32 }
  0xa5   :  { %p6706_p11 = scmp.ne.s32.totalorder %s110_s24, %s6705_s7  ;;  %p6710_p12 = scmp.lt.s32.totalorder %s110_s24, %s110_s24 }
  0xa6   :  { %p6711_p13 = scmp.lt.s32.totalorder %s6709_s1, %s6705_s7 }
  0xa8   :  { %p6712_p0 = por %p6711_p13, %p6710_p12 }
  0xaa   :  { %p6713_p1 = pnand %p6712_p0, %p6706_p11 }
  0xac   :  { %6716 = shalt.err (!%p6713_p1)
}
  0xad   :  { %112 = dma.hbm_to_vmem [thread:$0]  %s7841_s9, 16, %s110_s24, [#allocation12]  }
  0xae   :  { %s6717_s0 = scalar_lea.hbm %s7844_s12, 16 }
  0xaf   :  { %p6718_p2 = scmp.ne.s32.totalorder %s7844_s12, %s6717_s0  ;;  %p6721_p3 = scmp.lt.u32.totalorder %s6717_s0, %s7844_s12 }
  0xb1   :  { %p6723_p4 = pnand %p6721_p3, %p6718_p2 }
  0xb3   :  { %6726 = shalt.err (!%p6723_p4)
}
  0xb4   :  { %s6727_s20 = scalar_lea.vmem %s132_s8, 16  ;;  %s6731_s23 = scalar_lea.vmem %s132_s8, 32 }
  0xb5   :  { %p6728_p5 = scmp.ne.s32.totalorder %s132_s8, %s6727_s20  ;;  %p6732_p6 = scmp.lt.s32.totalorder %s132_s8, %s132_s8 }
  0xb6   :  { %p6733_p7 = scmp.lt.s32.totalorder %s6731_s23, %s6727_s20 }
  0xb8   :  { %p6734_p8 = por %p6733_p7, %p6732_p6 }
  0xba   :  { %p6735_p9 = pnand %p6734_p8, %p6728_p5 }
  0xbc   :  { %6738 = shalt.err (!%p6735_p9)
}
  0xbd   :  { %134 = dma.hbm_to_vmem [thread:$0]  %s7844_s12, 16, %s132_s8, [#allocation15]  }
  0xbe   :  { %s6833_s25 = smov [#allocation19]   ;;  %s6739_s26 = scalar_lea.hbm %s7847_s15, 16 }
  0xbf   :  { %s155_s21 = sshll.u32 %s6833_s25, 4  ;;  %p6740_p10 = scmp.ne.s32.totalorder %s7847_s15, %s6739_s26  ;;  %s156_s21 = int_to_ptr.vmem [resolvable:$true] %s155_s21 }
  0xc0   :  { %p6743_p11 = scmp.lt.u32.totalorder %s6739_s26, %s7847_s15 }
  0xc2   :  { %p6745_p12 = pnand %p6743_p11, %p6740_p10 }
  0xc4   :  { %6748 = shalt.err (!%p6745_p12)
}
  0xc5   :  { %s6749_s19 = scalar_lea.vmem %s156_s21, 16  ;;  %s6753_s12 = scalar_lea.vmem %s156_s21, 32 }
  0xc6   :  { %p6750_p13 = scmp.ne.s32.totalorder %s156_s21, %s6749_s19  ;;  %p6754_p0 = scmp.lt.s32.totalorder %s156_s21, %s156_s21 }
  0xc7   :  { %p6755_p1 = scmp.lt.s32.totalorder %s6753_s12, %s6749_s19 }
  0xc9   :  { %p6756_p2 = por %p6755_p1, %p6754_p0 }
  0xcb   :  { %p6757_p3 = pnand %p6756_p2, %p6750_p13 }
  0xcd   :  { %6760 = shalt.err (!%p6757_p3)
}
  0xce   :  { %158 = dma.hbm_to_vmem [thread:$0]  %s7847_s15, 16, %s156_s21, [#allocation18]  }
  0xcf   :  { %6805 = dma.done.wait [#allocation3], 32  }
  0xd0   :  { %6806 = vsyncadd [#allocation3], 4294967264 }
  0xd1   :  { %6807 = dma.done.wait [#allocation6], 80  }
  0xd2   :  { %6808 = vsyncadd [#allocation6], 4294967216 }
  0xd3   :  { %6809 = dma.done.wait [#allocation9], 272  }
  0xd4   :  { %6810 = vsyncadd [#allocation9], 4294967024 }
  0xd5   :  { %6811 = dma.done.wait [#allocation12], 272  }
  0xd6   :  { %6812 = vsyncadd [#allocation12], 4294967024 }
  0xd7   :  { %6813 = dma.done.wait [#allocation15], 144  }
  0xd8   :  { %6814 = vsyncadd [#allocation15], 4294967152 }
  0xd9   :  { %6815 = dma.done.wait [#allocation18], 272  }
  0xda   :  { %6816 = vsyncadd [#allocation18], 4294967024  ;;  %v225_v0 = vlaneseq  ;;  %v6834_v1 = vmov 0.0|0.0   ;;  %v6835_v2 = vmov 1983009808   ;;  %vm6836_vm0 = vmmov 0  }
  0xdb   :  { %5952 = vmatprep.subr.bf16.mxu1 %v6834_v1  ;;  %v223_v3 = vunpack.c.l.s4 %v6835_v2  ;;  %v6837_v4 = vmov 0.0   ;;  %vm259_vm1 = vcmask 1043456   ;;  %s7864_s2 = sld [smem:[#allocation34_spill]]  ;;  %v204_v9 = vld [vmem:[#allocation5] sm:$0xf]  ;;  %s7865_s3 = sld [smem:[#allocation31_spill]] }
  0xdc   :  { %5505 = vmatprep.mubr.msk.f32.mxu1 %vm6836_vm0, %v6837_v4  ;;  %v226_v6 = vshrl.u32 %v225_v0, 7  ;;  %5492 = vmatprep.subr.msk.mxu0 %vm259_vm1, %v204_v9  ;;  %vm254_vm2 = vcmask 31744   ;;  %v5197_v33 = vld [vmem:[#allocation7] ss:$0 sm:$0xff]  ;;  %s6838_s30 = smov 32   ;;  %v386_v52 = vld [vmem:[%s7837_s5] sm:$0xff] }
  0xdd   :  { %v224_v5 = vunpack.c.0.s8 %v223_v3  ;;  %5493 = vmatpush3.msk.msra.mxu0 %vm259_vm1, %v204_v9  ;;  %v387_v53 = vld [vmem:[%s7837_s5 + $0x8] sm:$0xff]  ;;  %v388_v54 = vld [vmem:[%s7837_s5 + $0x10] sm:$0xff]  ;;  %v389_v56 = vld [vmem:[%s7837_s5 + $0x18] sm:$0xff]  ;;  %s6839_s9 = smov 64   ;;  %vm393_vm3 = vcmask 261120   ;;  %s6840_s5 = smov 80  }
  0xde   :  { %5958 = vmatprep.subr.bf16.mxu0 %v6834_v1  ;;  %v7182_v55 = vpack.c.bf16 %v387_v53, %v386_v52  ;;  %v7188_v57 = vpack.c.bf16 %v389_v56, %v388_v54  ;;  %v390_v62 = vld [vmem:[#allocation8] sm:$0xff]  ;;  %v391_v63 = vld [vmem:[#allocation8 + $0x8] sm:$0xff]  ;;  %s6841_s24 = smov 16   ;;  %s6842_s25 = smov 96   ;;  %vm580_vm4 = vcmask 130048   ;;  %vm2701_vm5 = vcmask 123904  }
  0xdf   :  { %v7104_v10 = vsub.s32 %v224_v5, %v226_v6  ;;  %v7196_v0 = vpack.c.bf16 %v391_v63, %v390_v62  ;;  %s6843_s21 = smov 120   ;;  %vm2721_vm6 = vcmask 64512   ;;  %vm4978_vm7 = vcmask 1041408   ;;  %s6844_s20 = smov [#allocation20]  }
  0xe0   :  { %vm4981_vm8 = vcmask 1045504  }
  0xe1   :  { %v382_v7 = vld [vmem:[%s7864_s2] sm:$0xff]  ;;  %v383_v8 = vld [vmem:[%s7864_s2 + $0x8] sm:$0xff]  ;;  %v384_v23 = vld [vmem:[%s7864_s2 + $0x10] sm:$0xff] }
  0xe2   :  { %v7106_v11 = vpack.c.bf16 %v383_v8, %v382_v7  ;;  %v196_v12 = vld [vmem:[%s7865_s3] sm:$0x3]  ;;  %v197_v13 = vld [vmem:[%s7865_s3 + $0x2] sm:$0x3]  ;;  %v198_v14 = vld [vmem:[%s7865_s3 + $0x4] sm:$0x3] }
  0xe3   :  { %v199_v15 = vld [vmem:[%s7865_s3 + $0x6] sm:$0x3]  ;;  %v220_v16 = vcombine.low %v196_v12, %v197_v13  ;;  %v200_v17 = vld [vmem:[%s7865_s3 + $0x8] sm:$0x3]  ;;  %v201_v18 = vld [vmem:[%s7865_s3 + $0xa] sm:$0x3] }
  0xe4   :  { %5954 = vmatpush3.bf16.msra.mxu1 %v7106_v11  ;;  %v221_v19 = vcombine.low %v198_v14, %v199_v15  ;;  %v202_v20 = vld [vmem:[%s7865_s3 + $0xc] sm:$0x3]  ;;  %v203_v21 = vld [vmem:[%s7865_s3 + $0xe] sm:$0x3]  ;;  %v237_v22 = vcombine.low %v200_v17, %v201_v18  ;;  %v385_v26 = vld [vmem:[%s7864_s2 + $0x18] sm:$0xff] }
  0xe5   :  { %v228_v24 = vrot.slane %v220_v16, %v7104_v10  ;;  %v238_v25 = vcombine.low %v202_v20, %v203_v21  ;;  %5955 = vmatprep.subr.bf16.mxu1 %v6834_v1  ;;  %v7146_v29 = vpack.c.bf16 %v385_v26, %v384_v23  ;;  %v7217_v8 = vld [vmem:[#allocation10] ss:$0 sm:$0xff] }
  0xe6   :  { %v235_v27 = vrot.slane %v221_v19, %v7104_v10  ;;  %v245_v28 = vrot.slane %v237_v22, %v7104_v10 }
  0xe7   :  { %v252_v30 = vrot.slane %v238_v25, %v7104_v10 }
  0xe8   :  { %v236_v31 = vcombine.low %v228_v24, %v235_v27  ;;  %5957 = vmatpush3.bf16.msra.mxu1 %v7146_v29 }
  0xe9   :  { %v253_v32 = vcombine.low %v245_v28, %v252_v30  ;;  %5967 = vmatprep.subr.bf16.mxu1 %v6834_v1 }
  0xea   :  { %5494 = vmatprep.mubr.msk.f32.mxu0 %vm254_vm2, %v236_v31 }
  0xeb   :  { %5495 = vmatmul.mubr.msk.f32.vlgmr.msra.gmra.mrb[0].mxu0 %vm254_vm2, %v253_v32  ;;  %5506 = vmatmul.mubr.f32.vlgmr.msra.gmra.mrb[0].mxu1 %v6837_v4 }
  0xec   :  { %5969 = vmatpush3.bf16.msra.mxu1 %v7106_v11  ;;  %5516 = vmatprep.mubr.msk.f32.mxu0 %vm6836_vm0, %v6837_v4 }
  0xed   :  { %5970 = vmatprep.subr.bf16.mxu1 %v6834_v1  ;;  %5534 = vmatprep.mubr.msk.f32.mxu1 %vm6836_vm0, %v6837_v4 }
  0xee   :  { %5960 = vmatpush3.bf16.msra.mxu0 %v7182_v55 }
  0xef   :  { %5961 = vmatprep.subr.bf16.mxu0 %v6834_v1 }
  0xf0   :  { %5972 = vmatpush3.bf16.msra.mxu1 %v7146_v29 }
  0xf1   :  { %5982 = vmatprep.subr.bf16.mxu1 %v6834_v1 }
  0xf2   :  { %5963 = vmatpush3.bf16.msra.mxu0 %v7188_v57 }
  0xf3   :  { %5964 = vmatprep.subr.bf16.mxu0 %v6834_v1 }
 0x1be   :  { %v5496_v34 = vpop.f32.mrb[0].mxu0  ;;  %v463_v35 = vpop.f32.mrb[0].mxu1 }
 0x1bf   :  { %v7162_v36 = vadd.f32 %v5496_v34, %v5197_v33  ;;  %v329_v37 = vpop.f32.mrb[1].mxu0  ;;  %v5507_v38 = vpop.f32.mrb[1].mxu1 }
 0x1c0   :  { %v7164_v39 = vadd.f32 %v5197_v33, %v329_v37 }
 0x1c2   :  { %v347_v40 = vrot.slane %v7164_v39, %v7104_v10 }
 0x1c4   :  { %v467_v41 = vadd.f32 %v463_v35, %v347_v40  ;;  %v355_v3 = vcombine.high %v347_v40, %v347_v40 }
 0x1c6   :  { %6253 = vtanh.f32 %v467_v41  ;;  %v5201_v43 = vmul.f32 -1.442695, %v467_v41 }
 0x1c8   :  { %6255 = vpow2.f32 %v5201_v43 }
 0x1d0   :  { %v6254_v42 = vpop.eup %6253 }
 0x1d1   :  { %477 = vrot.lane.b32.xlu0 %v6254_v42, %s6838_s30 }
 0x1d2   :  { %v6256_v44 = vpop.eup %6255 }
 0x1d3   :  { %v471_v45 = vadd.f32 1.0, %v6256_v44 }
 0x1d5   :  { %6257 = vrcp.f32 %v471_v45 }
 0x1df   :  { %v6258_v46 = vpop.eup %6257 }
 0x1e0   :  { %v475_v49 = vmul.f32 0.0, %v6258_v46 }
 0x243   :  { %v478_v47 = vpop.permute.xlu0 %477 }
 0x244   :  { %v480_v48 = vmul.f32 %v6258_v46, %v478_v47 }
 0x246   :  { %482 = vrot.lane.b32.xlu0 %v480_v48, %s6838_s30 }
 0x2b8   :  { %v483_v50 = vpop.permute.xlu0 %482 }
 0x2b9   :  { %v7170_v51 = vadd.f32 %v483_v50, %v475_v49 }
 0x2bb   :  { %6259 = vtanh.f32 %v7170_v51 }
 0x2c5   :  { %v6260_v58 = vpop.eup %6259 }
 0x2c6   :  { %488 = vrot.lane.b32.xlu1 %v6260_v58, %s6838_s30 }
 0x338   :  { %v489_v59 = vpop.permute.xlu1 %488 }
 0x339   :  { %v491_v60 = vmul.f32 %v6258_v46, %v489_v59  ;;  %v340_v46 = vcombine.high %v7164_v39, %v7164_v39 }
 0x33b   :  { %v505_v61 = vrot.slane %v491_v60, %v7104_v10  ;;  %v7258_v47 = vrot.slane %v340_v46, %v7104_v10 }
 0x33d   :  { %506 = vrot.lane.b32.xlu1 %v505_v61, %s6839_s9 }
 0x3af   :  { %v507_v2 = vpop.permute.xlu1 %506 }
 0x3b0   :  { %5517 = vmatmul.mubr.msk.f32.vlgmr.msra.gmra.mrb[2].mxu0 %vm393_vm3, %v507_v2  ;;  %5535 = vmatmul.mubr.msk.f32.vlgmr.msra.gmra.mrb[2].mxu1 %vm393_vm3, %v507_v2 }
 0x3b1   :  { %5966 = vmatpush3.bf16.msra.mxu0 %v7196_v0  ;;  %5523 = vmatprep.mubr.msk.f32.mxu0 %vm6836_vm0, %v6837_v4 }
 0x3b2   :  { %5973 = vmatprep.subr.bf16.mxu0 %v6834_v1  ;;  %5984 = vmatpush3.bf16.msra.mxu1 %v7106_v11 }
 0x3b3   :  { %5985 = vmatprep.subr.bf16.mxu1 %v6834_v1  ;;  %5563 = vmatprep.mubr.msk.f32.mxu1 %vm6836_vm0, %v6837_v4 }
 0x3b6   :  { %5987 = vmatpush3.bf16.msra.mxu1 %v7146_v29 }
 0x3b7   :  { %5988 = vmatprep.subr.bf16.mxu1 %v6834_v1 }
 0x3b8   :  { %5524 = vmatmul.mubr.f32.vlgmr.msra.gmra.mrb[2].mxu0 %v6837_v4 }
 0x3b9   :  { %5975 = vmatpush3.bf16.msra.mxu0 %v7182_v55  ;;  %5545 = vmatprep.mubr.msk.f32.mxu0 %vm6836_vm0, %v6837_v4 }
 0x3ba   :  { %5976 = vmatprep.subr.bf16.mxu0 %v6834_v1 }
 0x3bd   :  { %5978 = vmatpush3.bf16.msra.mxu0 %v7188_v57 }
 0x3be   :  { %5979 = vmatprep.subr.bf16.mxu0 %v6834_v1 }
 0x483   :  { %v744_v5 = vpop.f32.mrb[2].mxu1 }
 0x484   :  { %v748_v6 = vadd.f32 %v744_v5, %v355_v3  ;;  %v5536_v7 = vpop.f32.mrb[3].mxu1 }
 0x486   :  { %6261 = vtanh.f32 %v748_v6  ;;  %v5206_v16 = vmul.f32 -1.442695, %v748_v6 }
 0x48b   :  { %v649_v9 = vpop.f32.mrb[2].mxu0 }
 0x48c   :  { %v6179_v12 = vadd.f32 %v7217_v8, %v649_v9  ;;  %v5525_v13 = vpop.f32.mrb[3].mxu0 }
 0x48e   :  { %6263 = vtanh.f32 %v6179_v12  ;;  %v5204_v17 = vmul.f32 -1.442695, %v6179_v12 }
 0x48f   :  { %6265 = vpow2.f32 %v5206_v16 }
 0x490   :  { %v6262_v14 = vpop.eup %6261  ;;  %6267 = vpow2.f32 %v5204_v17 }
 0x491   :  { %758 = vrot.lane.b32.xlu0 %v6262_v14, %s6838_s30 }
 0x498   :  { %v6264_v15 = vpop.eup %6263 }
 0x499   :  { %663 = vrot.lane.b32.xlu1 %v6264_v15, %s6840_s5  ;;  %v6266_v18 = vpop.eup %6265 }
 0x49a   :  { %v752_v19 = vadd.f32 1.0, %v6266_v18  ;;  %v6268_v20 = vpop.eup %6267 }
 0x49b   :  { %v657_v21 = vadd.f32 1.0, %v6268_v20 }
 0x49c   :  { %6269 = vrcp.f32 %v752_v19 }
 0x49d   :  { %6271 = vrcp.f32 %v657_v21 }
 0x4a6   :  { %v6270_v22 = vpop.eup %6269 }
 0x4a7   :  { %v6272_v25 = vpop.eup %6271  ;;  %v756_v28 = vmul.f32 %v6270_v22, %v7170_v51 }
 0x4a8   :  { %v661_v32 = vmul.f32 0.0, %v6272_v25 }
 0x503   :  { %v759_v23 = vpop.permute.xlu0 %758 }
 0x504   :  { %v761_v24 = vmul.f32 %v6270_v22, %v759_v23 }
 0x506   :  { %763 = vrot.lane.b32.xlu0 %v761_v24, %s6838_s30 }
 0x50b   :  { %v664_v26 = vpop.permute.xlu1 %663 }
 0x50c   :  { %v666_v27 = vmul.f32 %v6272_v25, %v664_v26  ;;  %v356_v26 = vcombine.high %v7258_v47, %v7258_v47 }
 0x50e   :  { %668 = vrot.lane.b32.xlu1 %v666_v27, %s6841_s24 }
 0x578   :  { %v764_v30 = vpop.permute.xlu0 %763 }
 0x579   :  { %v7225_v31 = vadd.f32 %v764_v30, %v756_v28 }
 0x57b   :  { %6273 = vtanh.f32 %v7225_v31 }
 0x580   :  { %v669_v33 = vpop.permute.xlu1 %668 }
 0x581   :  { %v7228_v34 = vadd.f32 %v669_v33, %v661_v32 }
 0x583   :  { %6275 = vtanh.f32 %v7228_v34 }
 0x585   :  { %v6274_v35 = vpop.eup %6273 }
 0x586   :  { %769 = vrot.lane.b32.xlu0 %v6274_v35, %s6838_s30 }
 0x58d   :  { %v6276_v37 = vpop.eup %6275 }
 0x58e   :  { %674 = vrot.lane.b32.xlu1 %v6276_v37, %s6841_s24 }
 0x5f8   :  { %v770_v38 = vpop.permute.xlu0 %769 }
 0x5f9   :  { %v772_v40 = vmul.f32 %v6270_v22, %v770_v38 }
 0x5fb   :  { %v780_v41 = vrot.slane %v772_v40, %v7104_v10 }
 0x5fd   :  { %781 = vrot.lane.b32.xlu0 %v780_v41, %s6839_s9 }
 0x600   :  { %v675_v42 = vpop.permute.xlu1 %674 }
 0x601   :  { %v677_v43 = vmul.f32 %v6272_v25, %v675_v42 }
 0x603   :  { %856 = vrot.lane.b32.xlu1 %v677_v43, %s6842_s25 }
 0x66f   :  { %v782_v44 = vpop.permute.xlu0 %781 }
 0x670   :  { %5546 = vmatmul.mubr.msk.f32.vlgmr.msra.gmra.mrb[4].mxu0 %vm393_vm3, %v782_v44  ;;  %5564 = vmatmul.mubr.msk.f32.vlgmr.msra.gmra.mrb[4].mxu1 %vm393_vm3, %v782_v44 }
 0x671   :  { %5981 = vmatpush3.bf16.msra.mxu0 %v7196_v0  ;;  %5552 = vmatprep.mubr.msk.f32.mxu0 %vm6836_vm0, %v6837_v4 }
 0x672   :  { %5997 = vmatprep.subr.bf16.mxu0 %v6834_v1  ;;  %5990 = vmatpush3.bf16.msra.mxu1 %v7182_v55 }
 0x673   :  { %5991 = vmatprep.subr.bf16.mxu1 %v6834_v1  ;;  %5574 = vmatprep.mubr.msk.f32.mxu1 %vm6836_vm0, %v6837_v4 }
 0x675   :  { %v857_v45 = vpop.permute.xlu1 %856 }
 0x676   :  { %5993 = vmatpush3.bf16.msra.mxu1 %v7188_v57 }
 0x677   :  { %5994 = vmatprep.subr.bf16.mxu1 %v6834_v1 }
 0x678   :  { %5553 = vmatmul.mubr.msk.f32.vlgmr.msra.gmra.mrb[4].mxu0 %vm580_vm4, %v857_v45 }
 0x679   :  { %5999 = vmatpush3.bf16.msra.mxu0 %v7106_v11  ;;  %5592 = vmatprep.mubr.msk.f32.mxu0 %vm6836_vm0, %v6837_v4 }
 0x67a   :  { %6000 = vmatprep.subr.bf16.mxu0 %v6834_v1 }
 0x67d   :  { %6002 = vmatpush3.bf16.msra.mxu0 %v7146_v29 }
 0x67e   :  { %6003 = vmatprep.subr.bf16.mxu0 %v6834_v1 }
 0x743   :  { %v1021_v48 = vpop.f32.mrb[4].mxu1 }
 0x744   :  { %v1025_v49 = vadd.f32 %v1021_v48, %v7258_v47  ;;  %v5565_v50 = vpop.f32.mrb[5].mxu1 }
 0x746   :  { %6277 = vtanh.f32 %v1025_v49  ;;  %v5211_v39 = vmul.f32 -1.442695, %v1025_v49 }
 0x74b   :  { %v926_v51 = vpop.f32.mrb[4].mxu0 }
 0x74c   :  { %v6180_v52 = vadd.f32 %v7217_v8, %v926_v51  ;;  %v5554_v53 = vpop.f32.mrb[5].mxu0 }
 0x74e   :  { %6279 = vtanh.f32 %v6180_v52  ;;  %v5209_v58 = vmul.f32 -1.442695, %v6180_v52 }
 0x74f   :  { %6281 = vpow2.f32 %v5211_v39 }
 0x750   :  { %v6278_v54 = vpop.eup %6277  ;;  %6283 = vpow2.f32 %v5209_v58 }
 0x751   :  { %1035 = vrot.lane.b32.xlu0 %v6278_v54, %s6838_s30 }
 0x758   :  { %v6280_v56 = vpop.eup %6279 }
 0x759   :  { %940 = vrot.lane.b32.xlu1 %v6280_v56, %s6840_s5  ;;  %v6282_v59 = vpop.eup %6281 }
 0x75a   :  { %v1029_v60 = vadd.f32 1.0, %v6282_v59  ;;  %v6284_v61 = vpop.eup %6283 }
 0x75b   :  { %v934_v62 = vadd.f32 1.0, %v6284_v61 }
 0x75c   :  { %6285 = vrcp.f32 %v1029_v60 }
 0x75d   :  { %6287 = vrcp.f32 %v934_v62 }
 0x766   :  { %v6286_v63 = vpop.eup %6285 }
 0x767   :  { %v6288_v5 = vpop.eup %6287  ;;  %v1033_v9 = vmul.f32 %v6286_v63, %v7225_v31 }
 0x768   :  { %v938_v14 = vmul.f32 %v6288_v5, %v7228_v34 }
 0x7c3   :  { %v1036_v2 = vpop.permute.xlu0 %1035 }
 0x7c4   :  { %v1038_v3 = vmul.f32 %v6286_v63, %v1036_v2 }
 0x7c6   :  { %1040 = vrot.lane.b32.xlu0 %v1038_v3, %s6838_s30 }
 0x7cb   :  { %v941_v6 = vpop.permute.xlu1 %940 }
 0x7cc   :  { %v943_v7 = vmul.f32 %v6288_v5, %v941_v6 }
 0x7ce   :  { %945 = vrot.lane.b32.xlu1 %v943_v7, %s6841_s24 }
 0x838   :  { %v1041_v12 = vpop.permute.xlu0 %1040 }
 0x839   :  { %v7267_v13 = vadd.f32 %v1041_v12, %v1033_v9 }
 0x83b   :  { %6289 = vtanh.f32 %v7267_v13 }
 0x840   :  { %v946_v15 = vpop.permute.xlu1 %945 }
 0x841   :  { %v7271_v16 = vadd.f32 %v946_v15, %v938_v14 }
 0x843   :  { %6291 = vtanh.f32 %v7271_v16 }
 0x845   :  { %v6290_v17 = vpop.eup %6289 }
 0x846   :  { %1046 = vrot.lane.b32.xlu0 %v6290_v17, %s6838_s30 }
 0x84d   :  { %v6292_v18 = vpop.eup %6291 }
 0x84e   :  { %951 = vrot.lane.b32.xlu1 %v6292_v18, %s6841_s24 }
 0x8b8   :  { %v1047_v19 = vpop.permute.xlu0 %1046 }
 0x8b9   :  { %v1049_v20 = vmul.f32 %v6286_v63, %v1047_v19 }
 0x8bb   :  { %v1057_v21 = vrot.slane %v1049_v20, %v7104_v10 }
 0x8bd   :  { %1058 = vrot.lane.b32.xlu0 %v1057_v21, %s6839_s9 }
 0x8c0   :  { %v952_v22 = vpop.permute.xlu1 %951 }
 0x8c1   :  { %v954_v23 = vmul.f32 %v6288_v5, %v952_v22  ;;  %v7339_v5 = vrot.slane %v7162_v36, %v7104_v10 }
 0x8c3   :  { %1133 = vrot.lane.b32.xlu1 %v954_v23, %s6842_s25 }
 0x92f   :  { %v1059_v24 = vpop.permute.xlu0 %1058 }
 0x930   :  { %5575 = vmatmul.mubr.msk.f32.vlgmr.msra.gmra.mrb[6].mxu1 %vm393_vm3, %v1059_v24  ;;  %5593 = vmatmul.mubr.msk.f32.vlgmr.msra.gmra.mrb[6].mxu0 %vm393_vm3, %v1059_v24 }
 0x931   :  { %5996 = vmatpush3.bf16.msra.mxu1 %v7196_v0  ;;  %5581 = vmatprep.mubr.msk.f32.mxu1 %vm6836_vm0, %v6837_v4 }
 0x932   :  { %6012 = vmatprep.subr.bf16.mxu1 %v6834_v1  ;;  %6005 = vmatpush3.bf16.msra.mxu0 %v7182_v55 }
 0x933   :  { %6006 = vmatprep.subr.bf16.mxu0 %v6834_v1  ;;  %5603 = vmatprep.mubr.msk.f32.mxu0 %vm6836_vm0, %v6837_v4 }
 0x935   :  { %v1134_v25 = vpop.permute.xlu1 %1133 }
 0x936   :  { %6008 = vmatpush3.bf16.msra.mxu0 %v7188_v57 }
 0x937   :  { %6009 = vmatprep.subr.bf16.mxu0 %v6834_v1 }
 0x938   :  { %5582 = vmatmul.mubr.msk.f32.vlgmr.msra.gmra.mrb[6].mxu1 %vm580_vm4, %v1134_v25 }
 0x939   :  { %6014 = vmatpush3.bf16.msra.mxu1 %v7106_v11  ;;  %5621 = vmatprep.mubr.msk.f32.mxu1 %vm6836_vm0, %v6837_v4 }
 0x93a   :  { %6015 = vmatprep.subr.bf16.mxu1 %v6834_v1 }
 0x93d   :  { %6017 = vmatpush3.bf16.msra.mxu1 %v7146_v29 }
 0x93e   :  { %6018 = vmatprep.subr.bf16.mxu1 %v6834_v1 }
 0xa03   :  { %v1298_v27 = vpop.f32.mrb[6].mxu0 }
 0xa04   :  { %v1302_v28 = vadd.f32 %v1298_v27, %v356_v26  ;;  %v5594_v30 = vpop.f32.mrb[7].mxu0 }
 0xa06   :  { %6293 = vtanh.f32 %v1302_v28  ;;  %v5216_v37 = vmul.f32 -1.442695, %v1302_v28 }
 0xa0b   :  { %v1203_v31 = vpop.f32.mrb[6].mxu1 }
 0xa0c   :  { %v6181_v32 = vadd.f32 %v7217_v8, %v1203_v31  ;;  %v5583_v33 = vpop.f32.mrb[7].mxu1 }
 0xa0e   :  { %6295 = vtanh.f32 %v6181_v32  ;;  %v5214_v38 = vmul.f32 -1.442695, %v6181_v32 }
 0xa0f   :  { %6297 = vpow2.f32 %v5216_v37 }
 0xa10   :  { %v6294_v34 = vpop.eup %6293  ;;  %6299 = vpow2.f32 %v5214_v38 }
 0xa11   :  { %1312 = vrot.lane.b32.xlu0 %v6294_v34, %s6838_s30 }
 0xa18   :  { %v6296_v35 = vpop.eup %6295 }
 0xa19   :  { %1217 = vrot.lane.b32.xlu1 %v6296_v35, %s6840_s5  ;;  %v6298_v40 = vpop.eup %6297 }
 0xa1a   :  { %v1306_v41 = vadd.f32 1.0, %v6298_v40  ;;  %v6300_v42 = vpop.eup %6299 }
 0xa1b   :  { %v1211_v43 = vadd.f32 1.0, %v6300_v42 }
 0xa1c   :  { %6301 = vrcp.f32 %v1306_v41 }
 0xa1d   :  { %6303 = vrcp.f32 %v1211_v43 }
 0xa26   :  { %v6302_v44 = vpop.eup %6301 }
 0xa27   :  { %v6304_v47 = vpop.eup %6303  ;;  %v1310_v50 = vmul.f32 %v6302_v44, %v7267_v13 }
 0xa28   :  { %v1215_v53 = vmul.f32 %v6304_v47, %v7271_v16 }
 0xa83   :  { %v1313_v45 = vpop.permute.xlu0 %1312 }
 0xa84   :  { %v1315_v46 = vmul.f32 %v6302_v44, %v1313_v45 }
 0xa86   :  { %1317 = vrot.lane.b32.xlu0 %v1315_v46, %s6838_s30 }
 0xa8b   :  { %v1218_v48 = vpop.permute.xlu1 %1217 }
 0xa8c   :  { %v1220_v49 = vmul.f32 %v6304_v47, %v1218_v48 }
 0xa8e   :  { %1222 = vrot.lane.b32.xlu1 %v1220_v49, %s6841_s24 }
 0xaf8   :  { %v1318_v51 = vpop.permute.xlu0 %1317 }
 0xaf9   :  { %v7306_v52 = vadd.f32 %v1318_v51, %v1310_v50 }
 0xafb   :  { %6305 = vtanh.f32 %v7306_v52 }
 0xb00   :  { %v1223_v54 = vpop.permute.xlu1 %1222 }
 0xb01   :  { %v7310_v56 = vadd.f32 %v1223_v54, %v1215_v53 }
 0xb03   :  { %6307 = vtanh.f32 %v7310_v56 }
 0xb05   :  { %v6306_v39 = vpop.eup %6305 }
 0xb06   :  { %1323 = vrot.lane.b32.xlu0 %v6306_v39, %s6838_s30 }
 0xb0d   :  { %v6308_v58 = vpop.eup %6307 }
 0xb0e   :  { %1228 = vrot.lane.b32.xlu1 %v6308_v58, %s6841_s24 }
 0xb78   :  { %v1324_v59 = vpop.permute.xlu0 %1323 }
 0xb79   :  { %v1326_v60 = vmul.f32 %v6302_v44, %v1324_v59 }
 0xb7b   :  { %v1334_v61 = vrot.slane %v1326_v60, %v7104_v10 }
 0xb7d   :  { %1335 = vrot.lane.b32.xlu0 %v1334_v61, %s6839_s9 }
 0xb80   :  { %v1229_v62 = vpop.permute.xlu1 %1228 }
 0xb81   :  { %v1231_v63 = vmul.f32 %v6304_v47, %v1229_v62  ;;  %v372_v47 = vcombine.high %v7339_v5, %v7339_v5 }
 0xb83   :  { %1410 = vrot.lane.b32.xlu1 %v1231_v63, %s6842_s25 }
 0xbef   :  { %v1336_v2 = vpop.permute.xlu0 %1335 }
 0xbf0   :  { %5604 = vmatmul.mubr.msk.f32.vlgmr.msra.gmra.mrb[8].mxu0 %vm393_vm3, %v1336_v2  ;;  %5622 = vmatmul.mubr.msk.f32.vlgmr.msra.gmra.mrb[8].mxu1 %vm393_vm3, %v1336_v2 }
 0xbf1   :  { %6011 = vmatpush3.bf16.msra.mxu0 %v7196_v0  ;;  %5610 = vmatprep.mubr.msk.f32.mxu0 %vm6836_vm0, %v6837_v4 }
 0xbf2   :  { %6027 = vmatprep.subr.bf16.mxu0 %v6834_v1  ;;  %6020 = vmatpush3.bf16.msra.mxu1 %v7182_v55 }
 0xbf3   :  { %6021 = vmatprep.subr.bf16.mxu1 %v6834_v1  ;;  %5632 = vmatprep.mubr.msk.f32.mxu1 %vm6836_vm0, %v6837_v4 }
 0xbf5   :  { %v1411_v3 = vpop.permute.xlu1 %1410 }
 0xbf6   :  { %6023 = vmatpush3.bf16.msra.mxu1 %v7188_v57 }
 0xbf7   :  { %6024 = vmatprep.subr.bf16.mxu1 %v6834_v1 }
 0xbf8   :  { %5611 = vmatmul.mubr.msk.f32.vlgmr.msra.gmra.mrb[8].mxu0 %vm580_vm4, %v1411_v3 }
 0xbf9   :  { %6029 = vmatpush3.bf16.msra.mxu0 %v7106_v11  ;;  %5650 = vmatprep.mubr.msk.f32.mxu0 %vm6836_vm0, %v6837_v4 }
 0xbfa   :  { %6030 = vmatprep.subr.bf16.mxu0 %v6834_v1 }
 0xbfd   :  { %6032 = vmatpush3.bf16.msra.mxu0 %v7146_v29 }
 0xbfe   :  { %6033 = vmatprep.subr.bf16.mxu0 %v6834_v1 }
 0xcc3   :  { %v1575_v6 = vpop.f32.mrb[8].mxu1 }
 0xcc4   :  { %v1579_v7 = vadd.f32 %v1575_v6, %v7339_v5  ;;  %v5623_v9 = vpop.f32.mrb[9].mxu1 }
 0xcc6   :  { %6309 = vtanh.f32 %v1579_v7  ;;  %v5221_v17 = vmul.f32 -1.442695, %v1579_v7 }
 0xccb   :  { %v1480_v12 = vpop.f32.mrb[8].mxu0 }
 0xccc   :  { %v6182_v13 = vadd.f32 %v7217_v8, %v1480_v12  ;;  %v5612_v14 = vpop.f32.mrb[9].mxu0 }
 0xcce   :  { %6311 = vtanh.f32 %v6182_v13  ;;  %v5219_v18 = vmul.f32 -1.442695, %v6182_v13 }
 0xccf   :  { %6313 = vpow2.f32 %v5221_v17 }
 0xcd0   :  { %v6310_v15 = vpop.eup %6309  ;;  %6315 = vpow2.f32 %v5219_v18 }
 0xcd1   :  { %1589 = vrot.lane.b32.xlu0 %v6310_v15, %s6838_s30 }
 0xcd8   :  { %v6312_v16 = vpop.eup %6311 }
 0xcd9   :  { %1494 = vrot.lane.b32.xlu1 %v6312_v16, %s6840_s5  ;;  %v6314_v19 = vpop.eup %6313 }
 0xcda   :  { %v1583_v20 = vadd.f32 1.0, %v6314_v19  ;;  %v6316_v21 = vpop.eup %6315 }
 0xcdb   :  { %v1488_v22 = vadd.f32 1.0, %v6316_v21 }
 0xcdc   :  { %6317 = vrcp.f32 %v1583_v20 }
 0xcdd   :  { %6319 = vrcp.f32 %v1488_v22 }
 0xce6   :  { %v6318_v23 = vpop.eup %6317 }
 0xce7   :  { %v6320_v26 = vpop.eup %6319  ;;  %v1587_v30 = vmul.f32 %v6318_v23, %v7306_v52 }
 0xce8   :  { %v1492_v33 = vmul.f32 %v6320_v26, %v7310_v56 }
 0xd43   :  { %v1590_v24 = vpop.permute.xlu0 %1589 }
 0xd44   :  { %v1592_v25 = vmul.f32 %v6318_v23, %v1590_v24 }
 0xd46   :  { %1594 = vrot.lane.b32.xlu0 %v1592_v25, %s6838_s30 }
 0xd4b   :  { %v1495_v27 = vpop.permute.xlu1 %1494 }
 0xd4c   :  { %v1497_v28 = vmul.f32 %v6320_v26, %v1495_v27 }
 0xd4e   :  { %1499 = vrot.lane.b32.xlu1 %v1497_v28, %s6841_s24 }
 0xdb8   :  { %v1595_v31 = vpop.permute.xlu0 %1594 }
 0xdb9   :  { %v7348_v32 = vadd.f32 %v1595_v31, %v1587_v30 }
 0xdbb   :  { %6321 = vtanh.f32 %v7348_v32 }
 0xdc0   :  { %v1500_v34 = vpop.permute.xlu1 %1499 }
 0xdc1   :  { %v7352_v35 = vadd.f32 %v1500_v34, %v1492_v33 }
 0xdc3   :  { %6323 = vtanh.f32 %v7352_v35 }
 0xdc5   :  { %v6322_v37 = vpop.eup %6321 }
 0xdc6   :  { %1600 = vrot.lane.b32.xlu0 %v6322_v37, %s6838_s30 }
 0xdcd   :  { %v6324_v38 = vpop.eup %6323 }
 0xdce   :  { %1505 = vrot.lane.b32.xlu1 %v6324_v38, %s6841_s24 }
 0xe38   :  { %v1601_v40 = vpop.permute.xlu0 %1600 }
 0xe39   :  { %v1603_v41 = vmul.f32 %v6318_v23, %v1601_v40 }
 0xe3b   :  { %v1611_v42 = vrot.slane %v1603_v41, %v7104_v10 }
 0xe3d   :  { %1612 = vrot.lane.b32.xlu0 %v1611_v42, %s6839_s9 }
 0xe40   :  { %v1506_v43 = vpop.permute.xlu1 %1505 }
 0xe41   :  { %v1508_v44 = vmul.f32 %v6320_v26, %v1506_v43  ;;  %v357_v26 = vcombine.high %v7162_v36, %v7162_v36 }
 0xe43   :  { %1687 = vrot.lane.b32.xlu1 %v1508_v44, %s6842_s25  ;;  %v7421_v27 = vrot.slane %v357_v26, %v7104_v10 }
 0xeaf   :  { %v1613_v45 = vpop.permute.xlu0 %1612 }
 0xeb0   :  { %5633 = vmatmul.mubr.msk.f32.vlgmr.msra.gmra.mrb[10].mxu1 %vm393_vm3, %v1613_v45  ;;  %5651 = vmatmul.mubr.msk.f32.vlgmr.msra.gmra.mrb[10].mxu0 %vm393_vm3, %v1613_v45 }
 0xeb1   :  { %6026 = vmatpush3.bf16.msra.mxu1 %v7196_v0  ;;  %5639 = vmatprep.mubr.msk.f32.mxu1 %vm6836_vm0, %v6837_v4 }
 0xeb2   :  { %6042 = vmatprep.subr.bf16.mxu1 %v6834_v1  ;;  %6035 = vmatpush3.bf16.msra.mxu0 %v7182_v55 }
 0xeb3   :  { %6036 = vmatprep.subr.bf16.mxu0 %v6834_v1  ;;  %5661 = vmatprep.mubr.msk.f32.mxu0 %vm6836_vm0, %v6837_v4 }
 0xeb5   :  { %v1688_v46 = vpop.permute.xlu1 %1687 }
 0xeb6   :  { %6038 = vmatpush3.bf16.msra.mxu0 %v7188_v57 }
 0xeb7   :  { %6039 = vmatprep.subr.bf16.mxu0 %v6834_v1 }
 0xeb8   :  { %5640 = vmatmul.mubr.msk.f32.vlgmr.msra.gmra.mrb[10].mxu1 %vm580_vm4, %v1688_v46 }
 0xeb9   :  { %6044 = vmatpush3.bf16.msra.mxu1 %v7106_v11  ;;  %5679 = vmatprep.mubr.msk.f32.mxu1 %vm6836_vm0, %v6837_v4 }
 0xeba   :  { %6045 = vmatprep.subr.bf16.mxu1 %v6834_v1 }
 0xebd   :  { %6047 = vmatpush3.bf16.msra.mxu1 %v7146_v29 }
 0xebe   :  { %6048 = vmatprep.subr.bf16.mxu1 %v6834_v1 }
 0xf83   :  { %v1852_v48 = vpop.f32.mrb[10].mxu0 }
 0xf84   :  { %v1856_v49 = vadd.f32 %v1852_v48, %v372_v47  ;;  %v5652_v50 = vpop.f32.mrb[11].mxu0 }
 0xf86   :  { %6325 = vtanh.f32 %v1856_v49  ;;  %v5226_v39 = vmul.f32 -1.442695, %v1856_v49 }
 0xf8b   :  { %v1757_v51 = vpop.f32.mrb[10].mxu1 }
 0xf8c   :  { %v6183_v52 = vadd.f32 %v7217_v8, %v1757_v51  ;;  %v5641_v53 = vpop.f32.mrb[11].mxu1 }
 0xf8e   :  { %6327 = vtanh.f32 %v6183_v52  ;;  %v5224_v58 = vmul.f32 -1.442695, %v6183_v52 }
 0xf8f   :  { %6329 = vpow2.f32 %v5226_v39 }
 0xf90   :  { %v6326_v54 = vpop.eup %6325  ;;  %6331 = vpow2.f32 %v5224_v58 }
 0xf91   :  { %1866 = vrot.lane.b32.xlu0 %v6326_v54, %s6838_s30 }
 0xf98   :  { %v6328_v56 = vpop.eup %6327 }
 0xf99   :  { %1771 = vrot.lane.b32.xlu1 %v6328_v56, %s6840_s5  ;;  %v6330_v59 = vpop.eup %6329 }
 0xf9a   :  { %v1860_v60 = vadd.f32 1.0, %v6330_v59  ;;  %v6332_v61 = vpop.eup %6331 }
 0xf9b   :  { %v1765_v62 = vadd.f32 1.0, %v6332_v61 }
 0xf9c   :  { %6333 = vrcp.f32 %v1860_v60 }
 0xf9d   :  { %6335 = vrcp.f32 %v1765_v62 }
 0xfa6   :  { %v6334_v63 = vpop.eup %6333 }
 0xfa7   :  { %v6336_v5 = vpop.eup %6335  ;;  %v1864_v9 = vmul.f32 %v6334_v63, %v7348_v32 }
 0xfa8   :  { %v1769_v14 = vmul.f32 %v6336_v5, %v7352_v35 }
0x1003   :  { %v1867_v2 = vpop.permute.xlu0 %1866 }
0x1004   :  { %v1869_v3 = vmul.f32 %v6334_v63, %v1867_v2 }
0x1006   :  { %1871 = vrot.lane.b32.xlu0 %v1869_v3, %s6838_s30 }
0x100b   :  { %v1772_v6 = vpop.permute.xlu1 %1771 }
0x100c   :  { %v1774_v7 = vmul.f32 %v6336_v5, %v1772_v6 }
0x100e   :  { %1776 = vrot.lane.b32.xlu1 %v1774_v7, %s6841_s24 }
0x1078   :  { %v1872_v12 = vpop.permute.xlu0 %1871 }
0x1079   :  { %v7387_v13 = vadd.f32 %v1872_v12, %v1864_v9 }
0x107b   :  { %6337 = vtanh.f32 %v7387_v13 }
0x1080   :  { %v1777_v15 = vpop.permute.xlu1 %1776 }
0x1081   :  { %v7391_v16 = vadd.f32 %v1777_v15, %v1769_v14 }
0x1083   :  { %6339 = vtanh.f32 %v7391_v16 }
0x1085   :  { %v6338_v17 = vpop.eup %6337 }
0x1086   :  { %1877 = vrot.lane.b32.xlu0 %v6338_v17, %s6838_s30 }
0x108d   :  { %v6340_v18 = vpop.eup %6339 }
0x108e   :  { %1782 = vrot.lane.b32.xlu1 %v6340_v18, %s6841_s24 }
0x10f8   :  { %v1878_v19 = vpop.permute.xlu0 %1877 }
0x10f9   :  { %v1880_v20 = vmul.f32 %v6334_v63, %v1878_v19 }
0x10fb   :  { %v1888_v21 = vrot.slane %v1880_v20, %v7104_v10 }
0x10fd   :  { %1889 = vrot.lane.b32.xlu0 %v1888_v21, %s6839_s9 }
0x1100   :  { %v1783_v22 = vpop.permute.xlu1 %1782 }
0x1101   :  { %v1785_v23 = vmul.f32 %v6336_v5, %v1783_v22 }
0x1103   :  { %1964 = vrot.lane.b32.xlu1 %v1785_v23, %s6842_s25 }
0x116f   :  { %v1890_v24 = vpop.permute.xlu0 %1889 }
0x1170   :  { %5662 = vmatmul.mubr.msk.f32.vlgmr.msra.gmra.mrb[12].mxu0 %vm393_vm3, %v1890_v24  ;;  %5680 = vmatmul.mubr.msk.f32.vlgmr.msra.gmra.mrb[12].mxu1 %vm393_vm3, %v1890_v24 }
0x1171   :  { %6041 = vmatpush3.bf16.msra.mxu0 %v7196_v0  ;;  %5668 = vmatprep.mubr.msk.f32.mxu0 %vm6836_vm0, %v6837_v4 }
0x1172   :  { %6057 = vmatprep.subr.bf16.mxu0 %v6834_v1  ;;  %6050 = vmatpush3.bf16.msra.mxu1 %v7182_v55 }
0x1173   :  { %6051 = vmatprep.subr.bf16.mxu1 %v6834_v1  ;;  %5690 = vmatprep.mubr.msk.f32.mxu1 %vm6836_vm0, %v6837_v4 }
0x1175   :  { %v1965_v25 = vpop.permute.xlu1 %1964 }
0x1176   :  { %6053 = vmatpush3.bf16.msra.mxu1 %v7188_v57 }
0x1177   :  { %6054 = vmatprep.subr.bf16.mxu1 %v6834_v1 }
0x1178   :  { %5669 = vmatmul.mubr.msk.f32.vlgmr.msra.gmra.mrb[12].mxu0 %vm580_vm4, %v1965_v25 }
0x1179   :  { %6059 = vmatpush3.bf16.msra.mxu0 %v7106_v11  ;;  %5708 = vmatprep.mubr.msk.f32.mxu0 %vm6836_vm0, %v6837_v4 }
0x117a   :  { %6060 = vmatprep.subr.bf16.mxu0 %v6834_v1 }
0x117d   :  { %6062 = vmatpush3.bf16.msra.mxu0 %v7146_v29 }
0x117e   :  { %6063 = vmatprep.subr.bf16.mxu0 %v6834_v1 }
0x1243   :  { %v2129_v28 = vpop.f32.mrb[12].mxu1 }
0x1244   :  { %v2133_v30 = vadd.f32 %v2129_v28, %v7421_v27  ;;  %v5681_v31 = vpop.f32.mrb[13].mxu1 }
0x1246   :  { %6341 = vtanh.f32 %v2133_v30  ;;  %v5231_v36 = vmul.f32 -1.442695, %v2133_v30 }
0x124b   :  { %v2034_v11 = vpop.f32.mrb[12].mxu0 }
0x124c   :  { %v6184_v32 = vadd.f32 %v7217_v8, %v2034_v11  ;;  %v5670_v33 = vpop.f32.mrb[13].mxu0 }
0x124e   :  { %6343 = vtanh.f32 %v6184_v32  ;;  %v5229_v35 = vmul.f32 -1.442695, %v6184_v32 }
0x124f   :  { %6345 = vpow2.f32 %v5231_v36 }
0x1250   :  { %v6342_v34 = vpop.eup %6341  ;;  %6347 = vpow2.f32 %v5229_v35 }
0x1251   :  { %2143 = vrot.lane.b32.xlu0 %v6342_v34, %s6838_s30 }
0x1258   :  { %v6344_v29 = vpop.eup %6343 }
0x1259   :  { %2048 = vrot.lane.b32.xlu1 %v6344_v29, %s6840_s5  ;;  %v6346_v37 = vpop.eup %6345 }
0x125a   :  { %v2137_v38 = vadd.f32 1.0, %v6346_v37  ;;  %v6348_v40 = vpop.eup %6347 }
0x125b   :  { %v2042_v41 = vadd.f32 1.0, %v6348_v40 }
0x125c   :  { %6349 = vrcp.f32 %v2137_v38 }
0x125d   :  { %6351 = vrcp.f32 %v2042_v41 }
0x1266   :  { %v6350_v42 = vpop.eup %6349 }
0x1267   :  { %v6352_v45 = vpop.eup %6351  ;;  %v2141_v48 = vmul.f32 %v6350_v42, %v7387_v13 }
0x1268   :  { %v2046_v51 = vmul.f32 %v6352_v45, %v7391_v16 }
0x12c3   :  { %v2144_v43 = vpop.permute.xlu0 %2143 }
0x12c4   :  { %v2146_v44 = vmul.f32 %v6350_v42, %v2144_v43 }
0x12c6   :  { %2148 = vrot.lane.b32.xlu0 %v2146_v44, %s6838_s30 }
0x12cb   :  { %v2049_v46 = vpop.permute.xlu1 %2048 }
0x12cc   :  { %v2051_v47 = vmul.f32 %v6352_v45, %v2049_v46 }
0x12ce   :  { %2053 = vrot.lane.b32.xlu1 %v2051_v47, %s6841_s24 }
0x1338   :  { %v2149_v49 = vpop.permute.xlu0 %2148 }
0x1339   :  { %v2151_v50 = vadd.f32 %v2149_v49, %v2141_v48 }
0x133b   :  { %6353 = vtanh.f32 %v2151_v50 }
0x1340   :  { %v2054_v52 = vpop.permute.xlu1 %2053 }
0x1341   :  { %v2056_v53 = vadd.f32 %v2054_v52, %v2046_v51  ;;  %v2618_v52 = vld [vmem:[#allocation11 + $0x8] sm:$0xff] }
0x1343   :  { %6355 = vtanh.f32 %v2056_v53 }
0x1345   :  { %v6354_v54 = vpop.eup %6353 }
0x1346   :  { %2154 = vrot.lane.b32.xlu0 %v6354_v54, %s6838_s30 }
0x134d   :  { %v6356_v56 = vpop.eup %6355 }
0x134e   :  { %2059 = vrot.lane.b32.xlu1 %v6356_v56, %s6841_s24 }
0x13b8   :  { %v2155_v39 = vpop.permute.xlu0 %2154 }
0x13b9   :  { %v2157_v58 = vmul.f32 %v6350_v42, %v2155_v39 }
0x13bb   :  { %v2165_v59 = vrot.slane %v2157_v58, %v7104_v10 }
0x13bd   :  { %2166 = vrot.lane.b32.xlu0 %v2165_v59, %s6839_s9  ;;  %v5240_v59 = vld [vmem:[#allocation13] ss:$0 sm:$0xff] }
0x13c0   :  { %v2060_v60 = vpop.permute.xlu1 %2059 }
0x13c1   :  { %v2062_v61 = vmul.f32 %v6352_v45, %v2060_v60 }
0x13c3   :  { %2241 = vrot.lane.b32.xlu1 %v2062_v61, %s6842_s25 }
0x142f   :  { %v2167_v62 = vpop.permute.xlu0 %2166 }
0x1430   :  { %5691 = vmatmul.mubr.msk.f32.vlgmr.msra.gmra.mrb[14].mxu1 %vm393_vm3, %v2167_v62  ;;  %5709 = vmatmul.mubr.msk.f32.vlgmr.msra.gmra.mrb[14].mxu0 %vm393_vm3, %v2167_v62 }
0x1431   :  { %6056 = vmatpush3.bf16.msra.mxu1 %v7196_v0  ;;  %5697 = vmatprep.mubr.msk.f32.mxu1 %vm6836_vm0, %v6837_v4 }
0x1432   :  { %6065 = vmatpush3.bf16.msra.mxu0 %v7182_v55  ;;  %5719 = vmatprep.mubr.msk.f32.mxu0 %vm6836_vm0, %v6837_v4  ;;  %v373_v55 = vcombine.high %v7421_v27, %v7421_v27 }
0x1433   :  { %6066 = vmatprep.subr.bf16.mxu0 %v6834_v1  ;;  %6072 = vmatprep.subr.bf16.mxu1 %v6834_v1 }
0x1435   :  { %v2242_v63 = vpop.permute.xlu1 %2241 }
0x1436   :  { %6068 = vmatpush3.bf16.msra.mxu0 %v7188_v57 }
0x1437   :  { %6069 = vmatprep.subr.bf16.mxu0 %v6834_v1 }
0x1438   :  { %5698 = vmatmul.mubr.msk.f32.vlgmr.msra.gmra.mrb[14].mxu1 %vm580_vm4, %v2242_v63 }
0x1439   :  { %5733 = vmatprep.mubr.msk.f32.mxu1 %vm6836_vm0, %v6837_v4 }
0x1503   :  { %v2406_v2 = vpop.f32.mrb[14].mxu0 }
0x1504   :  { %v2410_v3 = vadd.f32 %v2406_v2, %v373_v55  ;;  %v5710_v5 = vpop.f32.mrb[15].mxu0  ;;  %v2713_v2 = vld [vmem:[#allocation14] sm:$0xff] }
0x1505   :  { %v2703_v5 = vld [vmem:[#allocation2] sm:$0x3] }
0x1506   :  { %6357 = vtanh.f32 %v2410_v3  ;;  %v5236_v13 = vmul.f32 -1.442695, %v2410_v3 }
0x150b   :  { %v2311_v6 = vpop.f32.mrb[14].mxu1 }
0x150c   :  { %v6185_v7 = vadd.f32 %v7217_v8, %v2311_v6  ;;  %v5699_v9 = vpop.f32.mrb[15].mxu1  ;;  %v2795_v6 = vld [vmem:[%s7843_s11] sm:$0xff] }
0x150e   :  { %6359 = vtanh.f32 %v6185_v7  ;;  %v5234_v14 = vmul.f32 -1.442695, %v6185_v7  ;;  %v2796_v7 = vld [vmem:[%s7843_s11 + $0x8] sm:$0xff] }
0x150f   :  { %6361 = vpow2.f32 %v5236_v13 }
0x1510   :  { %v6358_v57 = vpop.eup %6357  ;;  %6363 = vpow2.f32 %v5234_v14  ;;  %v5242_v14 = vld [vmem:[#allocation16] ss:$0 sm:$0xff] }
0x1511   :  { %2420 = vrot.lane.b32.xlu0 %v6358_v57, %s6838_s30 }
0x1518   :  { %v6360_v12 = vpop.eup %6359 }
0x1519   :  { %2325 = vrot.lane.b32.xlu1 %v6360_v12, %s6840_s5  ;;  %v6362_v15 = vpop.eup %6361  ;;  %v7487_v12 = vpack.c.bf16 %v2796_v7, %v2795_v6 }
0x151a   :  { %v2414_v16 = vadd.f32 1.0, %v6362_v15  ;;  %v6364_v17 = vpop.eup %6363 }
0x151b   :  { %v2319_v18 = vadd.f32 1.0, %v6364_v17 }
0x151c   :  { %6365 = vrcp.f32 %v2414_v16 }
0x151d   :  { %6367 = vrcp.f32 %v2319_v18 }
0x1526   :  { %v6366_v19 = vpop.eup %6365 }
0x1527   :  { %v6368_v22 = vpop.eup %6367  ;;  %v2418_v25 = vmul.f32 %v6366_v19, %v2151_v50 }
0x1528   :  { %v2323_v28 = vmul.f32 %v6368_v22, %v2056_v53 }
0x1583   :  { %v2421_v20 = vpop.permute.xlu0 %2420 }
0x1584   :  { %v2423_v21 = vmul.f32 %v6366_v19, %v2421_v20 }
0x1586   :  { %2425 = vrot.lane.b32.xlu0 %v2423_v21, %s6838_s30 }
0x158b   :  { %v2326_v23 = vpop.permute.xlu1 %2325 }
0x158c   :  { %v2328_v24 = vmul.f32 %v6368_v22, %v2326_v23 }
0x158e   :  { %2330 = vrot.lane.b32.xlu1 %v2328_v24, %s6841_s24 }
0x15f8   :  { %v2426_v26 = vpop.permute.xlu0 %2425 }
0x15f9   :  { %v2428_v27 = vadd.f32 %v2426_v26, %v2418_v25 }
0x15fb   :  { %6369 = vtanh.f32 %v2428_v27 }
0x1600   :  { %v2331_v30 = vpop.permute.xlu1 %2330 }
0x1601   :  { %v2333_v31 = vadd.f32 %v2331_v30, %v2323_v28 }
0x1603   :  { %6371 = vtanh.f32 %v2333_v31 }
0x1605   :  { %v6370_v11 = vpop.eup %6369 }
0x1606   :  { %2431 = vrot.lane.b32.xlu0 %v6370_v11, %s6838_s30  ;;  %v2797_v11 = vld [vmem:[#allocation17] sm:$0xff] }
0x160d   :  { %v6372_v32 = vpop.eup %6371 }
0x160e   :  { %2336 = vrot.lane.b32.xlu1 %v6372_v32, %s6841_s24  ;;  %v2798_v32 = vld [vmem:[#allocation17 + $0x8] sm:$0xff] }
0x1678   :  { %v2432_v33 = vpop.permute.xlu0 %2431 }
0x1679   :  { %v2434_v34 = vmul.f32 %v6366_v19, %v2432_v33  ;;  %v7507_v33 = vpack.c.bf16 %v2798_v32, %v2797_v11 }
0x167b   :  { %v2442_v29 = vrot.slane %v2434_v34, %v7104_v10 }
0x167d   :  { %2443 = vrot.lane.b32.xlu0 %v2442_v29, %s6839_s9 }
0x1680   :  { %v2337_v36 = vpop.permute.xlu1 %2336 }
0x1681   :  { %v2339_v35 = vmul.f32 %v6368_v22, %v2337_v36 }
0x1683   :  { %2518 = vrot.lane.b32.xlu1 %v2339_v35, %s6842_s25  ;;  %v2799_v35 = vld [vmem:[%s7846_s14] sm:$0xff] }
0x16ef   :  { %v2444_v37 = vpop.permute.xlu0 %2443 }
0x16f0   :  { %5720 = vmatmul.mubr.msk.f32.vlgmr.msra.gmra.mrb[16].mxu0 %vm393_vm3, %v2444_v37  ;;  %v2800_v37 = vld [vmem:[%s7846_s14 + $0x8] sm:$0xff] }
0x16f1   :  { %6071 = vmatpush3.bf16.msra.mxu0 %v7196_v0  ;;  %5726 = vmatprep.mubr.msk.f32.mxu0 %vm6836_vm0, %v6837_v4 }
0x16f2   :  { %6078 = vmatprep.subr.bf16.mxu0 %v6834_v1 }
0x16f5   :  { %v2519_v38 = vpop.permute.xlu1 %2518 }
0x16f8   :  { %5727 = vmatmul.mubr.msk.f32.vlgmr.msra.gmra.mrb[16].mxu0 %vm580_vm4, %v2519_v38  ;;  %v7519_v38 = vpack.c.bf16 %v2800_v37, %v2799_v35 }
0x16f9   :  { %5752 = vmatprep.mubr.msk.f32.mxu0 %vm6836_vm0, %v6837_v4  ;;  %6080 = vmatpush3.bf16.msra.mxu0 %v7507_v33 }
0x16fa   :  { %6081 = vmatprep.subr.bf16.mxu0 %v6834_v1 }
0x17cb   :  { %v2588_v40 = vpop.f32.mrb[16].mxu0 }
0x17cc   :  { %v6186_v41 = vadd.f32 %v7217_v8, %v2588_v40  ;;  %v5728_v42 = vpop.f32.mrb[17].mxu0  ;;  %v2617_v8 = vld [vmem:[#allocation11] sm:$0xff] }
0x17cd   :  { %v6073_v53 = vpack.c.bf16 %v2618_v52, %v2617_v8  ;;  %v2801_v40 = vld [vmem:[%s7846_s14 + $0x10] sm:$0xff] }
0x17ce   :  { %6373 = vtanh.f32 %v6186_v41  ;;  %v5239_v0 = vmul.f32 -1.442695, %v6186_v41  ;;  %v2802_v41 = vld [vmem:[%s7846_s14 + $0x18] sm:$0xff] }
0x17cf   :  { %6074 = vmatpush3.bf16.msra.mxu1 %v6073_v53 }
0x17d0   :  { %6375 = vpow2.f32 %v5239_v0  ;;  %5736 = vmatprep.subr.mxu1 %v6837_v4 }
0x17d8   :  { %v6374_v43 = vpop.eup %6373 }
0x17d9   :  { %2602 = vrot.lane.b32.xlu0 %v6374_v43, %s6840_s5  ;;  %v7530_v43 = vpack.c.bf16 %v2802_v41, %v2801_v40 }
0x17da   :  { %v6376_v44 = vpop.eup %6375 }
0x17db   :  { %v2596_v45 = vadd.f32 1.0, %v6376_v44 }
0x17dd   :  { %6377 = vrcp.f32 %v2596_v45 }
0x17e7   :  { %v6378_v46 = vpop.eup %6377 }
0x17e8   :  { %v2600_v49 = vmul.f32 %v6378_v46, %v2333_v31 }
0x184b   :  { %v2603_v47 = vpop.permute.xlu0 %2602 }
0x184c   :  { %v2605_v48 = vmul.f32 %v6378_v46, %v2603_v47 }
0x184e   :  { %2607 = vrot.lane.b32.xlu1 %v2605_v48, %s6841_s24 }
0x18c0   :  { %v2608_v50 = vpop.permute.xlu1 %2607 }
0x18c1   :  { %v2610_v51 = vadd.f32 %v2608_v50, %v2600_v49 }
0x18c3   :  { %6379 = vtanh.f32 %v2610_v51 }
0x18cd   :  { %v6380_v54 = vpop.eup %6379 }
0x18ce   :  { %2613 = vrot.lane.b32.xlu0 %v6380_v54, %s6841_s24 }
0x1940   :  { %v2614_v56 = vpop.permute.xlu0 %2613 }
0x1941   :  { %v2616_v39 = vmul.f32 %v6378_v46, %v2614_v56  ;;  %v7547_v46 = vld [vmem:[#allocation19] ss:$0 sm:$0xff] }
0x1943   :  { %2627 = vrot.lane.b32.xlu1 %v2616_v39, %s6842_s25 }
0x19b5   :  { %v2628_v58 = vpop.permute.xlu1 %2627 }
0x19b6   :  { %5734 = vmatmul.mubr.msk.f32.vlgmr.msra.gmra.mrb[16].mxu1 %vm580_vm4, %v2628_v58 }
0x19b7   :  { %5738 = vmatprep.mubr.msk.f32.mxu1 %vm6836_vm0, %v6837_v4  ;;  %5737 = vmatpush3.msra.mxu1 %v2713_v2 }
0x19b8   :  { %6075 = vmatprep.subr.bf16.mxu1 %v6834_v1 }
0x1a89   :  { %v2697_v60 = vpop.f32.mrb[16].mxu1 }
0x1a8a   :  { %v2698_v61 = vadd.f32 %v5240_v59, %v2697_v60  ;;  %v5735_v62 = vpop.f32.mrb[17].mxu1 }
0x1a8c   :  { %v2704_v63 = vmul.f32 0.5, %v2698_v61  ;;  %2702 = vst.msk [vmem:[#allocation20] sm:$0x3] %vm2701_vm5, %v2698_v61 }
0x1a8e   :  { %v2705_v55 = vmul.f32 1.442695, %v2704_v63 }
0x1a90   :  { %6381 = vpow2.f32 %v2705_v55 }
0x1a9a   :  { %v6382_v3 = vpop.eup %6381 }
0x1a9b   :  { %2708 = vrot.lane.b32.xlu0 %v6382_v3, %s6843_s21 }
0x1b0d   :  { %v2709_v9 = vpop.permute.xlu0 %2708 }
0x1b0e   :  { %v2711_v57 = vmul.f32 %v2709_v9, %v2703_v5 }
0x1b10   :  { %v2712_v13 = vadd.f32 %v2711_v57, %v2698_v61 }
0x1b12   :  { %5739 = vmatmul.mubr.msk.f32.vlgmr.msra.gmra.mrb[18].mxu1 %vm2721_vm6, %v2712_v13 }
0x1b13   :  { %6077 = vmatpush3.bf16.msra.mxu1 %v7487_v12  ;;  %5745 = vmatprep.mubr.msk.f32.mxu1 %vm6836_vm0, %v6837_v4 }
0x1b14   :  { %6087 = vmatprep.subr.bf16.mxu1 %v6834_v1 }
0x1b16   :  { %5746 = vmatmul.mubr.f32.vlgmr.msra.gmra.mrb[20].mxu1 %v6837_v4 }
0x1b17   :  { %6089 = vmatpush3.bf16.msra.mxu1 %v7487_v12  ;;  %5770 = vmatprep.mubr.msk.f32.mxu1 %vm6836_vm0, %v6837_v4 }
0x1b18   :  { %6090 = vmatprep.subr.bf16.mxu1 %v6834_v1 }
0x1be5   :  { %v2791_v15 = vpop.f32.mrb[18].mxu1 }
0x1be6   :  { %v5740_v16 = vpop.f32.mrb[19].mxu1  ;;  %v7499_v17 = vadd.f32 %v5242_v14, %v2791_v15 }
0x1be9   :  { %v2870_v18 = vpop.f32.mrb[20].mxu1 }
0x1bea   :  { %v2874_v19 = vadd.f32 %v2870_v18, %v7499_v17  ;;  %v5747_v20 = vpop.f32.mrb[21].mxu1 }
0x1bec   :  { %6383 = vtanh.f32 %v2874_v19  ;;  %v5244_v22 = vmul.f32 -1.442695, %v2874_v19 }
0x1bee   :  { %6385 = vpow2.f32 %v5244_v22 }
0x1bf6   :  { %v6384_v21 = vpop.eup %6383 }
0x1bf7   :  { %2884 = vrot.lane.b32.xlu1 %v6384_v21, %s6840_s5 }
0x1bf8   :  { %v6386_v23 = vpop.eup %6385 }
0x1bf9   :  { %v2878_v24 = vadd.f32 1.0, %v6386_v23 }
0x1bfb   :  { %6387 = vrcp.f32 %v2878_v24 }
0x1c05   :  { %v6388_v25 = vpop.eup %6387 }
0x1c06   :  { %v2882_v28 = vmul.f32 0.0, %v6388_v25 }
0x1c69   :  { %v2885_v26 = vpop.permute.xlu1 %2884 }
0x1c6a   :  { %v2887_v27 = vmul.f32 %v6388_v25, %v2885_v26 }
0x1c6c   :  { %2889 = vrot.lane.b32.xlu0 %v2887_v27, %s6841_s24 }
0x1cde   :  { %v2890_v30 = vpop.permute.xlu0 %2889 }
0x1cdf   :  { %v7504_v31 = vadd.f32 %v2890_v30, %v2882_v28 }
0x1ce1   :  { %6389 = vtanh.f32 %v7504_v31 }
0x1ceb   :  { %v6390_v34 = vpop.eup %6389 }
0x1cec   :  { %2895 = vrot.lane.b32.xlu1 %v6390_v34, %s6841_s24 }
0x1d5e   :  { %v2896_v29 = vpop.permute.xlu1 %2895 }
0x1d5f   :  { %v2898_v36 = vmul.f32 %v6388_v25, %v2896_v29 }
0x1d61   :  { %2906 = vrot.lane.b32.xlu0 %v2898_v36, %s6842_s25 }
0x1dd3   :  { %v2907_v42 = vpop.permute.xlu0 %2906 }
0x1dd4   :  { %5753 = vmatmul.mubr.msk.f32.vlgmr.msra.gmra.mrb[18].mxu0 %vm580_vm4, %v2907_v42  ;;  %5771 = vmatmul.mubr.msk.f32.vlgmr.msra.gmra.mrb[22].mxu1 %vm580_vm4, %v2907_v42 }
0x1dd5   :  { %6083 = vmatpush3.bf16.msra.mxu0 %v7519_v38  ;;  %5763 = vmatprep.mubr.msk.f32.mxu0 %vm6836_vm0, %v6837_v4 }
0x1dd6   :  { %6084 = vmatprep.subr.bf16.mxu0 %v6834_v1  ;;  %6092 = vmatpush3.bf16.msra.mxu1 %v7507_v33 }
0x1dd7   :  { %5777 = vmatprep.mubr.msk.f32.mxu1 %vm6836_vm0, %v6837_v4  ;;  %6093 = vmatprep.subr.bf16.mxu1 %v6834_v1 }
0x1dd9   :  { %6086 = vmatpush3.bf16.msra.mxu0 %v7530_v43 }
0x1dda   :  { %6099 = vmatprep.subr.bf16.mxu0 %v6834_v1 }
0x1ddc   :  { %5764 = vmatmul.mubr.f32.vlgmr.msra.gmra.mrb[18].mxu0 %v6837_v4 }
0x1ddd   :  { %6101 = vmatpush3.bf16.msra.mxu0 %v7487_v12  ;;  %5795 = vmatprep.mubr.msk.f32.mxu0 %vm6836_vm0, %v6837_v4 }
0x1dde   :  { %6102 = vmatprep.subr.bf16.mxu0 %v6834_v1 }
0x1ea7   :  { %v3141_v0 = vpop.f32.mrb[22].mxu1 }
0x1ea8   :  { %v3145_v44 = vadd.f32 %v3141_v0, %v7499_v17  ;;  %v5772_v45 = vpop.f32.mrb[23].mxu1 }
0x1eaa   :  { %6391 = vtanh.f32 %v3145_v44  ;;  %v5249_v8 = vmul.f32 -1.442695, %v3145_v44 }
0x1eaf   :  { %v3046_v47 = vpop.f32.mrb[18].mxu0 }
0x1eb0   :  { %v6187_v48 = vadd.f32 %v7547_v46, %v3046_v47  ;;  %v5765_v49 = vpop.f32.mrb[19].mxu0 }
0x1eb2   :  { %6393 = vtanh.f32 %v6187_v48  ;;  %v5247_v52 = vmul.f32 -1.442695, %v6187_v48 }
0x1eb3   :  { %6395 = vpow2.f32 %v5249_v8 }
0x1eb4   :  { %v6392_v50 = vpop.eup %6391  ;;  %6397 = vpow2.f32 %v5247_v52 }
0x1eb5   :  { %3155 = vrot.lane.b32.xlu1 %v6392_v50, %s6840_s5 }
0x1ebc   :  { %v6394_v51 = vpop.eup %6393 }
0x1ebd   :  { %3060 = vrot.lane.b32.xlu0 %v6394_v51, %s6838_s30  ;;  %v6396_v53 = vpop.eup %6395 }
0x1ebe   :  { %v3149_v54 = vadd.f32 1.0, %v6396_v53  ;;  %v6398_v56 = vpop.eup %6397 }
0x1ebf   :  { %v3054_v39 = vadd.f32 1.0, %v6398_v56 }
0x1ec0   :  { %6399 = vrcp.f32 %v3149_v54 }
0x1ec1   :  { %6401 = vrcp.f32 %v3054_v39 }
0x1eca   :  { %v6400_v58 = vpop.eup %6399 }
0x1ecb   :  { %v6402_v61 = vpop.eup %6401  ;;  %v3153_v55 = vmul.f32 %v6400_v58, %v7504_v31 }
0x1ecc   :  { %v3058_v5 = vmul.f32 0.0, %v6402_v61 }
0x1f27   :  { %v3156_v59 = vpop.permute.xlu1 %3155 }
0x1f28   :  { %v3158_v60 = vmul.f32 %v6400_v58, %v3156_v59 }
0x1f2a   :  { %3160 = vrot.lane.b32.xlu1 %v3158_v60, %s6841_s24 }
0x1f2f   :  { %v3061_v62 = vpop.permute.xlu0 %3060 }
0x1f30   :  { %v3063_v63 = vmul.f32 %v6402_v61, %v3061_v62 }
0x1f32   :  { %3065 = vrot.lane.b32.xlu0 %v3063_v63, %s6838_s30 }
0x1f9c   :  { %v3161_v2 = vpop.permute.xlu1 %3160 }
0x1f9d   :  { %v3163_v3 = vadd.f32 %v3161_v2, %v3153_v55 }
0x1f9f   :  { %6403 = vtanh.f32 %v3163_v3 }
0x1fa4   :  { %v3066_v6 = vpop.permute.xlu0 %3065 }
0x1fa5   :  { %v3068_v7 = vadd.f32 %v3066_v6, %v3058_v5 }
0x1fa7   :  { %6405 = vtanh.f32 %v3068_v7 }
0x1fa9   :  { %v6404_v9 = vpop.eup %6403 }
0x1faa   :  { %3166 = vrot.lane.b32.xlu1 %v6404_v9, %s6841_s24 }
0x1fb1   :  { %v6406_v57 = vpop.eup %6405 }
0x1fb2   :  { %3071 = vrot.lane.b32.xlu0 %v6406_v57, %s6838_s30 }
0x201c   :  { %v3167_v13 = vpop.permute.xlu1 %3166 }
0x201d   :  { %v3169_v14 = vmul.f32 %v6400_v58, %v3167_v13 }
0x201f   :  { %3171 = vrot.lane.b32.xlu1 %v3169_v14, %s6842_s25 }
0x2024   :  { %v3072_v15 = vpop.permute.xlu0 %3071 }
0x2025   :  { %v7558_v16 = vmul.f32 %v6402_v61, %v3072_v15 }
0x2027   :  { %3246 = vrot.lane.b32.xlu0 %v7558_v16, %s6839_s9 }
0x2091   :  { %v3172_v18 = vpop.permute.xlu1 %3171 }
0x2092   :  { %5778 = vmatmul.mubr.msk.f32.vlgmr.msra.gmra.mrb[24].mxu1 %vm580_vm4, %v3172_v18  ;;  %5796 = vmatmul.mubr.msk.f32.vlgmr.msra.gmra.mrb[20].mxu0 %vm580_vm4, %v3172_v18 }
0x2093   :  { %6095 = vmatpush3.bf16.msra.mxu1 %v7519_v38  ;;  %5788 = vmatprep.mubr.msk.f32.mxu1 %vm6836_vm0, %v6837_v4 }
0x2094   :  { %6096 = vmatprep.subr.bf16.mxu1 %v6834_v1  ;;  %6104 = vmatpush3.bf16.msra.mxu0 %v7507_v33 }
0x2095   :  { %5802 = vmatprep.mubr.msk.f32.mxu0 %vm6836_vm0, %v6837_v4  ;;  %6105 = vmatprep.subr.bf16.mxu0 %v6834_v1 }
0x2097   :  { %6098 = vmatpush3.bf16.msra.mxu1 %v7530_v43 }
0x2098   :  { %6111 = vmatprep.subr.bf16.mxu1 %v6834_v1 }
0x2099   :  { %v3247_v19 = vpop.permute.xlu0 %3246 }
0x209a   :  { %5789 = vmatmul.mubr.msk.f32.vlgmr.msra.gmra.mrb[24].mxu1 %vm393_vm3, %v3247_v19 }
0x209b   :  { %6113 = vmatpush3.bf16.msra.mxu1 %v7487_v12  ;;  %5820 = vmatprep.mubr.msk.f32.mxu1 %vm6836_vm0, %v6837_v4 }
0x209c   :  { %6114 = vmatprep.subr.bf16.mxu1 %v6834_v1 }
0x2165   :  { %v3411_v20 = vpop.f32.mrb[20].mxu0 }
0x2166   :  { %v3415_v21 = vadd.f32 %v3411_v20, %v7499_v17  ;;  %v5797_v22 = vpop.f32.mrb[21].mxu0 }
0x2168   :  { %6407 = vtanh.f32 %v3415_v21  ;;  %v5254_v28 = vmul.f32 -1.442695, %v3415_v21 }
0x216d   :  { %v3316_v23 = vpop.f32.mrb[24].mxu1 }
0x216e   :  { %v6188_v24 = vadd.f32 %v7547_v46, %v3316_v23  ;;  %v5790_v25 = vpop.f32.mrb[25].mxu1 }
0x2170   :  { %6409 = vtanh.f32 %v6188_v24  ;;  %v5252_v30 = vmul.f32 -1.442695, %v6188_v24 }
0x2171   :  { %6411 = vpow2.f32 %v5254_v28 }
0x2172   :  { %v6408_v26 = vpop.eup %6407  ;;  %6413 = vpow2.f32 %v5252_v30 }
0x2173   :  { %3425 = vrot.lane.b32.xlu1 %v6408_v26, %s6840_s5 }
0x217a   :  { %v6410_v27 = vpop.eup %6409 }
0x217b   :  { %3330 = vrot.lane.b32.xlu0 %v6410_v27, %s6838_s30  ;;  %v6412_v31 = vpop.eup %6411 }
0x217c   :  { %v3419_v11 = vadd.f32 1.0, %v6412_v31  ;;  %v6414_v32 = vpop.eup %6413 }
0x217d   :  { %v3324_v34 = vadd.f32 1.0, %v6414_v32 }
0x217e   :  { %6415 = vrcp.f32 %v3419_v11 }
0x217f   :  { %6417 = vrcp.f32 %v3324_v34 }
0x2188   :  { %v6416_v29 = vpop.eup %6415 }
0x2189   :  { %v6418_v37 = vpop.eup %6417  ;;  %v3423_v42 = vmul.f32 %v6416_v29, %v3163_v3 }
0x218a   :  { %v3328_v45 = vmul.f32 %v6418_v37, %v3068_v7 }
0x21e5   :  { %v3426_v36 = vpop.permute.xlu1 %3425 }
0x21e6   :  { %v3428_v35 = vmul.f32 %v6416_v29, %v3426_v36 }
0x21e8   :  { %3430 = vrot.lane.b32.xlu1 %v3428_v35, %s6841_s24 }
0x21ed   :  { %v3331_v40 = vpop.permute.xlu0 %3330 }
0x21ee   :  { %v3333_v41 = vmul.f32 %v6418_v37, %v3331_v40 }
0x21f0   :  { %3335 = vrot.lane.b32.xlu0 %v3333_v41, %s6838_s30 }
0x225a   :  { %v3431_v0 = vpop.permute.xlu1 %3430 }
0x225b   :  { %v3433_v44 = vadd.f32 %v3431_v0, %v3423_v42 }
0x225d   :  { %6419 = vtanh.f32 %v3433_v44 }
0x2262   :  { %v3336_v47 = vpop.permute.xlu0 %3335 }
0x2263   :  { %v3338_v48 = vadd.f32 %v3336_v47, %v3328_v45 }
0x2265   :  { %6421 = vtanh.f32 %v3338_v48 }
0x2267   :  { %v6420_v49 = vpop.eup %6419 }
0x2268   :  { %3436 = vrot.lane.b32.xlu1 %v6420_v49, %s6841_s24 }
0x226f   :  { %v6422_v50 = vpop.eup %6421 }
0x2270   :  { %3341 = vrot.lane.b32.xlu0 %v6422_v50, %s6838_s30 }
0x22da   :  { %v3437_v51 = vpop.permute.xlu1 %3436 }
0x22db   :  { %v3439_v8 = vmul.f32 %v6416_v29, %v3437_v51 }
0x22dd   :  { %3441 = vrot.lane.b32.xlu1 %v3439_v8, %s6842_s25 }
0x22e2   :  { %v3342_v52 = vpop.permute.xlu0 %3341 }
0x22e3   :  { %v7588_v53 = vmul.f32 %v6418_v37, %v3342_v52 }
0x22e5   :  { %3516 = vrot.lane.b32.xlu0 %v7588_v53, %s6839_s9  ;;  %v4965_v31 = vrot.slane %v7588_v53, 6 }
0x22e7   :  { %v4979_v29 = vsel %vm4978_vm7, %v7558_v16, %v4965_v31 }
0x234f   :  { %v3442_v54 = vpop.permute.xlu1 %3441 }
0x2350   :  { %5803 = vmatmul.mubr.msk.f32.vlgmr.msra.gmra.mrb[22].mxu0 %vm580_vm4, %v3442_v54  ;;  %5821 = vmatmul.mubr.msk.f32.vlgmr.msra.gmra.mrb[26].mxu1 %vm580_vm4, %v3442_v54 }
0x2351   :  { %6107 = vmatpush3.bf16.msra.mxu0 %v7519_v38  ;;  %5813 = vmatprep.mubr.msk.f32.mxu0 %vm6836_vm0, %v6837_v4 }
0x2352   :  { %6108 = vmatprep.subr.bf16.mxu0 %v6834_v1  ;;  %6116 = vmatpush3.bf16.msra.mxu1 %v7507_v33 }
0x2353   :  { %5827 = vmatprep.mubr.msk.f32.mxu1 %vm6836_vm0, %v6837_v4  ;;  %6117 = vmatprep.subr.bf16.mxu1 %v6834_v1 }
0x2355   :  { %6110 = vmatpush3.bf16.msra.mxu0 %v7530_v43 }
0x2356   :  { %6123 = vmatprep.subr.bf16.mxu0 %v6834_v1 }
0x2357   :  { %v3517_v56 = vpop.permute.xlu0 %3516 }
0x2358   :  { %5814 = vmatmul.mubr.msk.f32.vlgmr.msra.gmra.mrb[22].mxu0 %vm393_vm3, %v3517_v56 }
0x2359   :  { %6125 = vmatpush3.bf16.msra.mxu0 %v7487_v12  ;;  %5845 = vmatprep.mubr.msk.f32.mxu0 %vm6836_vm0, %v6837_v4 }
0x235a   :  { %6126 = vmatprep.subr.bf16.mxu0 %v6834_v1 }
0x2423   :  { %v3681_v39 = vpop.f32.mrb[26].mxu1 }
0x2424   :  { %v3685_v58 = vadd.f32 %v3681_v39, %v7499_v17  ;;  %v5822_v59 = vpop.f32.mrb[27].mxu1 }
0x2426   :  { %6423 = vtanh.f32 %v3685_v58  ;;  %v5259_v2 = vmul.f32 -1.442695, %v3685_v58 }
0x242b   :  { %v3586_v60 = vpop.f32.mrb[22].mxu0 }
0x242c   :  { %v6189_v61 = vadd.f32 %v7547_v46, %v3586_v60  ;;  %v5815_v62 = vpop.f32.mrb[23].mxu0 }
0x242e   :  { %6425 = vtanh.f32 %v6189_v61  ;;  %v5257_v3 = vmul.f32 -1.442695, %v6189_v61 }
0x242f   :  { %6427 = vpow2.f32 %v5259_v2 }
0x2430   :  { %v6424_v63 = vpop.eup %6423  ;;  %6429 = vpow2.f32 %v5257_v3 }
0x2431   :  { %3695 = vrot.lane.b32.xlu1 %v6424_v63, %s6840_s5 }
0x2438   :  { %v6426_v55 = vpop.eup %6425 }
0x2439   :  { %3600 = vrot.lane.b32.xlu0 %v6426_v55, %s6838_s30  ;;  %v6428_v5 = vpop.eup %6427 }
0x243a   :  { %v3689_v6 = vadd.f32 1.0, %v6428_v5  ;;  %v6430_v7 = vpop.eup %6429 }
0x243b   :  { %v3594_v9 = vadd.f32 1.0, %v6430_v7 }
0x243c   :  { %6431 = vrcp.f32 %v3689_v6 }
0x243d   :  { %6433 = vrcp.f32 %v3594_v9 }
0x2446   :  { %v6432_v57 = vpop.eup %6431 }
0x2447   :  { %v6434_v15 = vpop.eup %6433  ;;  %v3693_v20 = vmul.f32 %v6432_v57, %v3433_v44 }
0x2448   :  { %v3598_v23 = vmul.f32 %v6434_v15, %v3338_v48 }
0x24a3   :  { %v3696_v13 = vpop.permute.xlu1 %3695 }
0x24a4   :  { %v3698_v14 = vmul.f32 %v6432_v57, %v3696_v13 }
0x24a6   :  { %3700 = vrot.lane.b32.xlu1 %v3698_v14, %s6841_s24 }
0x24ab   :  { %v3601_v18 = vpop.permute.xlu0 %3600 }
0x24ac   :  { %v3603_v19 = vmul.f32 %v6434_v15, %v3601_v18 }
0x24ae   :  { %3605 = vrot.lane.b32.xlu0 %v3603_v19, %s6838_s30 }
0x2518   :  { %v3701_v21 = vpop.permute.xlu1 %3700 }
0x2519   :  { %v7615_v22 = vadd.f32 %v3701_v21, %v3693_v20 }
0x251b   :  { %6435 = vtanh.f32 %v7615_v22 }
0x2520   :  { %v3606_v24 = vpop.permute.xlu0 %3605 }
0x2521   :  { %v7618_v25 = vadd.f32 %v3606_v24, %v3598_v23 }
0x2523   :  { %6437 = vtanh.f32 %v7618_v25 }
0x2525   :  { %v6436_v26 = vpop.eup %6435 }
0x2526   :  { %3706 = vrot.lane.b32.xlu1 %v6436_v26, %s6841_s24 }
0x252d   :  { %v6438_v27 = vpop.eup %6437 }
0x252e   :  { %3611 = vrot.lane.b32.xlu0 %v6438_v27, %s6838_s30 }
0x2598   :  { %v3707_v28 = vpop.permute.xlu1 %3706 }
0x2599   :  { %v3709_v30 = vmul.f32 %v6432_v57, %v3707_v28 }
0x259b   :  { %3711 = vrot.lane.b32.xlu1 %v3709_v30, %s6842_s25 }
0x25a0   :  { %v3612_v11 = vpop.permute.xlu0 %3611 }
0x25a1   :  { %v3614_v32 = vmul.f32 %v6434_v15, %v3612_v11 }
0x25a3   :  { %v4967_v34 = vrot.slane %v3614_v32, 4  ;;  %3786 = vrot.lane.b32.xlu0 %v3614_v32, %s6839_s9 }
0x25a5   :  { %v7629_v36 = vsel %vm259_vm1, %v4979_v29, %v4967_v34 }
0x260d   :  { %v3712_v35 = vpop.permute.xlu1 %3711 }
0x260e   :  { %5828 = vmatmul.mubr.msk.f32.vlgmr.msra.gmra.mrb[28].mxu1 %vm580_vm4, %v3712_v35  ;;  %5846 = vmatmul.mubr.msk.f32.vlgmr.msra.gmra.mrb[24].mxu0 %vm580_vm4, %v3712_v35 }
0x260f   :  { %6119 = vmatpush3.bf16.msra.mxu1 %v7519_v38  ;;  %5838 = vmatprep.mubr.msk.f32.mxu1 %vm6836_vm0, %v6837_v4 }
0x2610   :  { %6120 = vmatprep.subr.bf16.mxu1 %v6834_v1  ;;  %6128 = vmatpush3.bf16.msra.mxu0 %v7507_v33 }
0x2611   :  { %5852 = vmatprep.mubr.msk.f32.mxu0 %vm6836_vm0, %v6837_v4  ;;  %6129 = vmatprep.subr.bf16.mxu0 %v6834_v1 }
0x2613   :  { %6122 = vmatpush3.bf16.msra.mxu1 %v7530_v43 }
0x2614   :  { %6135 = vmatprep.subr.bf16.mxu1 %v6834_v1 }
0x2615   :  { %v3787_v16 = vpop.permute.xlu0 %3786 }
0x2616   :  { %5839 = vmatmul.mubr.msk.f32.vlgmr.msra.gmra.mrb[28].mxu1 %vm393_vm3, %v3787_v16 }
0x2617   :  { %6137 = vmatpush3.bf16.msra.mxu1 %v7487_v12  ;;  %5870 = vmatprep.mubr.msk.f32.mxu1 %vm6836_vm0, %v6837_v4 }
0x2618   :  { %6138 = vmatprep.subr.bf16.mxu1 %v6834_v1 }
0x26e1   :  { %v3951_v37 = vpop.f32.mrb[24].mxu0 }
0x26e2   :  { %v3955_v40 = vadd.f32 %v3951_v37, %v7499_v17  ;;  %v5847_v41 = vpop.f32.mrb[25].mxu0 }
0x26e4   :  { %6439 = vtanh.f32 %v3955_v40  ;;  %v5264_v48 = vmul.f32 -1.442695, %v3955_v40 }
0x26e9   :  { %v3856_v42 = vpop.f32.mrb[28].mxu1 }
0x26ea   :  { %v6190_v0 = vadd.f32 %v7547_v46, %v3856_v42  ;;  %v5840_v44 = vpop.f32.mrb[29].mxu1 }
0x26ec   :  { %6441 = vtanh.f32 %v6190_v0  ;;  %v5262_v49 = vmul.f32 -1.442695, %v6190_v0 }
0x26ed   :  { %6443 = vpow2.f32 %v5264_v48 }
0x26ee   :  { %v6440_v45 = vpop.eup %6439  ;;  %6445 = vpow2.f32 %v5262_v49 }
0x26ef   :  { %3965 = vrot.lane.b32.xlu1 %v6440_v45, %s6840_s5 }
0x26f6   :  { %v6442_v47 = vpop.eup %6441 }
0x26f7   :  { %3870 = vrot.lane.b32.xlu0 %v6442_v47, %s6838_s30  ;;  %v6444_v50 = vpop.eup %6443 }
0x26f8   :  { %v3959_v51 = vadd.f32 1.0, %v6444_v50  ;;  %v6446_v8 = vpop.eup %6445 }
0x26f9   :  { %v3864_v52 = vadd.f32 1.0, %v6446_v8 }
0x26fa   :  { %6447 = vrcp.f32 %v3959_v51 }
0x26fb   :  { %6449 = vrcp.f32 %v3864_v52 }
0x2704   :  { %v6448_v53 = vpop.eup %6447 }
0x2705   :  { %v6450_v39 = vpop.eup %6449  ;;  %v3963_v60 = vmul.f32 %v6448_v53, %v7615_v22 }
0x2706   :  { %v3868_v63 = vmul.f32 %v6450_v39, %v7618_v25 }
0x2761   :  { %v3966_v54 = vpop.permute.xlu1 %3965 }
0x2762   :  { %v3968_v56 = vmul.f32 %v6448_v53, %v3966_v54 }
0x2764   :  { %3970 = vrot.lane.b32.xlu1 %v3968_v56, %s6841_s24 }
0x2769   :  { %v3871_v58 = vpop.permute.xlu0 %3870 }
0x276a   :  { %v3873_v59 = vmul.f32 %v6450_v39, %v3871_v58 }
0x276c   :  { %3875 = vrot.lane.b32.xlu0 %v3873_v59, %s6838_s30 }
0x27d6   :  { %v3971_v61 = vpop.permute.xlu1 %3970 }
0x27d7   :  { %v7655_v62 = vadd.f32 %v3971_v61, %v3963_v60 }
0x27d9   :  { %6451 = vtanh.f32 %v7655_v62 }
0x27de   :  { %v3876_v55 = vpop.permute.xlu0 %3875 }
0x27df   :  { %v7659_v2 = vadd.f32 %v3876_v55, %v3868_v63 }
0x27e1   :  { %6453 = vtanh.f32 %v7659_v2 }
0x27e3   :  { %v6452_v3 = vpop.eup %6451 }
0x27e4   :  { %3976 = vrot.lane.b32.xlu1 %v6452_v3, %s6841_s24 }
0x27eb   :  { %v6454_v5 = vpop.eup %6453 }
0x27ec   :  { %3881 = vrot.lane.b32.xlu0 %v6454_v5, %s6838_s30 }
0x2856   :  { %v3977_v6 = vpop.permute.xlu1 %3976 }
0x2857   :  { %v3979_v7 = vmul.f32 %v6448_v53, %v3977_v6 }
0x2859   :  { %3981 = vrot.lane.b32.xlu1 %v3979_v7, %s6842_s25 }
0x285e   :  { %v3882_v9 = vpop.permute.xlu0 %3881 }
0x285f   :  { %v3884_v57 = vmul.f32 %v6450_v39, %v3882_v9 }
0x2861   :  { %v4969_v13 = vrot.slane %v3884_v57, 2  ;;  %4056 = vrot.lane.b32.xlu0 %v3884_v57, %s6839_s9 }
0x2863   :  { %v7668_v14 = vsel %vm4981_vm8, %v7629_v36, %v4969_v13 }
0x28cb   :  { %v3982_v15 = vpop.permute.xlu1 %3981 }
0x28cc   :  { %5853 = vmatmul.mubr.msk.f32.vlgmr.msra.gmra.mrb[26].mxu0 %vm580_vm4, %v3982_v15  ;;  %5871 = vmatmul.mubr.msk.f32.vlgmr.msra.gmra.mrb[30].mxu1 %vm580_vm4, %v3982_v15 }
0x28cd   :  { %6131 = vmatpush3.bf16.msra.mxu0 %v7519_v38  ;;  %5863 = vmatprep.mubr.msk.f32.mxu0 %vm6836_vm0, %v6837_v4 }
0x28ce   :  { %6132 = vmatprep.subr.bf16.mxu0 %v6834_v1  ;;  %6140 = vmatpush3.bf16.msra.mxu1 %v7507_v33 }
0x28cf   :  { %5877 = vmatprep.mubr.msk.f32.mxu1 %vm6836_vm0, %v6837_v4  ;;  %6141 = vmatprep.subr.bf16.mxu1 %v6834_v1 }
0x28d1   :  { %6134 = vmatpush3.bf16.msra.mxu0 %v7530_v43 }
0x28d2   :  { %6147 = vmatprep.subr.bf16.mxu0 %v6834_v1 }
0x28d3   :  { %v4057_v18 = vpop.permute.xlu0 %4056 }
0x28d4   :  { %5864 = vmatmul.mubr.msk.f32.vlgmr.msra.gmra.mrb[26].mxu0 %vm393_vm3, %v4057_v18 }
0x28d5   :  { %6149 = vmatpush3.bf16.msra.mxu0 %v7487_v12  ;;  %5895 = vmatprep.mubr.msk.f32.mxu0 %vm6836_vm0, %v6837_v4 }
0x28d6   :  { %6150 = vmatprep.subr.bf16.mxu0 %v6834_v1 }
0x299f   :  { %v4221_v19 = vpop.f32.mrb[30].mxu1 }
0x29a0   :  { %v4225_v20 = vadd.f32 %v4221_v19, %v7499_v17  ;;  %v5872_v21 = vpop.f32.mrb[31].mxu1 }
0x29a2   :  { %6455 = vtanh.f32 %v4225_v20  ;;  %v5269_v27 = vmul.f32 -1.442695, %v4225_v20 }
0x29a7   :  { %v4126_v22 = vpop.f32.mrb[26].mxu0 }
0x29a8   :  { %v6191_v23 = vadd.f32 %v7547_v46, %v4126_v22  ;;  %v5865_v24 = vpop.f32.mrb[27].mxu0 }
0x29aa   :  { %6457 = vtanh.f32 %v6191_v23  ;;  %v5267_v28 = vmul.f32 -1.442695, %v6191_v23 }
0x29ab   :  { %6459 = vpow2.f32 %v5269_v27 }
0x29ac   :  { %v6456_v25 = vpop.eup %6455  ;;  %6461 = vpow2.f32 %v5267_v28 }
0x29ad   :  { %4235 = vrot.lane.b32.xlu1 %v6456_v25, %s6840_s5 }
0x29b4   :  { %v6458_v26 = vpop.eup %6457 }
0x29b5   :  { %4140 = vrot.lane.b32.xlu0 %v6458_v26, %s6838_s30  ;;  %v6460_v30 = vpop.eup %6459 }
0x29b6   :  { %v4229_v31 = vadd.f32 1.0, %v6460_v30  ;;  %v6462_v11 = vpop.eup %6461 }
0x29b7   :  { %v4134_v32 = vadd.f32 1.0, %v6462_v11 }
0x29b8   :  { %6463 = vrcp.f32 %v4229_v31 }
0x29b9   :  { %6465 = vrcp.f32 %v4134_v32 }
0x29c2   :  { %v6464_v34 = vpop.eup %6463 }
0x29c3   :  { %v6466_v35 = vpop.eup %6465  ;;  %v4233_v40 = vmul.f32 %v6464_v34, %v7655_v62 }
0x29c4   :  { %v4138_v0 = vmul.f32 %v6466_v35, %v7659_v2 }
0x2a1f   :  { %v4236_v29 = vpop.permute.xlu1 %4235 }
0x2a20   :  { %v4238_v36 = vmul.f32 %v6464_v34, %v4236_v29 }
0x2a22   :  { %4240 = vrot.lane.b32.xlu1 %v4238_v36, %s6841_s24 }
0x2a27   :  { %v4141_v16 = vpop.permute.xlu0 %4140 }
0x2a28   :  { %v4143_v37 = vmul.f32 %v6466_v35, %v4141_v16 }
0x2a2a   :  { %4145 = vrot.lane.b32.xlu0 %v4143_v37, %s6838_s30 }
0x2a94   :  { %v4241_v41 = vpop.permute.xlu1 %4240 }
0x2a95   :  { %v4243_v42 = vadd.f32 %v4241_v41, %v4233_v40 }
0x2a97   :  { %6467 = vtanh.f32 %v4243_v42 }
0x2a9c   :  { %v4146_v44 = vpop.permute.xlu0 %4145 }
0x2a9d   :  { %v4148_v45 = vadd.f32 %v4146_v44, %v4138_v0 }
0x2a9f   :  { %6469 = vtanh.f32 %v4148_v45 }
0x2aa1   :  { %v6468_v47 = vpop.eup %6467 }
0x2aa2   :  { %4246 = vrot.lane.b32.xlu1 %v6468_v47, %s6841_s24 }
0x2aa9   :  { %v6470_v48 = vpop.eup %6469 }
0x2aaa   :  { %4151 = vrot.lane.b32.xlu0 %v6470_v48, %s6838_s30 }
0x2b14   :  { %v4247_v49 = vpop.permute.xlu1 %4246 }
0x2b15   :  { %v4249_v50 = vmul.f32 %v6464_v34, %v4247_v49 }
0x2b17   :  { %4251 = vrot.lane.b32.xlu1 %v4249_v50, %s6842_s25 }
0x2b1c   :  { %v4152_v51 = vpop.permute.xlu0 %4151 }
0x2b1d   :  { %v7698_v8 = vmul.f32 %v6466_v35, %v4152_v51 }
0x2b1f   :  { %4326 = vrot.lane.b32.xlu0 %v7698_v8, %s6839_s9 }
0x2b89   :  { %v4252_v52 = vpop.permute.xlu1 %4251 }
0x2b8a   :  { %5878 = vmatmul.mubr.msk.f32.vlgmr.msra.gmra.mrb[32].mxu1 %vm580_vm4, %v4252_v52  ;;  %5896 = vmatmul.mubr.msk.f32.vlgmr.msra.gmra.mrb[28].mxu0 %vm580_vm4, %v4252_v52 }
0x2b8b   :  { %6143 = vmatpush3.bf16.msra.mxu1 %v7519_v38  ;;  %5888 = vmatprep.mubr.msk.f32.mxu1 %vm6836_vm0, %v6837_v4 }
0x2b8c   :  { %6144 = vmatprep.subr.bf16.mxu1 %v6834_v1  ;;  %6152 = vmatpush3.bf16.msra.mxu0 %v7507_v33 }
0x2b8d   :  { %5902 = vmatprep.mubr.msk.f32.mxu0 %vm6836_vm0, %v6837_v4  ;;  %6153 = vmatprep.subr.bf16.mxu0 %v6834_v1 }
0x2b8f   :  { %6146 = vmatpush3.bf16.msra.mxu1 %v7530_v43 }
0x2b90   :  { %6159 = vmatprep.subr.bf16.mxu1 %v6834_v1 }
0x2b91   :  { %v4327_v53 = vpop.permute.xlu0 %4326 }
0x2b92   :  { %5889 = vmatmul.mubr.msk.f32.vlgmr.msra.gmra.mrb[32].mxu1 %vm393_vm3, %v4327_v53 }
0x2b93   :  { %6161 = vmatpush3.bf16.msra.mxu1 %v7487_v12  ;;  %5920 = vmatprep.mubr.msk.f32.mxu1 %vm6836_vm0, %v6837_v4 }
0x2b94   :  { %6162 = vmatprep.subr.bf16.mxu1 %v6834_v1 }
0x2c5d   :  { %v4491_v54 = vpop.f32.mrb[28].mxu0 }
0x2c5e   :  { %v4495_v56 = vadd.f32 %v4491_v54, %v7499_v17  ;;  %v5897_v39 = vpop.f32.mrb[29].mxu0 }
0x2c60   :  { %6471 = vtanh.f32 %v4495_v56  ;;  %v5274_v12 = vmul.f32 -1.442695, %v4495_v56 }
0x2c65   :  { %v4396_v58 = vpop.f32.mrb[32].mxu1 }
0x2c66   :  { %v6192_v59 = vadd.f32 %v7547_v46, %v4396_v58  ;;  %v5890_v60 = vpop.f32.mrb[33].mxu1 }
0x2c68   :  { %6473 = vtanh.f32 %v6192_v59  ;;  %v5272_v63 = vmul.f32 -1.442695, %v6192_v59 }
0x2c69   :  { %6475 = vpow2.f32 %v5274_v12 }
0x2c6a   :  { %v6472_v61 = vpop.eup %6471  ;;  %6477 = vpow2.f32 %v5272_v63 }
0x2c6b   :  { %4505 = vrot.lane.b32.xlu1 %v6472_v61, %s6840_s5 }
0x2c72   :  { %v6474_v62 = vpop.eup %6473 }
0x2c73   :  { %4410 = vrot.lane.b32.xlu0 %v6474_v62, %s6838_s30  ;;  %v6476_v55 = vpop.eup %6475 }
0x2c74   :  { %v4499_v2 = vadd.f32 1.0, %v6476_v55  ;;  %v6478_v3 = vpop.eup %6477 }
0x2c75   :  { %v4404_v5 = vadd.f32 1.0, %v6478_v3 }
0x2c76   :  { %6479 = vrcp.f32 %v4499_v2 }
0x2c77   :  { %6481 = vrcp.f32 %v4404_v5 }
0x2c80   :  { %v6480_v6 = vpop.eup %6479 }
0x2c81   :  { %v6482_v57 = vpop.eup %6481  ;;  %v4503_v18 = vmul.f32 %v6480_v6, %v4243_v42 }
0x2c82   :  { %v4408_v21 = vmul.f32 %v6482_v57, %v4148_v45 }
0x2cdd   :  { %v4506_v7 = vpop.permute.xlu1 %4505 }
0x2cde   :  { %v4508_v9 = vmul.f32 %v6480_v6, %v4506_v7 }
0x2ce0   :  { %4510 = vrot.lane.b32.xlu1 %v4508_v9, %s6841_s24 }
0x2ce5   :  { %v4411_v13 = vpop.permute.xlu0 %4410 }
0x2ce6   :  { %v4413_v15 = vmul.f32 %v6482_v57, %v4411_v13 }
0x2ce8   :  { %4415 = vrot.lane.b32.xlu0 %v4413_v15, %s6838_s30 }
0x2d52   :  { %v4511_v19 = vpop.permute.xlu1 %4510 }
0x2d53   :  { %v4513_v20 = vadd.f32 %v4511_v19, %v4503_v18 }
0x2d55   :  { %6483 = vtanh.f32 %v4513_v20 }
0x2d5a   :  { %v4416_v22 = vpop.permute.xlu0 %4415 }
0x2d5b   :  { %v4418_v23 = vadd.f32 %v4416_v22, %v4408_v21  ;;  %v4986_v22 = vld [vmem:[%s7848_s16] sm:$0xff] }
0x2d5d   :  { %6485 = vtanh.f32 %v4418_v23 }
0x2d5f   :  { %v6484_v24 = vpop.eup %6483 }
0x2d60   :  { %4516 = vrot.lane.b32.xlu1 %v6484_v24, %s6841_s24  ;;  %v4988_v24 = vld [vmem:[%s7848_s16 + $0x10] sm:$0xff] }
0x2d67   :  { %v6486_v25 = vpop.eup %6485 }
0x2d68   :  { %4421 = vrot.lane.b32.xlu0 %v6486_v25, %s6838_s30  ;;  %v4989_v25 = vld [vmem:[%s7848_s16 + $0x18] sm:$0xff] }
0x2dd2   :  { %v4517_v26 = vpop.permute.xlu1 %4516 }
0x2dd3   :  { %v4519_v27 = vmul.f32 %v6480_v6, %v4517_v26  ;;  %v6175_v26 = vpack.c.bf16 %v4989_v25, %v4988_v24 }
0x2dd5   :  { %4521 = vrot.lane.b32.xlu1 %v4519_v27, %s6842_s25 }
0x2dda   :  { %v4422_v28 = vpop.permute.xlu0 %4421 }
0x2ddb   :  { %v7728_v30 = vmul.f32 %v6482_v57, %v4422_v28 }
0x2ddd   :  { %4596 = vrot.lane.b32.xlu0 %v7728_v30, %s6839_s9  ;;  %v4971_v12 = vrot.slane %v7728_v30, 6 }
0x2ddf   :  { %v4983_v3 = vsel %vm4978_vm7, %v7698_v8, %v4971_v12 }
0x2e47   :  { %v4522_v31 = vpop.permute.xlu1 %4521 }
0x2e48   :  { %5903 = vmatmul.mubr.msk.f32.vlgmr.msra.gmra.mrb[30].mxu0 %vm580_vm4, %v4522_v31  ;;  %5921 = vmatmul.mubr.msk.f32.vlgmr.msra.gmra.mrb[34].mxu1 %vm580_vm4, %v4522_v31 }
0x2e49   :  { %6155 = vmatpush3.bf16.msra.mxu0 %v7519_v38  ;;  %5913 = vmatprep.mubr.msk.f32.mxu0 %vm6836_vm0, %v6837_v4 }
0x2e4a   :  { %6156 = vmatprep.subr.bf16.mxu0 %v6834_v1  ;;  %6164 = vmatpush3.bf16.msra.mxu1 %v7507_v33 }
0x2e4b   :  { %5927 = vmatprep.mubr.msk.f32.mxu1 %vm6836_vm0, %v6837_v4  ;;  %6165 = vmatprep.subr.bf16.mxu1 %v6834_v1 }
0x2e4d   :  { %6158 = vmatpush3.bf16.msra.mxu0 %v7530_v43 }
0x2e4f   :  { %v4597_v11 = vpop.permute.xlu0 %4596 }
0x2e50   :  { %5914 = vmatmul.mubr.msk.f32.vlgmr.msra.gmra.mrb[30].mxu0 %vm393_vm3, %v4597_v11 }
0x2f1b   :  { %v4761_v32 = vpop.f32.mrb[34].mxu1 }
0x2f1c   :  { %v4765_v34 = vadd.f32 %v4761_v32, %v7499_v17  ;;  %v5922_v29 = vpop.f32.mrb[35].mxu1 }
0x2f1e   :  { %6487 = vtanh.f32 %v4765_v34  ;;  %v5279_v40 = vmul.f32 -1.442695, %v4765_v34 }
0x2f23   :  { %v4666_v36 = vpop.f32.mrb[30].mxu0 }
0x2f24   :  { %v6193_v35 = vadd.f32 %v7547_v46, %v4666_v36  ;;  %v5915_v16 = vpop.f32.mrb[31].mxu0 }
0x2f26   :  { %6489 = vtanh.f32 %v6193_v35  ;;  %v5277_v41 = vmul.f32 -1.442695, %v6193_v35 }
0x2f27   :  { %6491 = vpow2.f32 %v5279_v40 }
0x2f28   :  { %v6488_v33 = vpop.eup %6487  ;;  %6493 = vpow2.f32 %v5277_v41 }
0x2f29   :  { %4775 = vrot.lane.b32.xlu1 %v6488_v33, %s6840_s5 }
0x2f30   :  { %v6490_v37 = vpop.eup %6489 }
0x2f31   :  { %4680 = vrot.lane.b32.xlu0 %v6490_v37, %s6838_s30  ;;  %v6492_v42 = vpop.eup %6491 }
0x2f32   :  { %v4769_v0 = vadd.f32 1.0, %v6492_v42  ;;  %v6494_v17 = vpop.eup %6493 }
0x2f33   :  { %v4674_v44 = vadd.f32 1.0, %v6494_v17 }
0x2f34   :  { %6495 = vrcp.f32 %v4769_v0 }
0x2f35   :  { %6497 = vrcp.f32 %v4674_v44 }
0x2f3e   :  { %v6496_v45 = vpop.eup %6495 }
0x2f3f   :  { %v6498_v49 = vpop.eup %6497  ;;  %v4773_v52 = vmul.f32 %v6496_v45, %v4513_v20 }
0x2f40   :  { %v4678_v56 = vmul.f32 %v6498_v49, %v4418_v23  ;;  %v4987_v23 = vld [vmem:[%s7848_s16 + $0x8] sm:$0xff]  ;;  %s5167_s16 = sshll.u32 %s6844_s20, 4  ;;  %s5168_s16 = int_to_ptr.vmem [resolvable:$true] %s5167_s16 }
0x2f41   :  { %s6761_s23 = scalar_lea.vmem %s5168_s16, 32  ;;  %p6766_p5 = scmp.lt.s32.totalorder %s5168_s16, %s5168_s16 }
0x2f42   :  { %p6762_p4 = scmp.ne.s32.totalorder %s5168_s16, %s6761_s23  ;;  %p6767_p6 = scmp.lt.s32.totalorder %s6761_s23, %s6761_s23 }
0x2f44   :  { %p6768_p7 = por %p6767_p6, %p6766_p5 }
0x2f46   :  { %p6769_p8 = pnand %p6768_p7, %p6762_p4 }
0x2f9b   :  { %v4776_v47 = vpop.permute.xlu1 %4775 }
0x2f9c   :  { %v4778_v48 = vmul.f32 %v6496_v45, %v4776_v47 }
0x2f9e   :  { %4780 = vrot.lane.b32.xlu1 %v4778_v48, %s6841_s24 }
0x2fa3   :  { %v4681_v50 = vpop.permute.xlu0 %4680 }
0x2fa4   :  { %v4683_v51 = vmul.f32 %v6498_v49, %v4681_v50 }
0x2fa6   :  { %4685 = vrot.lane.b32.xlu0 %v4683_v51, %s6838_s30 }
0x3010   :  { %v4781_v53 = vpop.permute.xlu1 %4780 }
0x3011   :  { %v4783_v54 = vadd.f32 %v4781_v53, %v4773_v52 }
0x3013   :  { %6499 = vtanh.f32 %v4783_v54 }
0x3018   :  { %v4686_v39 = vpop.permute.xlu0 %4685 }
0x3019   :  { %v4688_v58 = vadd.f32 %v4686_v39, %v4678_v56 }
0x301b   :  { %6501 = vtanh.f32 %v4688_v58 }
0x301d   :  { %v6500_v59 = vpop.eup %6499 }
0x301e   :  { %4786 = vrot.lane.b32.xlu1 %v6500_v59, %s6841_s24 }
0x3025   :  { %v6502_v60 = vpop.eup %6501 }
0x3026   :  { %4691 = vrot.lane.b32.xlu0 %v6502_v60, %s6838_s30 }
0x3090   :  { %v4787_v61 = vpop.permute.xlu1 %4786 }
0x3091   :  { %v4789_v62 = vmul.f32 %v6496_v45, %v4787_v61 }
0x3093   :  { %4791 = vrot.lane.b32.xlu1 %v4789_v62, %s6842_s25 }
0x3098   :  { %v4692_v63 = vpop.permute.xlu0 %4691 }
0x3099   :  { %v4694_v55 = vmul.f32 %v6498_v49, %v4692_v63 }
0x309b   :  { %v4973_v2 = vrot.slane %v4694_v55, 4  ;;  %4866 = vrot.lane.b32.xlu0 %v4694_v55, %s6839_s9 }
0x309d   :  { %v4984_v5 = vsel %vm259_vm1, %v4983_v3, %v4973_v2 }
0x3105   :  { %v4792_v6 = vpop.permute.xlu1 %4791 }
0x3106   :  { %5928 = vmatmul.mubr.msk.f32.vlgmr.msra.gmra.mrb[36].mxu1 %vm580_vm4, %v4792_v6 }
0x3107   :  { %6167 = vmatpush3.bf16.msra.mxu1 %v7519_v38  ;;  %5938 = vmatprep.mubr.msk.f32.mxu1 %vm6836_vm0, %v6837_v4 }
0x3108   :  { %6168 = vmatprep.subr.bf16.mxu1 %v6834_v1 }
0x310b   :  { %6170 = vmatpush3.bf16.msra.mxu1 %v7530_v43 }
0x310d   :  { %v4867_v7 = vpop.permute.xlu0 %4866 }
0x310e   :  { %5939 = vmatmul.mubr.msk.f32.vlgmr.msra.gmra.mrb[36].mxu1 %vm393_vm3, %v4867_v7 }
0x31e1   :  { %v4936_v9 = vpop.f32.mrb[36].mxu1 }
0x31e2   :  { %v6194_v8 = vadd.f32 %v7547_v46, %v4936_v9  ;;  %v5940_v57 = vpop.f32.mrb[37].mxu1 }
0x31e4   :  { %6503 = vtanh.f32 %v6194_v8  ;;  %v5282_v15 = vmul.f32 -1.442695, %v6194_v8 }
0x31e6   :  { %6505 = vpow2.f32 %v5282_v15 }
0x31ee   :  { %v6504_v13 = vpop.eup %6503 }
0x31ef   :  { %4950 = vrot.lane.b32.xlu1 %v6504_v13, %s6838_s30 }
0x31f0   :  { %v6506_v38 = vpop.eup %6505 }
0x31f1   :  { %v4944_v18 = vadd.f32 1.0, %v6506_v38 }
0x31f3   :  { %6507 = vrcp.f32 %v4944_v18 }
0x31fd   :  { %v6508_v4 = vpop.eup %6507 }
0x31fe   :  { %v4948_v43 = vmul.f32 %v6508_v4, %v4688_v58 }
0x3261   :  { %v4951_v1 = vpop.permute.xlu1 %4950 }
0x3262   :  { %v4953_v19 = vmul.f32 %v6508_v4, %v4951_v1 }
0x3264   :  { %4955 = vrot.lane.b32.xlu0 %v4953_v19, %s6838_s30 }
0x3268   :  { %4999 = vrot.lane.b32.xlu0 %v7668_v14, %s6839_s9  ;;  %v6171_v14 = vpack.c.bf16 %v4987_v23, %v4986_v22 }
0x326a   :  { %6172 = vmatprep.subr.bf16.mxu0 %v6171_v14 }
0x326b   :  { %6174 = vmatpush3.bf16.msra.mxu0 %v6171_v14 }
0x326c   :  { %6176 = vmatprep.subr.bf16.mxu0 %v6175_v26 }
0x326f   :  { %6178 = vmatpush3.bf16.msra.mxu0 %v6175_v26 }
0x32d6   :  { %v4956_v46 = vpop.permute.xlu0 %4955 }
0x32d7   :  { %v4958_v20 = vadd.f32 %v4956_v46, %v4948_v43 }
0x32d9   :  { %6509 = vtanh.f32 %v4958_v20 }
0x32da   :  { %v5000_v21 = vpop.permute.xlu0 %4999 }
0x32db   :  { %5949 = vmatprep.mubr.msk.f32.mxu0 %vm393_vm3, %v5000_v21 }
0x32e3   :  { %v6510_v27 = vpop.eup %6509 }
0x32e4   :  { %4961 = vrot.lane.b32.xlu1 %v6510_v27, %s6838_s30 }
0x3356   :  { %v4962_v28 = vpop.permute.xlu1 %4961 }
0x3357   :  { %v4964_v30 = vmul.f32 %v6508_v4, %v4962_v28 }
0x3359   :  { %v4976_v31 = vrot.slane %v4964_v30, 2 }
0x335b   :  { %v4985_v11 = vsel %vm4981_vm8, %v4984_v5, %v4976_v31 }
0x335c   :  { %5001 = vrot.lane.b32.xlu1 %v4985_v11, %s6839_s9 }
0x33ce   :  { %v5002_v32 = vpop.permute.xlu1 %5001 }
0x33cf   :  { %5950 = vmatmul.mubr.msk.f32.vlgmr.msra.gmra.mrb[32].mxu0 %vm393_vm3, %v5002_v32 }
0x33d0   :  { %6772 = shalt.err (!%p6769_p8)
}
0x33d1   :  { %s6773_s25 = scalar_lea.hbm %s7850_s18, 32 }
0x33d2   :  { %p6774_p9 = scmp.ne.s32.totalorder %s7850_s18, %s6773_s25  ;;  %p6777_p10 = scmp.lt.u32.totalorder %s6773_s25, %s7850_s18 }
0x33d4   :  { %p6779_p11 = pnand %p6777_p10, %p6774_p9 }
0x33d6   :  { %6782 = shalt.err (!%p6779_p11)
}
0x33d7   :  { %5170 = dma.vmem_to_hbm [thread:$0]  %s5168_s16, 32, %s7850_s18, [#allocation4]   ;;  %v5283_v34 = vld [vmem:[%s7849_s17] ss:$0 sm:$0xff]  ;;  %vm5152_vm11 = vcmask 91136  }
0x33d8   :  { %s6845_s17 = smov [#allocation21]  }
0x33d9   :  { %s5176_s18 = sshll.u32 %s6845_s17, 4  ;;  %s5177_s18 = int_to_ptr.vmem [resolvable:$true] %s5176_s18 }
0x33da   :  { %s6783_s7 = scalar_lea.vmem %s5177_s18, 256  ;;  %p6788_p13 = scmp.lt.s32.totalorder %s5177_s18, %s5177_s18 }
0x33db   :  { %p6784_p12 = scmp.ne.s32.totalorder %s5177_s18, %s6783_s7  ;;  %p6789_p0 = scmp.lt.s32.totalorder %s6783_s7, %s6783_s7 }
0x33dd   :  { %p6790_p1 = por %p6789_p0, %p6788_p13 }
0x33df   :  { %p6791_p2 = pnand %p6790_p1, %p6784_p12 }
0x34a2   :  { %v5951_v29 = vpop.f32.mrb[32].mxu0 }
0x34a3   :  { %v5079_v36 = vadd.f32 %v5951_v29, %v5283_v34  ;;  %v5073_v35 = vpop.f32.mrb[33].mxu0 }
0x34a4   :  { %v5074_v16 = vadd.f32 %v5283_v34, %v5073_v35 }
0x34a5   :  { %v5085_v33 = vmul.f32 %v5079_v36, %v5079_v36  ;;  %6511 = vtanh.f32 %v5079_v36  ;;  %vm5083_vm9 = vcmp.gt.f32.partialorder %v5079_v36, 0.0 }
0x34a6   :  { %v5084_v37 = vmul.f32 %v5074_v16, %v5074_v16  ;;  %6513 = vtanh.f32 %v5074_v16  ;;  %vm5082_vm10 = vcmp.gt.f32.partialorder %v5074_v16, 0.0 }
0x34a7   :  { %v5087_v40 = vadd.f32 1.0, %v5085_v33 }
0x34a8   :  { %v5086_v41 = vadd.f32 1.0, %v5084_v37 }
0x34a9   :  { %6515 = vrsqrt.f32 %v5087_v40 }
0x34aa   :  { %6517 = vrsqrt.f32 %v5086_v41 }
0x34af   :  { %v6512_v42 = vpop.eup %6511 }
0x34b0   :  { %v6514_v0 = vpop.eup %6513  ;;  %v5099_v17 = vmul.f32 0.999, %v6512_v42 }
0x34b1   :  { %v5098_v44 = vmul.f32 0.999, %v6514_v0 }
0x34b2   :  { %v5101_v49 = vadd.f32 1.0, %v5099_v17 }
0x34b3   :  { %v6516_v45 = vpop.eup %6515  ;;  %v5100_v51 = vadd.f32 1.0, %v5098_v44 }
0x34b4   :  { %v6518_v47 = vpop.eup %6517  ;;  %v5091_v48 = vmul.f32 %v6516_v45, %v5079_v36  ;;  %v5103_v56 = vmul.f32 0.5, %v5101_v49 }
0x34b5   :  { %v5090_v50 = vmul.f32 %v6518_v47, %v5074_v16  ;;  %v5102_v59 = vmul.f32 0.5, %v5100_v51 }
0x34b6   :  { %v5093_v52 = vsel %vm5083_vm9, %v5079_v36, %v5091_v48 }
0x34b7   :  { %v5095_v53 = vadd.f32 1.005, %v5093_v52  ;;  %v5092_v54 = vsel %vm5082_vm10, %v5074_v16, %v5090_v50 }
0x34b8   :  { %v5094_v39 = vadd.f32 1.005, %v5092_v54 }
0x34b9   :  { %v5105_v58 = vsel %vm254_vm2, %v5079_v36, %v5095_v53 }
0x34ba   :  { %v5107_v60 = vsel %vm2721_vm6, %v5105_v58, %v5103_v56  ;;  %v5104_v61 = vsel %vm254_vm2, %v5074_v16, %v5094_v39 }
0x34bb   :  { %v5127_v62 = vcombine.high %v5107_v60, %v5107_v60  ;;  %v5134_v12 = vrot.slane %v5107_v60, %v7104_v10  ;;  %v5106_v63 = vsel %vm2721_vm6, %v5104_v61, %v5102_v59 }
0x34bc   :  { %v5110_v55 = vcombine.high %v5106_v63, %v5106_v63  ;;  %v5117_v2 = vrot.slane %v5106_v63, %v7104_v10 }
0x34bd   :  { %v5141_v3 = vrot.slane %v5127_v62, %v7104_v10  ;;  %v5142_v5 = vcombine.high %v5134_v12, %v5134_v12  ;;  %5157 = vst.msk [vmem:[#allocation21 + $0x8] sm:$0x3] %vm5152_vm11, %v5134_v12 }
0x34be   :  { %v5124_v6 = vrot.slane %v5110_v55, %v7104_v10  ;;  %v5125_v7 = vcombine.high %v5117_v2, %v5117_v2  ;;  %5153 = vst.msk [vmem:[#allocation21] sm:$0x3] %vm5152_vm11, %v5117_v2 }
0x34bf   :  { %v5143_v9 = vcombine.high %v5141_v3, %v5141_v3  ;;  %5158 = vst.msk [vmem:[#allocation21 + $0xa] sm:$0x3] %vm5152_vm11, %v5142_v5  ;;  %5159 = vst.msk [vmem:[#allocation21 + $0xc] sm:$0x3] %vm5152_vm11, %v5141_v3 }
0x34c0   :  { %v5126_v8 = vcombine.high %v5124_v6, %v5124_v6  ;;  %5154 = vst.msk [vmem:[#allocation21 + $0x2] sm:$0x3] %vm5152_vm11, %v5125_v7  ;;  %5155 = vst.msk [vmem:[#allocation21 + $0x4] sm:$0x3] %vm5152_vm11, %v5124_v6 }
0x34c1   :  { %5160 = vst.msk [vmem:[#allocation21 + $0xe] sm:$0x3] %vm5152_vm11, %v5143_v9 }
0x34c2   :  { %5156 = vst.msk [vmem:[#allocation21 + $0x6] sm:$0x3] %vm5152_vm11, %v5126_v8 }
0x34c3   :  { %6794 = shalt.err (!%p6791_p2)
}
0x34c4   :  { %s7866_s12 = sld [smem:[#allocation35_spill]] }
0x34ca   :  { %s6795_s8 = scalar_lea.hbm %s7866_s12, 256 }
0x34cb   :  { %p6796_p3 = scmp.ne.s32.totalorder %s7866_s12, %s6795_s8  ;;  %p6799_p4 = scmp.lt.u32.totalorder %s6795_s8, %s7866_s12 }
0x34cd   :  { %p6801_p5 = pnand %p6799_p4, %p6796_p3 }
0x34cf   :  { %6804 = shalt.err (!%p6801_p5)
}
0x34d0   :  { %s6846_s0 = smov 2  }
0x34d1   :  { %5182 = dma.vmem_to_hbm [thread:$0]  %s5177_s18, 256, %s7866_s12, [#allocation22], %s6838_s30, %s6838_s30, %s6846_s0  }
0x34d2   :  { %6817 = dma.done.wait [#allocation4], 32  }
0x34d3   :  { %6818 = vsyncadd [#allocation4], 4294967264 }
0x34d4   :  { %6819 = dma.done.wait [#allocation22], 256  }
0x34d5   :  { %6820 = vsyncadd [#allocation22], 4294967040 }
0x34d6   :  { %5189 = vsyncpa [#allocation3], 1 }
0x34d7   :  { %5190 = vsyncpa [#allocation6], 1 }
0x34d8   :  { %5191 = vsyncpa [#allocation9], 1 }
0x34d9   :  { %5192 = vsyncpa [#allocation12], 1 }
0x34da   :  { %5193 = vsyncpa [#allocation15], 1 }
0x34db   :  { %5194 = vsyncpa [#allocation18], 1 }
0x34dc   :  { %5195 = vsyncpa [#allocation4], 1 }
0x34dd   :  { %5196 = vsyncpa [#allocation22], 1 }

</bundles_post_ra>
